<compile_context>
chip_gen: v5e
topology: v5e:2x2
jax: 0.10.0
libtpu: 0.0.40
codegen_flags: <defaults>
</compile_context>

<pallas_src>
import numpy as np
import jax
import jax.numpy as jnp
from jax.experimental import pallas as pl
from jax.experimental.pallas import tpu as pltpu

# ---------------- static model / packing constants ----------------
SR, N_FFT, HOP = 16000, 400, 160
N_MELS = 64                    # real mel channels
MP = 128                       # channel width lane-padded to one full lane tile
HID = 32                       # GRU hidden size
G3 = 3 * HID                   # 96
N_CLASSES = 10
F_REAL = N_FFT // 2 + 1        # 201 rFFT bins
F_PAD = 256                    # lane-padded bins

# bf16 weight-slab row offsets
CW_ROWS = 3 * MP               # 384 rows per conv layer ([prev|center|next] taps)
W_IH_OFF = 3 * CW_ROWS         # 1152
FC2_W_OFF = W_IH_OFF + MP      # 1280
W_ROWS = FC2_W_OFF + HID       # 1312

# f32 slab row offsets
ROW_CONV_B = 0                 # rows 0..2 : conv biases (padded to 128 lanes)
ROW_B_IH, ROW_B_HH = 3, 4
ROW_ATT_W, ROW_ATT_B = 5, 6
ROW_FC2_B, ROW_LMASK = 7, 8
WHH_OFF = 16                   # rows 16..47 : GRU W_hh^T (kept f32, recurrence path)
MEL_OFF = 48                   # rows 48..303: mel filterbank (256 x 128)
BMASK_OFF = MEL_OFF + F_PAD    # 304..       : per-row batch-membership masks


# ----------------------------------------------------------------------------
# Plain-JAX front end: STFT power spectrogram (torchaudio MelSpectrogram half)
# ----------------------------------------------------------------------------
def stft_power(x, n_fft=N_FFT, hop=HOP):
    B, L = x.shape
    pad = n_fft // 2
    xp = jnp.pad(x, ((0, 0), (pad, pad)), mode="reflect")
    num_frames = 1 + L // hop
    starts = jnp.arange(num_frames) * hop
    idx = starts[:, None] + jnp.arange(n_fft)[None, :]
    frames = xp[:, idx]                                         # (B, T, n_fft)
    n = jnp.arange(n_fft, dtype=jnp.float32)
    win = 0.5 - 0.5 * jnp.cos(2.0 * jnp.pi * n / n_fft)         # periodic hann
    spec = jnp.fft.rfft(frames * win[None, None, :], axis=-1)
    return (jnp.abs(spec) ** 2).astype(jnp.float32)             # (B, T, 201)


def make_mel_fb(sr=SR, n_fft=N_FFT, n_mels=N_MELS):
    """torchaudio HTK mel filterbank, (n_freqs, n_mels)."""
    n_freqs = n_fft // 2 + 1
    all_freqs = np.linspace(0.0, sr / 2.0, n_freqs)
    hz_to_mel = lambda fq: 2595.0 * np.log10(1.0 + fq / 700.0)
    mel_to_hz = lambda m: 700.0 * (10.0 ** (m / 2595.0) - 1.0)
    m_pts = np.linspace(hz_to_mel(0.0), hz_to_mel(sr / 2.0), n_mels + 2)
    f_pts = mel_to_hz(m_pts)
    f_diff = f_pts[1:] - f_pts[:-1]
    slopes = f_pts[None, :] - all_freqs[:, None]
    down = -slopes[:, :-2] / f_diff[:-1]
    up = slopes[:, 2:] / f_diff[1:]
    return np.maximum(0.0, np.minimum(down, up)).astype(np.float32)


# ----------------------------------------------------------------------------
# The fused kernel (one grid step = one batch shard, fully batched inside)
# ----------------------------------------------------------------------------
def make_kernel(T, Bb):
    BT = T * Bb

    def _sum_all(v):  # (R, 128) -> (1, 1)
        return jnp.sum(jnp.sum(v, axis=1, keepdims=True), axis=0, keepdims=True)

    def kernel(pwr_ref, w_ref, f_ref, o_ref, y_ref):
        # ---- mel projection: one batched (B*T, 256) @ (256, 128) f32 matmul ----
        x = pwr_ref[...]                                        # (BT, F_PAD)
        fb = f_ref[MEL_OFF:MEL_OFF + F_PAD, :]                  # (F_PAD, 128)
        mel = jnp.dot(x, fb, preferred_element_type=jnp.float32)
        db = 10.0 * jnp.log10(jnp.maximum(mel, 1e-10))          # AmplitudeToDB(power)

        # ---- per-sample mean / (unbiased std + 1e-5) normalization ----
        lmask = f_ref[ROW_LMASK:ROW_LMASK + 1, :]               # 1.0 on real mel lanes
        n = float(T * N_MELS)
        feat = jnp.zeros_like(db)
        for b in range(Bb):                                     # Bb is small & static
            mb = f_ref[BMASK_OFF:BMASK_OFF + BT, b:b + 1]       # rows of sample b
            valid = mb * lmask                                  # (BT, 128)
            mean = _sum_all(db * valid) * (1.0 / n)
            diff = (db - mean) * valid
            var = _sum_all(diff * diff) * (1.0 / (n - 1.0))
            inv = 1.0 / (jnp.sqrt(var) + 1e-5)                  # exact; PyTorch eps on std
            feat = feat + valid * (db - mean) * inv

        # ---- simplified MatchboxNetSkip: 3x Conv1d(k=3,pad=1)+ReLU, one skip ----
        def conv_layer(xin, layer, residual=None):
            zero = jnp.zeros((Bb, MP), jnp.float32)
            prev = jnp.concatenate([zero, xin[:BT - Bb, :]], axis=0)   # x_{t-1}
            nxt = jnp.concatenate([xin[Bb:, :], zero], axis=0)         # x_{t+1}
            cat = jnp.concatenate([prev, xin, nxt], axis=1)            # (BT, 384)
            w = w_ref[layer * CW_ROWS:(layer + 1) * CW_ROWS, :]        # (384, 128) bf16
            acc = jnp.dot(cat.astype(jnp.bfloat16), w,
                          preferred_element_type=jnp.float32)
            acc = acc + f_ref[ROW_CONV_B + layer:ROW_CONV_B + layer + 1, :]
            if residual is not None:
                acc = acc + residual
            return jnp.maximum(acc, 0.0)

        h1 = conv_layer(feat, 0)
        h2 = conv_layer(h1, 1)
        h3 = conv_layer(h2, 2, residual=h1)                     # (BT, 128)

        # ---- GRU input projection, batched over all B*T rows ----
        w_ih = w_ref[W_IH_OFF:W_IH_OFF + MP, 0:G3]              # (128, 96) bf16
        gx = jnp.dot(h3.astype(jnp.bfloat16), w_ih,
                     preferred_element_type=jnp.float32)
        gx = gx + f_ref[ROW_B_IH:ROW_B_IH + 1, 0:G3]            # (BT, 96)

        whh = f_ref[WHH_OFF:WHH_OFF + HID, 0:G3]                # (32, 96) f32
        b_hh = f_ref[ROW_B_HH:ROW_B_HH + 1, 0:G3]               # (1, 96)

        # ---- GRU recurrence (PyTorch gate order r,z,n), state (Bb, H) ----
        h = jnp.zeros((Bb, HID), jnp.float32)
        for t in range(T):                                      # static unroll (T=21)
            gxt = gx[t * Bb:(t + 1) * Bb, :]                    # contiguous time-major slice
            gh = jnp.dot(h, whh, preferred_element_type=jnp.float32) + b_hh
            r = jax.nn.sigmoid(gxt[:, 0:HID] + gh[:, 0:HID])
            z = jax.nn.sigmoid(gxt[:, HID:2 * HID] + gh[:, HID:2 * HID])
            cand = jnp.tanh(gxt[:, 2 * HID:] + r * gh[:, 2 * HID:])
            h = (1.0 - z) * cand + z * h
            y_ref[t * Bb:(t + 1) * Bb, :] = h                   # stash y_t (off critical path)

        # ---- attention pooling: Linear(H->1) + softmax over time, per sample ----
        y = y_ref[...]                                          # (BT, 32)
        att_w = f_ref[ROW_ATT_W:ROW_ATT_W + 1, 0:HID]           # (1, 32)
        att_b = f_ref[ROW_ATT_B:ROW_ATT_B + 1, 0:1]             # (1, 1)
        scores = jnp.sum(y * att_w, axis=1, keepdims=True) + att_b    # (BT, 1)
        ctx_rows = []
        for b in range(Bb):
            mb = f_ref[BMASK_OFF:BMASK_OFF + BT, b:b + 1]       # (BT, 1)
            s_b = scores + (mb - 1.0) * 1e30                    # mask other samples' rows
            m_b = jnp.max(s_b, axis=0, keepdims=True)
            e_b = jnp.exp(s_b - m_b) * mb
            den = jnp.sum(e_b, axis=0, keepdims=True)
            ctx_rows.append(jnp.sum(e_b * y, axis=0, keepdims=True) / den)   # (1, H)
        ctx = ctx_rows[0] if Bb == 1 else jnp.concatenate(ctx_rows, axis=0)  # (Bb, H)

        # ---- dropout (identity in eval) + fc2; lane-dense (Bb, 128) output ----
        fc2_w = w_ref[FC2_W_OFF:FC2_W_OFF + HID, :]             # (32, 128) bf16
        fc2_b = f_ref[ROW_FC2_B:ROW_FC2_B + 1, :]               # (1, 128)
        o_ref[...] = (jnp.dot(ctx.astype(jnp.bfloat16), fc2_w,
                              preferred_element_type=jnp.float32) + fc2_b)

    return kernel


def phi_gru_pallas(power_tm, wslab, fslab, *, T, Bb, num_shards):
    BT = T * Bb
    out = pl.pallas_call(
        make_kernel(T, Bb),
        grid=(num_shards,),
        in_specs=[
            pl.BlockSpec((None, BT, F_PAD), lambda i: (i, 0, 0)),   # per-shard power rows
            pl.BlockSpec(wslab.shape, lambda i: (0, 0)),            # bf16 weight slab
            pl.BlockSpec(fslab.shape, lambda i: (0, 0)),            # f32 param slab
        ],
        out_specs=pl.BlockSpec((None, Bb, 128), lambda i: (i, 0, 0)),
        out_shape=jax.ShapeDtypeStruct((num_shards, Bb, 128), jnp.float32),
        scratch_shapes=[pltpu.VMEM((BT, HID), jnp.float32)],         # y_t stash
        compiler_params=pltpu.CompilerParams(
            dimension_semantics=("parallel",)),
    )(power_tm, wslab, fslab)
    return out.reshape(num_shards * Bb, 128)[:, :N_CLASSES]


def forward(x_audio, wslab, fslab, num_shards):
    B, _ = x_audio.shape
    Bb = B // num_shards
    power = stft_power(x_audio)                                  # (B, T, 201) plain-JAX rFFT
    T = power.shape[1]
    power = jnp.pad(power, ((0, 0), (0, 0), (0, F_PAD - power.shape[2])))
    ptm = (power.reshape(num_shards, Bb, T, F_PAD)
                 .transpose(0, 2, 1, 3)                          # time-major rows per shard
                 .reshape(num_shards, T * Bb, F_PAD))
    return phi_gru_pallas(ptm, wslab, fslab, T=T, Bb=Bb, num_shards=num_shards)


# ----------------------------------------------------------------------------
# Parameters: canonical init + host-side packing into the two slabs
# ----------------------------------------------------------------------------
def init_params(key, n_mels=N_MELS, hidden=HID, num_classes=N_CLASSES):
    ks = jax.random.split(key, 12)
    g = lambda k, shape, s=0.1: (s * jax.random.normal(k, shape)).astype(jnp.float32)
    return {
        "conv_w": [g(ks[0], (64, n_mels, 3)), g(ks[1], (64, 64, 3)), g(ks[2], (64, 64, 3))],
        "conv_b": [g(ks[3], (64,)), g(ks[4], (64,)), g(ks[5], (64,))],
        "gru_w_ih": g(ks[6], (3 * hidden, 64)),
        "gru_b_ih": jnp.zeros((3 * hidden,), jnp.float32),       # _init_weights: zero GRU bias
        "gru_w_hh": g(ks[7], (3 * hidden, hidden)),
        "gru_b_hh": jnp.zeros((3 * hidden,), jnp.float32),
        "att_w": g(ks[8], (1, hidden)),
        "att_b": g(ks[9], (1,)),
        "fc2_w": g(ks[10], (num_classes, hidden)),
        "fc2_b": g(ks[11], (num_classes,)),
    }


def pack_params(p, T, Bb):
    BT = T * Bb
    # --- bf16 matmul-weight slab ---
    w = np.zeros((W_ROWS, 128), np.float32)
    for l in range(3):
        cw = np.asarray(p["conv_w"][l])                          # (out, in, 3) PyTorch layout
        for k in range(3):                                       # k=0: x_{t-1}, 1: x_t, 2: x_{t+1}
            blk = cw[:, :, k].T                                  # (in, out)
            r0 = l * CW_ROWS + k * MP
            w[r0:r0 + blk.shape[0], :blk.shape[1]] = blk
    w[W_IH_OFF:W_IH_OFF + N_MELS, :G3] = np.asarray(p["gru_w_ih"]).T
    w[FC2_W_OFF:FC2_W_OFF + HID, :N_CLASSES] = np.asarray(p["fc2_w"]).T
    wslab = jnp.asarray(w, dtype=jnp.bfloat16)

    # --- f32 slab: biases, attention, W_hh, mel filterbank, row masks ---
    frows = ((BMASK_OFF + BT + 7) // 8) * 8
    f = np.zeros((frows, 128), np.float32)
    for l in range(3):
        f[ROW_CONV_B + l, :N_MELS] = np.asarray(p["conv_b"][l])
    f[ROW_B_IH, :G3] = np.asarray(p["gru_b_ih"])
    f[ROW_B_HH, :G3] = np.asarray(p["gru_b_hh"])
    f[ROW_ATT_W, :HID] = np.asarray(p["att_w"]).reshape(-1)
    f[ROW_ATT_B, 0] = float(np.asarray(p["att_b"]).reshape(-1)[0])
    f[ROW_FC2_B, :N_CLASSES] = np.asarray(p["fc2_b"])
    f[ROW_LMASK, :N_MELS] = 1.0                                  # real-mel-lane mask
    f[WHH_OFF:WHH_OFF + HID, :G3] = np.asarray(p["gru_w_hh"]).T
    f[MEL_OFF:MEL_OFF + F_REAL, :N_MELS] = make_mel_fb()
    r = np.arange(BT)
    f[BMASK_OFF:BMASK_OFF + BT, :Bb] = (
        r[:, None] % Bb == np.arange(Bb)[None, :]).astype(np.float32)
    return wslab, jnp.asarray(f)


if __name__ == "__main__":
    B, L = 4, 3200                       # 0.2 s of 16 kHz audio -> T = 21 frames
    x_audio = jax.random.normal(jax.random.PRNGKey(0), (B, L), dtype=jnp.float32)
    params = init_params(jax.random.PRNGKey(42))
    num_shards = 2 if B % 2 == 0 else 1  # 2 parallel grid steps keep both v7x TCs busy
    T = 1 + L // HOP
    wslab, fslab = pack_params(params, T=T, Bb=B // num_shards)
    fwd = jax.jit(forward, static_argnames=("num_shards",))
    logits = fwd(x_audio, wslab, fslab, num_shards=num_shards)
    jax.block_until_ready(logits)
    assert logits.shape == (B, N_CLASSES) and logits.dtype == jnp.float32
    assert bool(jnp.all(jnp.isfinite(logits)))
    print("KERNEL_OK")
</pallas_src>

<mosaic_0001>
module attributes {stable_mosaic.version = 11 : i64} {
  func.func @kernel(%arg0: i32, %arg1: memref<1x42x256xf32, #tpu.memory_space<vmem>>, %arg2: memref<1312x128xbf16, #tpu.memory_space<vmem>>, %arg3: memref<352x128xf32, #tpu.memory_space<vmem>>, %arg4: memref<1x2x128xf32, #tpu.memory_space<vmem>>, %arg5: memref<42x32xf32, #tpu.memory_space<vmem>>) attributes {dimension_semantics = [#tpu.dimension_semantics<parallel>], iteration_bounds = array<i64: 2>, scalar_prefetch = 0 : i64, scratch_operands = 1 : i64, tpu.core_type = #tpu.core_type<tc>, window_params = [{transform_indices = @transform_0, window_bounds = array<i64: 1, 42, 256>}, {pipeline_mode = #tpu.pipeline_mode<synchronous>, transform_indices = @transform_1, window_bounds = array<i64: 1312, 128>}, {pipeline_mode = #tpu.pipeline_mode<synchronous>, transform_indices = @transform_2, window_bounds = array<i64: 352, 128>}, {transform_indices = @transform_3, window_bounds = array<i64: 1, 2, 128>}]} {
    %c0 = arith.constant 0 : index
    %c0_0 = arith.constant 0 : index
    %c0_1 = arith.constant 0 : index
    %0 = vector.load %arg1[%c0, %c0_0, %c0_1] : memref<1x42x256xf32, #tpu.memory_space<vmem>>, vector<1x42x256xf32>
    %1 = vector.shape_cast %0 : vector<1x42x256xf32> to vector<42x256xf32>
    %c48 = arith.constant 48 : index
    %c0_2 = arith.constant 0 : index
    %2 = vector.load %arg3[%c48, %c0_2] : memref<352x128xf32, #tpu.memory_space<vmem>>, vector<256x128xf32>
    %cst = arith.constant dense<0.000000e+00> : vector<42x128xf32>
    %3 = tpu.matmul %1, %2, %cst {dimension_numbers = #tpu.dot_dimension_numbers<[1], [0], [0], [1], [0, 0, 1, 1], [], []>} : vector<42x256xf32>, vector<256x128xf32>, vector<42x128xf32> -> vector<42x128xf32>
    %cst_3 = arith.constant 1.000000e-10 : f32
    %4 = vector.broadcast %cst_3 : f32 to vector<42x128xf32>
    %5 = arith.maximumf %3, %4 : vector<42x128xf32>
    %6 = math.log %5 : vector<42x128xf32>
    %cst_4 = arith.constant 0.434294492 : f32
    %7 = vector.broadcast %cst_4 : f32 to vector<42x128xf32>
    %8 = arith.mulf %6, %7 : vector<42x128xf32>
    %cst_5 = arith.constant 1.000000e+01 : f32
    %9 = vector.broadcast %cst_5 : f32 to vector<42x128xf32>
    %10 = arith.mulf %9, %8 : vector<42x128xf32>
    %c8 = arith.constant 8 : index
    %c0_6 = arith.constant 0 : index
    %11 = vector.load %arg3[%c8, %c0_6] : memref<352x128xf32, #tpu.memory_space<vmem>>, vector<1x128xf32>
    %cst_7 = arith.constant 0.000000e+00 : f32
    %12 = vector.broadcast %cst_7 : f32 to vector<42x128xf32>
    %c304 = arith.constant 304 : index
    %c0_8 = arith.constant 0 : index
    %13 = vector.load %arg3[%c304, %c0_8] : memref<352x128xf32, #tpu.memory_space<vmem>>, vector<42x1xf32>
    %14 = vector.broadcast %13 : vector<42x1xf32> to vector<42x128xf32>
    %15 = vector.broadcast %11 : vector<1x128xf32> to vector<42x128xf32>
    %16 = arith.mulf %14, %15 : vector<42x128xf32>
    %17 = arith.mulf %10, %16 : vector<42x128xf32>
    %cst_9 = arith.constant dense<0.000000e+00> : vector<42xf32>
    %18 = vector.multi_reduction <add>, %17, %cst_9 [1] : vector<42x128xf32> to vector<42xf32>
    %19 = vector.shape_cast %18 : vector<42xf32> to vector<42x1xf32>
    %cst_10 = arith.constant dense<0.000000e+00> : vector<1xf32>
    %20 = vector.multi_reduction <add>, %19, %cst_10 [0] : vector<42x1xf32> to vector<1xf32>
    %21 = vector.shape_cast %20 : vector<1xf32> to vector<1x1xf32>
    %cst_11 = arith.constant 7.44047633E-4 : f32
    %22 = vector.broadcast %cst_11 : f32 to vector<1x1xf32>
    %23 = arith.mulf %21, %22 : vector<1x1xf32>
    %24 = vector.broadcast %23 : vector<1x1xf32> to vector<42x128xf32>
    %25 = arith.subf %10, %24 : vector<42x128xf32>
    %26 = arith.mulf %25, %16 : vector<42x128xf32>
    %27 = arith.mulf %26, %26 : vector<42x128xf32>
    %cst_12 = arith.constant dense<0.000000e+00> : vector<42xf32>
    %28 = vector.multi_reduction <add>, %27, %cst_12 [1] : vector<42x128xf32> to vector<42xf32>
    %29 = vector.shape_cast %28 : vector<42xf32> to vector<42x1xf32>
    %cst_13 = arith.constant dense<0.000000e+00> : vector<1xf32>
    %30 = vector.multi_reduction <add>, %29, %cst_13 [0] : vector<42x1xf32> to vector<1xf32>
    %31 = vector.shape_cast %30 : vector<1xf32> to vector<1x1xf32>
    %cst_14 = arith.constant 7.44601653E-4 : f32
    %32 = vector.broadcast %cst_14 : f32 to vector<1x1xf32>
    %33 = arith.mulf %31, %32 : vector<1x1xf32>
    %34 = math.sqrt %33 : vector<1x1xf32>
    %cst_15 = arith.constant 9.99999974E-6 : f32
    %35 = vector.broadcast %cst_15 : f32 to vector<1x1xf32>
    %36 = arith.addf %34, %35 : vector<1x1xf32>
    %cst_16 = arith.constant 1.000000e+00 : f32
    %37 = vector.broadcast %cst_16 : f32 to vector<1x1xf32>
    %38 = arith.divf %37, %36 : vector<1x1xf32>
    %39 = vector.broadcast %23 : vector<1x1xf32> to vector<42x128xf32>
    %40 = arith.subf %10, %39 : vector<42x128xf32>
    %41 = arith.mulf %16, %40 : vector<42x128xf32>
    %42 = vector.broadcast %38 : vector<1x1xf32> to vector<42x128xf32>
    %43 = arith.mulf %41, %42 : vector<42x128xf32>
    %44 = arith.addf %12, %43 : vector<42x128xf32>
    %c304_17 = arith.constant 304 : index
    %c1 = arith.constant 1 : index
    %45 = vector.load %arg3[%c304_17, %c1] : memref<352x128xf32, #tpu.memory_space<vmem>>, vector<42x1xf32>
    %46 = vector.broadcast %45 : vector<42x1xf32> to vector<42x128xf32>
    %47 = vector.broadcast %11 : vector<1x128xf32> to vector<42x128xf32>
    %48 = arith.mulf %46, %47 : vector<42x128xf32>
    %49 = arith.mulf %10, %48 : vector<42x128xf32>
    %cst_18 = arith.constant dense<0.000000e+00> : vector<42xf32>
    %50 = vector.multi_reduction <add>, %49, %cst_18 [1] : vector<42x128xf32> to vector<42xf32>
    %51 = vector.shape_cast %50 : vector<42xf32> to vector<42x1xf32>
    %cst_19 = arith.constant dense<0.000000e+00> : vector<1xf32>
    %52 = vector.multi_reduction <add>, %51, %cst_19 [0] : vector<42x1xf32> to vector<1xf32>
    %53 = vector.shape_cast %52 : vector<1xf32> to vector<1x1xf32>
    %cst_20 = arith.constant 7.44047633E-4 : f32
    %54 = vector.broadcast %cst_20 : f32 to vector<1x1xf32>
    %55 = arith.mulf %53, %54 : vector<1x1xf32>
    %56 = vector.broadcast %55 : vector<1x1xf32> to vector<42x128xf32>
    %57 = arith.subf %10, %56 : vector<42x128xf32>
    %58 = arith.mulf %57, %48 : vector<42x128xf32>
    %59 = arith.mulf %58, %58 : vector<42x128xf32>
    %cst_21 = arith.constant dense<0.000000e+00> : vector<42xf32>
    %60 = vector.multi_reduction <add>, %59, %cst_21 [1] : vector<42x128xf32> to vector<42xf32>
    %61 = vector.shape_cast %60 : vector<42xf32> to vector<42x1xf32>
    %cst_22 = arith.constant dense<0.000000e+00> : vector<1xf32>
    %62 = vector.multi_reduction <add>, %61, %cst_22 [0] : vector<42x1xf32> to vector<1xf32>
    %63 = vector.shape_cast %62 : vector<1xf32> to vector<1x1xf32>
    %cst_23 = arith.constant 7.44601653E-4 : f32
    %64 = vector.broadcast %cst_23 : f32 to vector<1x1xf32>
    %65 = arith.mulf %63, %64 : vector<1x1xf32>
    %66 = math.sqrt %65 : vector<1x1xf32>
    %cst_24 = arith.constant 9.99999974E-6 : f32
    %67 = vector.broadcast %cst_24 : f32 to vector<1x1xf32>
    %68 = arith.addf %66, %67 : vector<1x1xf32>
    %cst_25 = arith.constant 1.000000e+00 : f32
    %69 = vector.broadcast %cst_25 : f32 to vector<1x1xf32>
    %70 = arith.divf %69, %68 : vector<1x1xf32>
    %71 = vector.broadcast %55 : vector<1x1xf32> to vector<42x128xf32>
    %72 = arith.subf %10, %71 : vector<42x128xf32>
    %73 = arith.mulf %48, %72 : vector<42x128xf32>
    %74 = vector.broadcast %70 : vector<1x1xf32> to vector<42x128xf32>
    %75 = arith.mulf %73, %74 : vector<42x128xf32>
    %76 = arith.addf %44, %75 : vector<42x128xf32>
    %cst_26 = arith.constant 0.000000e+00 : f32
    %77 = vector.broadcast %cst_26 : f32 to vector<2x128xf32>
    %78 = vector.extract_strided_slice %76 {offsets = [0, 0], sizes = [40, 128], strides = [1, 1]} : vector<42x128xf32> to vector<40x128xf32>
    %79 = tpu.concatenate %77, %78 in 0 : vector<2x128xf32>, vector<40x128xf32> -> vector<42x128xf32>
    %80 = vector.extract_strided_slice %76 {offsets = [2, 0], sizes = [40, 128], strides = [1, 1]} : vector<42x128xf32> to vector<40x128xf32>
    %81 = tpu.concatenate %80, %77 in 0 : vector<40x128xf32>, vector<2x128xf32> -> vector<42x128xf32>
    %82 = tpu.concatenate %79, %76, %81 in 1 : vector<42x128xf32>, vector<42x128xf32>, vector<42x128xf32> -> vector<42x384xf32>
    %c0_27 = arith.constant 0 : index
    %c0_28 = arith.constant 0 : index
    %83 = vector.load %arg2[%c0_27, %c0_28] : memref<1312x128xbf16, #tpu.memory_space<vmem>>, vector<384x128xbf16>
    %84 = arith.truncf %82 : vector<42x384xf32> to vector<42x384xbf16>
    %cst_29 = arith.constant dense<0.000000e+00> : vector<42x128xf32>
    %85 = tpu.matmul %84, %83, %cst_29 {dimension_numbers = #tpu.dot_dimension_numbers<[1], [0], [0], [1], [0, 0, 1, 1], [], []>} : vector<42x384xbf16>, vector<384x128xbf16>, vector<42x128xf32> -> vector<42x128xf32>
    %c0_30 = arith.constant 0 : index
    %c0_31 = arith.constant 0 : index
    %86 = vector.load %arg3[%c0_30, %c0_31] : memref<352x128xf32, #tpu.memory_space<vmem>>, vector<1x128xf32>
    %87 = vector.broadcast %86 : vector<1x128xf32> to vector<42x128xf32>
    %88 = arith.addf %85, %87 : vector<42x128xf32>
    %cst_32 = arith.constant 0.000000e+00 : f32
    %89 = vector.broadcast %cst_32 : f32 to vector<42x128xf32>
    %90 = arith.maximumf %88, %89 : vector<42x128xf32>
    %cst_33 = arith.constant 0.000000e+00 : f32
    %91 = vector.broadcast %cst_33 : f32 to vector<2x128xf32>
    %92 = vector.extract_strided_slice %90 {offsets = [0, 0], sizes = [40, 128], strides = [1, 1]} : vector<42x128xf32> to vector<40x128xf32>
    %93 = tpu.concatenate %91, %92 in 0 : vector<2x128xf32>, vector<40x128xf32> -> vector<42x128xf32>
    %94 = vector.extract_strided_slice %90 {offsets = [2, 0], sizes = [40, 128], strides = [1, 1]} : vector<42x128xf32> to vector<40x128xf32>
    %95 = tpu.concatenate %94, %91 in 0 : vector<40x128xf32>, vector<2x128xf32> -> vector<42x128xf32>
    %96 = tpu.concatenate %93, %90, %95 in 1 : vector<42x128xf32>, vector<42x128xf32>, vector<42x128xf32> -> vector<42x384xf32>
    %c384 = arith.constant 384 : index
    %c0_34 = arith.constant 0 : index
    %97 = vector.load %arg2[%c384, %c0_34] : memref<1312x128xbf16, #tpu.memory_space<vmem>>, vector<384x128xbf16>
    %98 = arith.truncf %96 : vector<42x384xf32> to vector<42x384xbf16>
    %cst_35 = arith.constant dense<0.000000e+00> : vector<42x128xf32>
    %99 = tpu.matmul %98, %97, %cst_35 {dimension_numbers = #tpu.dot_dimension_numbers<[1], [0], [0], [1], [0, 0, 1, 1], [], []>} : vector<42x384xbf16>, vector<384x128xbf16>, vector<42x128xf32> -> vector<42x128xf32>
    %c1_36 = arith.constant 1 : index
    %c0_37 = arith.constant 0 : index
    %100 = vector.load %arg3[%c1_36, %c0_37] : memref<352x128xf32, #tpu.memory_space<vmem>>, vector<1x128xf32>
    %101 = vector.broadcast %100 : vector<1x128xf32> to vector<42x128xf32>
    %102 = arith.addf %99, %101 : vector<42x128xf32>
    %cst_38 = arith.constant 0.000000e+00 : f32
    %103 = vector.broadcast %cst_38 : f32 to vector<42x128xf32>
    %104 = arith.maximumf %102, %103 : vector<42x128xf32>
    %cst_39 = arith.constant 0.000000e+00 : f32
    %105 = vector.broadcast %cst_39 : f32 to vector<2x128xf32>
    %106 = vector.extract_strided_slice %104 {offsets = [0, 0], sizes = [40, 128], strides = [1, 1]} : vector<42x128xf32> to vector<40x128xf32>
    %107 = tpu.concatenate %105, %106 in 0 : vector<2x128xf32>, vector<40x128xf32> -> vector<42x128xf32>
    %108 = vector.extract_strided_slice %104 {offsets = [2, 0], sizes = [40, 128], strides = [1, 1]} : vector<42x128xf32> to vector<40x128xf32>
    %109 = tpu.concatenate %108, %105 in 0 : vector<40x128xf32>, vector<2x128xf32> -> vector<42x128xf32>
    %110 = tpu.concatenate %107, %104, %109 in 1 : vector<42x128xf32>, vector<42x128xf32>, vector<42x128xf32> -> vector<42x384xf32>
    %c768 = arith.constant 768 : index
    %c0_40 = arith.constant 0 : index
    %111 = vector.load %arg2[%c768, %c0_40] : memref<1312x128xbf16, #tpu.memory_space<vmem>>, vector<384x128xbf16>
    %112 = arith.truncf %110 : vector<42x384xf32> to vector<42x384xbf16>
    %cst_41 = arith.constant dense<0.000000e+00> : vector<42x128xf32>
    %113 = tpu.matmul %112, %111, %cst_41 {dimension_numbers = #tpu.dot_dimension_numbers<[1], [0], [0], [1], [0, 0, 1, 1], [], []>} : vector<42x384xbf16>, vector<384x128xbf16>, vector<42x128xf32> -> vector<42x128xf32>
    %c2 = arith.constant 2 : index
    %c0_42 = arith.constant 0 : index
    %114 = vector.load %arg3[%c2, %c0_42] : memref<352x128xf32, #tpu.memory_space<vmem>>, vector<1x128xf32>
    %115 = vector.broadcast %114 : vector<1x128xf32> to vector<42x128xf32>
    %116 = arith.addf %113, %115 : vector<42x128xf32>
    %117 = arith.addf %116, %90 : vector<42x128xf32>
    %cst_43 = arith.constant 0.000000e+00 : f32
    %118 = vector.broadcast %cst_43 : f32 to vector<42x128xf32>
    %119 = arith.maximumf %117, %118 : vector<42x128xf32>
    %c1152 = arith.constant 1152 : index
    %c0_44 = arith.constant 0 : index
    %120 = vector.load %arg2[%c1152, %c0_44] : memref<1312x128xbf16, #tpu.memory_space<vmem>>, vector<128x96xbf16>
    %121 = arith.truncf %119 : vector<42x128xf32> to vector<42x128xbf16>
    %cst_45 = arith.constant dense<0.000000e+00> : vector<42x96xf32>
    %122 = tpu.matmul %121, %120, %cst_45 {dimension_numbers = #tpu.dot_dimension_numbers<[1], [0], [0], [1], [0, 0, 1, 1], [], []>} : vector<42x128xbf16>, vector<128x96xbf16>, vector<42x96xf32> -> vector<42x96xf32>
    %c3 = arith.constant 3 : index
    %c0_46 = arith.constant 0 : index
    %123 = vector.load %arg3[%c3, %c0_46] : memref<352x128xf32, #tpu.memory_space<vmem>>, vector<1x96xf32>
    %124 = vector.broadcast %123 : vector<1x96xf32> to vector<42x96xf32>
    %125 = arith.addf %122, %124 : vector<42x96xf32>
    %c16 = arith.constant 16 : index
    %c0_47 = arith.constant 0 : index
    %126 = vector.load %arg3[%c16, %c0_47] : memref<352x128xf32, #tpu.memory_space<vmem>>, vector<32x96xf32>
    %c4 = arith.constant 4 : index
    %c0_48 = arith.constant 0 : index
    %127 = vector.load %arg3[%c4, %c0_48] : memref<352x128xf32, #tpu.memory_space<vmem>>, vector<1x96xf32>
    %cst_49 = arith.constant 0.000000e+00 : f32
    %128 = vector.broadcast %cst_49 : f32 to vector<2x32xf32>
    %129 = vector.extract_strided_slice %125 {offsets = [0, 0], sizes = [2, 96], strides = [1, 1]} : vector<42x96xf32> to vector<2x96xf32>
    %cst_50 = arith.constant dense<0.000000e+00> : vector<2x96xf32>
    %130 = tpu.matmul %128, %126, %cst_50 {dimension_numbers = #tpu.dot_dimension_numbers<[1], [0], [0], [1], [0, 0, 1, 1], [], []>} : vector<2x32xf32>, vector<32x96xf32>, vector<2x96xf32> -> vector<2x96xf32>
    %131 = vector.broadcast %127 : vector<1x96xf32> to vector<2x96xf32>
    %132 = arith.addf %130, %131 : vector<2x96xf32>
    %133 = vector.extract_strided_slice %129 {offsets = [0, 0], sizes = [2, 32], strides = [1, 1]} : vector<2x96xf32> to vector<2x32xf32>
    %134 = vector.extract_strided_slice %132 {offsets = [0, 0], sizes = [2, 32], strides = [1, 1]} : vector<2x96xf32> to vector<2x32xf32>
    %135 = arith.addf %133, %134 : vector<2x32xf32>
    %136 = arith.negf %135 : vector<2x32xf32>
    %137 = math.exp %136 : vector<2x32xf32>
    %cst_51 = arith.constant 1.000000e+00 : f32
    %138 = vector.broadcast %cst_51 : f32 to vector<2x32xf32>
    %139 = arith.addf %138, %137 : vector<2x32xf32>
    %140 = arith.divf %138, %139 : vector<2x32xf32>
    %141 = vector.extract_strided_slice %129 {offsets = [0, 32], sizes = [2, 32], strides = [1, 1]} : vector<2x96xf32> to vector<2x32xf32>
    %142 = vector.extract_strided_slice %132 {offsets = [0, 32], sizes = [2, 32], strides = [1, 1]} : vector<2x96xf32> to vector<2x32xf32>
    %143 = arith.addf %141, %142 : vector<2x32xf32>
    %144 = arith.negf %143 : vector<2x32xf32>
    %145 = math.exp %144 : vector<2x32xf32>
    %cst_52 = arith.constant 1.000000e+00 : f32
    %146 = vector.broadcast %cst_52 : f32 to vector<2x32xf32>
    %147 = arith.addf %146, %145 : vector<2x32xf32>
    %148 = arith.divf %146, %147 : vector<2x32xf32>
    %149 = vector.extract_strided_slice %129 {offsets = [0, 64], sizes = [2, 32], strides = [1, 1]} : vector<2x96xf32> to vector<2x32xf32>
    %150 = vector.extract_strided_slice %132 {offsets = [0, 64], sizes = [2, 32], strides = [1, 1]} : vector<2x96xf32> to vector<2x32xf32>
    %151 = arith.mulf %140, %150 : vector<2x32xf32>
    %152 = arith.addf %149, %151 : vector<2x32xf32>
    %153 = math.tanh %152 : vector<2x32xf32>
    %cst_53 = arith.constant 1.000000e+00 : f32
    %154 = vector.broadcast %cst_53 : f32 to vector<2x32xf32>
    %155 = arith.subf %154, %148 : vector<2x32xf32>
    %156 = arith.mulf %155, %153 : vector<2x32xf32>
    %157 = arith.mulf %148, %128 : vector<2x32xf32>
    %158 = arith.addf %156, %157 : vector<2x32xf32>
    %c0_54 = arith.constant 0 : index
    %c0_55 = arith.constant 0 : index
    %159 = vector.load %arg5[%c0_54, %c0_55] : memref<42x32xf32, #tpu.memory_space<vmem>>, vector<2x32xf32>
    tpu.vector_store %arg5[%c0_54, %c0_55], %158 {strides = array<i32>} : memref<42x32xf32, #tpu.memory_space<vmem>>, vector<2x32xf32>,
    %160 = vector.extract_strided_slice %125 {offsets = [2, 0], sizes = [2, 96], strides = [1, 1]} : vector<42x96xf32> to vector<2x96xf32>
    %cst_56 = arith.constant dense<0.000000e+00> : vector<2x96xf32>
    %161 = tpu.matmul %158, %126, %cst_56 {dimension_numbers = #tpu.dot_dimension_numbers<[1], [0], [0], [1], [0, 0, 1, 1], [], []>} : vector<2x32xf32>, vector<32x96xf32>, vector<2x96xf32> -> vector<2x96xf32>
    %162 = vector.broadcast %127 : vector<1x96xf32> to vector<2x96xf32>
    %163 = arith.addf %161, %162 : vector<2x96xf32>
    %164 = vector.extract_strided_slice %160 {offsets = [0, 0], sizes = [2, 32], strides = [1, 1]} : vector<2x96xf32> to vector<2x32xf32>
    %165 = vector.extract_strided_slice %163 {offsets = [0, 0], sizes = [2, 32], strides = [1, 1]} : vector<2x96xf32> to vector<2x32xf32>
    %166 = arith.addf %164, %165 : vector<2x32xf32>
    %167 = arith.negf %166 : vector<2x32xf32>
    %168 = math.exp %167 : vector<2x32xf32>
    %cst_57 = arith.constant 1.000000e+00 : f32
    %169 = vector.broadcast %cst_57 : f32 to vector<2x32xf32>
    %170 = arith.addf %169, %168 : vector<2x32xf32>
    %171 = arith.divf %169, %170 : vector<2x32xf32>
    %172 = vector.extract_strided_slice %160 {offsets = [0, 32], sizes = [2, 32], strides = [1, 1]} : vector<2x96xf32> to vector<2x32xf32>
    %173 = vector.extract_strided_slice %163 {offsets = [0, 32], sizes = [2, 32], strides = [1, 1]} : vector<2x96xf32> to vector<2x32xf32>
    %174 = arith.addf %172, %173 : vector<2x32xf32>
    %175 = arith.negf %174 : vector<2x32xf32>
    %176 = math.exp %175 : vector<2x32xf32>
    %cst_58 = arith.constant 1.000000e+00 : f32
    %177 = vector.broadcast %cst_58 : f32 to vector<2x32xf32>
    %178 = arith.addf %177, %176 : vector<2x32xf32>
    %179 = arith.divf %177, %178 : vector<2x32xf32>
    %180 = vector.extract_strided_slice %160 {offsets = [0, 64], sizes = [2, 32], strides = [1, 1]} : vector<2x96xf32> to vector<2x32xf32>
    %181 = vector.extract_strided_slice %163 {offsets = [0, 64], sizes = [2, 32], strides = [1, 1]} : vector<2x96xf32> to vector<2x32xf32>
    %182 = arith.mulf %171, %181 : vector<2x32xf32>
    %183 = arith.addf %180, %182 : vector<2x32xf32>
    %184 = math.tanh %183 : vector<2x32xf32>
    %cst_59 = arith.constant 1.000000e+00 : f32
    %185 = vector.broadcast %cst_59 : f32 to vector<2x32xf32>
    %186 = arith.subf %185, %179 : vector<2x32xf32>
    %187 = arith.mulf %186, %184 : vector<2x32xf32>
    %188 = arith.mulf %179, %158 : vector<2x32xf32>
    %189 = arith.addf %187, %188 : vector<2x32xf32>
    %c2_60 = arith.constant 2 : index
    %c0_61 = arith.constant 0 : index
    %190 = vector.load %arg5[%c2_60, %c0_61] : memref<42x32xf32, #tpu.memory_space<vmem>>, vector<2x32xf32>
    tpu.vector_store %arg5[%c2_60, %c0_61], %189 {strides = array<i32>} : memref<42x32xf32, #tpu.memory_space<vmem>>, vector<2x32xf32>,
    %191 = vector.extract_strided_slice %125 {offsets = [4, 0], sizes = [2, 96], strides = [1, 1]} : vector<42x96xf32> to vector<2x96xf32>
    %cst_62 = arith.constant dense<0.000000e+00> : vector<2x96xf32>
    %192 = tpu.matmul %189, %126, %cst_62 {dimension_numbers = #tpu.dot_dimension_numbers<[1], [0], [0], [1], [0, 0, 1, 1], [], []>} : vector<2x32xf32>, vector<32x96xf32>, vector<2x96xf32> -> vector<2x96xf32>
    %193 = vector.broadcast %127 : vector<1x96xf32> to vector<2x96xf32>
    %194 = arith.addf %192, %193 : vector<2x96xf32>
    %195 = vector.extract_strided_slice %191 {offsets = [0, 0], sizes = [2, 32], strides = [1, 1]} : vector<2x96xf32> to vector<2x32xf32>
    %196 = vector.extract_strided_slice %194 {offsets = [0, 0], sizes = [2, 32], strides = [1, 1]} : vector<2x96xf32> to vector<2x32xf32>
    %197 = arith.addf %195, %196 : vector<2x32xf32>
    %198 = arith.negf %197 : vector<2x32xf32>
    %199 = math.exp %198 : vector<2x32xf32>
    %cst_63 = arith.constant 1.000000e+00 : f32
    %200 = vector.broadcast %cst_63 : f32 to vector<2x32xf32>
    %201 = arith.addf %200, %199 : vector<2x32xf32>
    %202 = arith.divf %200, %201 : vector<2x32xf32>
    %203 = vector.extract_strided_slice %191 {offsets = [0, 32], sizes = [2, 32], strides = [1, 1]} : vector<2x96xf32> to vector<2x32xf32>
    %204 = vector.extract_strided_slice %194 {offsets = [0, 32], sizes = [2, 32], strides = [1, 1]} : vector<2x96xf32> to vector<2x32xf32>
    %205 = arith.addf %203, %204 : vector<2x32xf32>
    %206 = arith.negf %205 : vector<2x32xf32>
    %207 = math.exp %206 : vector<2x32xf32>
    %cst_64 = arith.constant 1.000000e+00 : f32
    %208 = vector.broadcast %cst_64 : f32 to vector<2x32xf32>
    %209 = arith.addf %208, %207 : vector<2x32xf32>
    %210 = arith.divf %208, %209 : vector<2x32xf32>
    %211 = vector.extract_strided_slice %191 {offsets = [0, 64], sizes = [2, 32], strides = [1, 1]} : vector<2x96xf32> to vector<2x32xf32>
    %212 = vector.extract_strided_slice %194 {offsets = [0, 64], sizes = [2, 32], strides = [1, 1]} : vector<2x96xf32> to vector<2x32xf32>
    %213 = arith.mulf %202, %212 : vector<2x32xf32>
    %214 = arith.addf %211, %213 : vector<2x32xf32>
    %215 = math.tanh %214 : vector<2x32xf32>
    %cst_65 = arith.constant 1.000000e+00 : f32
    %216 = vector.broadcast %cst_65 : f32 to vector<2x32xf32>
    %217 = arith.subf %216, %210 : vector<2x32xf32>
    %218 = arith.mulf %217, %215 : vector<2x32xf32>
    %219 = arith.mulf %210, %189 : vector<2x32xf32>
    %220 = arith.addf %218, %219 : vector<2x32xf32>
    %c4_66 = arith.constant 4 : index
    %c0_67 = arith.constant 0 : index
    %221 = vector.load %arg5[%c4_66, %c0_67] : memref<42x32xf32, #tpu.memory_space<vmem>>, vector<2x32xf32>
    tpu.vector_store %arg5[%c4_66, %c0_67], %220 {strides = array<i32>} : memref<42x32xf32, #tpu.memory_space<vmem>>, vector<2x32xf32>,
    %222 = vector.extract_strided_slice %125 {offsets = [6, 0], sizes = [2, 96], strides = [1, 1]} : vector<42x96xf32> to vector<2x96xf32>
    %cst_68 = arith.constant dense<0.000000e+00> : vector<2x96xf32>
    %223 = tpu.matmul %220, %126, %cst_68 {dimension_numbers = #tpu.dot_dimension_numbers<[1], [0], [0], [1], [0, 0, 1, 1], [], []>} : vector<2x32xf32>, vector<32x96xf32>, vector<2x96xf32> -> vector<2x96xf32>
    %224 = vector.broadcast %127 : vector<1x96xf32> to vector<2x96xf32>
    %225 = arith.addf %223, %224 : vector<2x96xf32>
    %226 = vector.extract_strided_slice %222 {offsets = [0, 0], sizes = [2, 32], strides = [1, 1]} : vector<2x96xf32> to vector<2x32xf32>
    %227 = vector.extract_strided_slice %225 {offsets = [0, 0], sizes = [2, 32], strides = [1, 1]} : vector<2x96xf32> to vector<2x32xf32>
    %228 = arith.addf %226, %227 : vector<2x32xf32>
    %229 = arith.negf %228 : vector<2x32xf32>
    %230 = math.exp %229 : vector<2x32xf32>
    %cst_69 = arith.constant 1.000000e+00 : f32
    %231 = vector.broadcast %cst_69 : f32 to vector<2x32xf32>
    %232 = arith.addf %231, %230 : vector<2x32xf32>
    %233 = arith.divf %231, %232 : vector<2x32xf32>
    %234 = vector.extract_strided_slice %222 {offsets = [0, 32], sizes = [2, 32], strides = [1, 1]} : vector<2x96xf32> to vector<2x32xf32>
    %235 = vector.extract_strided_slice %225 {offsets = [0, 32], sizes = [2, 32], strides = [1, 1]} : vector<2x96xf32> to vector<2x32xf32>
    %236 = arith.addf %234, %235 : vector<2x32xf32>
    %237 = arith.negf %236 : vector<2x32xf32>
    %238 = math.exp %237 : vector<2x32xf32>
    %cst_70 = arith.constant 1.000000e+00 : f32
    %239 = vector.broadcast %cst_70 : f32 to vector<2x32xf32>
    %240 = arith.addf %239, %238 : vector<2x32xf32>
    %241 = arith.divf %239, %240 : vector<2x32xf32>
    %242 = vector.extract_strided_slice %222 {offsets = [0, 64], sizes = [2, 32], strides = [1, 1]} : vector<2x96xf32> to vector<2x32xf32>
    %243 = vector.extract_strided_slice %225 {offsets = [0, 64], sizes = [2, 32], strides = [1, 1]} : vector<2x96xf32> to vector<2x32xf32>
    %244 = arith.mulf %233, %243 : vector<2x32xf32>
    %245 = arith.addf %242, %244 : vector<2x32xf32>
    %246 = math.tanh %245 : vector<2x32xf32>
    %cst_71 = arith.constant 1.000000e+00 : f32
    %247 = vector.broadcast %cst_71 : f32 to vector<2x32xf32>
    %248 = arith.subf %247, %241 : vector<2x32xf32>
    %249 = arith.mulf %248, %246 : vector<2x32xf32>
    %250 = arith.mulf %241, %220 : vector<2x32xf32>
    %251 = arith.addf %249, %250 : vector<2x32xf32>
    %c6 = arith.constant 6 : index
    %c0_72 = arith.constant 0 : index
    %252 = vector.load %arg5[%c6, %c0_72] : memref<42x32xf32, #tpu.memory_space<vmem>>, vector<2x32xf32>
    tpu.vector_store %arg5[%c6, %c0_72], %251 {strides = array<i32>} : memref<42x32xf32, #tpu.memory_space<vmem>>, vector<2x32xf32>,
    %253 = vector.extract_strided_slice %125 {offsets = [8, 0], sizes = [2, 96], strides = [1, 1]} : vector<42x96xf32> to vector<2x96xf32>
    %cst_73 = arith.constant dense<0.000000e+00> : vector<2x96xf32>
    %254 = tpu.matmul %251, %126, %cst_73 {dimension_numbers = #tpu.dot_dimension_numbers<[1], [0], [0], [1], [0, 0, 1, 1], [], []>} : vector<2x32xf32>, vector<32x96xf32>, vector<2x96xf32> -> vector<2x96xf32>
    %255 = vector.broadcast %127 : vector<1x96xf32> to vector<2x96xf32>
    %256 = arith.addf %254, %255 : vector<2x96xf32>
    %257 = vector.extract_strided_slice %253 {offsets = [0, 0], sizes = [2, 32], strides = [1, 1]} : vector<2x96xf32> to vector<2x32xf32>
    %258 = vector.extract_strided_slice %256 {offsets = [0, 0], sizes = [2, 32], strides = [1, 1]} : vector<2x96xf32> to vector<2x32xf32>
    %259 = arith.addf %257, %258 : vector<2x32xf32>
    %260 = arith.negf %259 : vector<2x32xf32>
    %261 = math.exp %260 : vector<2x32xf32>
    %cst_74 = arith.constant 1.000000e+00 : f32
    %262 = vector.broadcast %cst_74 : f32 to vector<2x32xf32>
    %263 = arith.addf %262, %261 : vector<2x32xf32>
    %264 = arith.divf %262, %263 : vector<2x32xf32>
    %265 = vector.extract_strided_slice %253 {offsets = [0, 32], sizes = [2, 32], strides = [1, 1]} : vector<2x96xf32> to vector<2x32xf32>
    %266 = vector.extract_strided_slice %256 {offsets = [0, 32], sizes = [2, 32], strides = [1, 1]} : vector<2x96xf32> to vector<2x32xf32>
    %267 = arith.addf %265, %266 : vector<2x32xf32>
    %268 = arith.negf %267 : vector<2x32xf32>
    %269 = math.exp %268 : vector<2x32xf32>
    %cst_75 = arith.constant 1.000000e+00 : f32
    %270 = vector.broadcast %cst_75 : f32 to vector<2x32xf32>
    %271 = arith.addf %270, %269 : vector<2x32xf32>
    %272 = arith.divf %270, %271 : vector<2x32xf32>
    %273 = vector.extract_strided_slice %253 {offsets = [0, 64], sizes = [2, 32], strides = [1, 1]} : vector<2x96xf32> to vector<2x32xf32>
    %274 = vector.extract_strided_slice %256 {offsets = [0, 64], sizes = [2, 32], strides = [1, 1]} : vector<2x96xf32> to vector<2x32xf32>
    %275 = arith.mulf %264, %274 : vector<2x32xf32>
    %276 = arith.addf %273, %275 : vector<2x32xf32>
    %277 = math.tanh %276 : vector<2x32xf32>
    %cst_76 = arith.constant 1.000000e+00 : f32
    %278 = vector.broadcast %cst_76 : f32 to vector<2x32xf32>
    %279 = arith.subf %278, %272 : vector<2x32xf32>
    %280 = arith.mulf %279, %277 : vector<2x32xf32>
    %281 = arith.mulf %272, %251 : vector<2x32xf32>
    %282 = arith.addf %280, %281 : vector<2x32xf32>
    %c8_77 = arith.constant 8 : index
    %c0_78 = arith.constant 0 : index
    %283 = vector.load %arg5[%c8_77, %c0_78] : memref<42x32xf32, #tpu.memory_space<vmem>>, vector<2x32xf32>
    tpu.vector_store %arg5[%c8_77, %c0_78], %282 {strides = array<i32>} : memref<42x32xf32, #tpu.memory_space<vmem>>, vector<2x32xf32>,
    %284 = vector.extract_strided_slice %125 {offsets = [10, 0], sizes = [2, 96], strides = [1, 1]} : vector<42x96xf32> to vector<2x96xf32>
    %cst_79 = arith.constant dense<0.000000e+00> : vector<2x96xf32>
    %285 = tpu.matmul %282, %126, %cst_79 {dimension_numbers = #tpu.dot_dimension_numbers<[1], [0], [0], [1], [0, 0, 1, 1], [], []>} : vector<2x32xf32>, vector<32x96xf32>, vector<2x96xf32> -> vector<2x96xf32>
    %286 = vector.broadcast %127 : vector<1x96xf32> to vector<2x96xf32>
    %287 = arith.addf %285, %286 : vector<2x96xf32>
    %288 = vector.extract_strided_slice %284 {offsets = [0, 0], sizes = [2, 32], strides = [1, 1]} : vector<2x96xf32> to vector<2x32xf32>
    %289 = vector.extract_strided_slice %287 {offsets = [0, 0], sizes = [2, 32], strides = [1, 1]} : vector<2x96xf32> to vector<2x32xf32>
    %290 = arith.addf %288, %289 : vector<2x32xf32>
    %291 = arith.negf %290 : vector<2x32xf32>
    %292 = math.exp %291 : vector<2x32xf32>
    %cst_80 = arith.constant 1.000000e+00 : f32
    %293 = vector.broadcast %cst_80 : f32 to vector<2x32xf32>
    %294 = arith.addf %293, %292 : vector<2x32xf32>
    %295 = arith.divf %293, %294 : vector<2x32xf32>
    %296 = vector.extract_strided_slice %284 {offsets = [0, 32], sizes = [2, 32], strides = [1, 1]} : vector<2x96xf32> to vector<2x32xf32>
    %297 = vector.extract_strided_slice %287 {offsets = [0, 32], sizes = [2, 32], strides = [1, 1]} : vector<2x96xf32> to vector<2x32xf32>
    %298 = arith.addf %296, %297 : vector<2x32xf32>
    %299 = arith.negf %298 : vector<2x32xf32>
    %300 = math.exp %299 : vector<2x32xf32>
    %cst_81 = arith.constant 1.000000e+00 : f32
    %301 = vector.broadcast %cst_81 : f32 to vector<2x32xf32>
    %302 = arith.addf %301, %300 : vector<2x32xf32>
    %303 = arith.divf %301, %302 : vector<2x32xf32>
    %304 = vector.extract_strided_slice %284 {offsets = [0, 64], sizes = [2, 32], strides = [1, 1]} : vector<2x96xf32> to vector<2x32xf32>
    %305 = vector.extract_strided_slice %287 {offsets = [0, 64], sizes = [2, 32], strides = [1, 1]} : vector<2x96xf32> to vector<2x32xf32>
    %306 = arith.mulf %295, %305 : vector<2x32xf32>
    %307 = arith.addf %304, %306 : vector<2x32xf32>
    %308 = math.tanh %307 : vector<2x32xf32>
    %cst_82 = arith.constant 1.000000e+00 : f32
    %309 = vector.broadcast %cst_82 : f32 to vector<2x32xf32>
    %310 = arith.subf %309, %303 : vector<2x32xf32>
    %311 = arith.mulf %310, %308 : vector<2x32xf32>
    %312 = arith.mulf %303, %282 : vector<2x32xf32>
    %313 = arith.addf %311, %312 : vector<2x32xf32>
    %c10 = arith.constant 10 : index
    %c0_83 = arith.constant 0 : index
    %314 = vector.load %arg5[%c10, %c0_83] : memref<42x32xf32, #tpu.memory_space<vmem>>, vector<2x32xf32>
    tpu.vector_store %arg5[%c10, %c0_83], %313 {strides = array<i32>} : memref<42x32xf32, #tpu.memory_space<vmem>>, vector<2x32xf32>,
    %315 = vector.extract_strided_slice %125 {offsets = [12, 0], sizes = [2, 96], strides = [1, 1]} : vector<42x96xf32> to vector<2x96xf32>
    %cst_84 = arith.constant dense<0.000000e+00> : vector<2x96xf32>
    %316 = tpu.matmul %313, %126, %cst_84 {dimension_numbers = #tpu.dot_dimension_numbers<[1], [0], [0], [1], [0, 0, 1, 1], [], []>} : vector<2x32xf32>, vector<32x96xf32>, vector<2x96xf32> -> vector<2x96xf32>
    %317 = vector.broadcast %127 : vector<1x96xf32> to vector<2x96xf32>
    %318 = arith.addf %316, %317 : vector<2x96xf32>
    %319 = vector.extract_strided_slice %315 {offsets = [0, 0], sizes = [2, 32], strides = [1, 1]} : vector<2x96xf32> to vector<2x32xf32>
    %320 = vector.extract_strided_slice %318 {offsets = [0, 0], sizes = [2, 32], strides = [1, 1]} : vector<2x96xf32> to vector<2x32xf32>
    %321 = arith.addf %319, %320 : vector<2x32xf32>
    %322 = arith.negf %321 : vector<2x32xf32>
    %323 = math.exp %322 : vector<2x32xf32>
    %cst_85 = arith.constant 1.000000e+00 : f32
    %324 = vector.broadcast %cst_85 : f32 to vector<2x32xf32>
    %325 = arith.addf %324, %323 : vector<2x32xf32>
    %326 = arith.divf %324, %325 : vector<2x32xf32>
    %327 = vector.extract_strided_slice %315 {offsets = [0, 32], sizes = [2, 32], strides = [1, 1]} : vector<2x96xf32> to vector<2x32xf32>
    %328 = vector.extract_strided_slice %318 {offsets = [0, 32], sizes = [2, 32], strides = [1, 1]} : vector<2x96xf32> to vector<2x32xf32>
    %329 = arith.addf %327, %328 : vector<2x32xf32>
    %330 = arith.negf %329 : vector<2x32xf32>
    %331 = math.exp %330 : vector<2x32xf32>
    %cst_86 = arith.constant 1.000000e+00 : f32
    %332 = vector.broadcast %cst_86 : f32 to vector<2x32xf32>
    %333 = arith.addf %332, %331 : vector<2x32xf32>
    %334 = arith.divf %332, %333 : vector<2x32xf32>
    %335 = vector.extract_strided_slice %315 {offsets = [0, 64], sizes = [2, 32], strides = [1, 1]} : vector<2x96xf32> to vector<2x32xf32>
    %336 = vector.extract_strided_slice %318 {offsets = [0, 64], sizes = [2, 32], strides = [1, 1]} : vector<2x96xf32> to vector<2x32xf32>
    %337 = arith.mulf %326, %336 : vector<2x32xf32>
    %338 = arith.addf %335, %337 : vector<2x32xf32>
    %339 = math.tanh %338 : vector<2x32xf32>
    %cst_87 = arith.constant 1.000000e+00 : f32
    %340 = vector.broadcast %cst_87 : f32 to vector<2x32xf32>
    %341 = arith.subf %340, %334 : vector<2x32xf32>
    %342 = arith.mulf %341, %339 : vector<2x32xf32>
    %343 = arith.mulf %334, %313 : vector<2x32xf32>
    %344 = arith.addf %342, %343 : vector<2x32xf32>
    %c12 = arith.constant 12 : index
    %c0_88 = arith.constant 0 : index
    %345 = vector.load %arg5[%c12, %c0_88] : memref<42x32xf32, #tpu.memory_space<vmem>>, vector<2x32xf32>
    tpu.vector_store %arg5[%c12, %c0_88], %344 {strides = array<i32>} : memref<42x32xf32, #tpu.memory_space<vmem>>, vector<2x32xf32>,
    %346 = vector.extract_strided_slice %125 {offsets = [14, 0], sizes = [2, 96], strides = [1, 1]} : vector<42x96xf32> to vector<2x96xf32>
    %cst_89 = arith.constant dense<0.000000e+00> : vector<2x96xf32>
    %347 = tpu.matmul %344, %126, %cst_89 {dimension_numbers = #tpu.dot_dimension_numbers<[1], [0], [0], [1], [0, 0, 1, 1], [], []>} : vector<2x32xf32>, vector<32x96xf32>, vector<2x96xf32> -> vector<2x96xf32>
    %348 = vector.broadcast %127 : vector<1x96xf32> to vector<2x96xf32>
    %349 = arith.addf %347, %348 : vector<2x96xf32>
    %350 = vector.extract_strided_slice %346 {offsets = [0, 0], sizes = [2, 32], strides = [1, 1]} : vector<2x96xf32> to vector<2x32xf32>
    %351 = vector.extract_strided_slice %349 {offsets = [0, 0], sizes = [2, 32], strides = [1, 1]} : vector<2x96xf32> to vector<2x32xf32>
    %352 = arith.addf %350, %351 : vector<2x32xf32>
    %353 = arith.negf %352 : vector<2x32xf32>
    %354 = math.exp %353 : vector<2x32xf32>
    %cst_90 = arith.constant 1.000000e+00 : f32
    %355 = vector.broadcast %cst_90 : f32 to vector<2x32xf32>
    %356 = arith.addf %355, %354 : vector<2x32xf32>
    %357 = arith.divf %355, %356 : vector<2x32xf32>
    %358 = vector.extract_strided_slice %346 {offsets = [0, 32], sizes = [2, 32], strides = [1, 1]} : vector<2x96xf32> to vector<2x32xf32>
    %359 = vector.extract_strided_slice %349 {offsets = [0, 32], sizes = [2, 32], strides = [1, 1]} : vector<2x96xf32> to vector<2x32xf32>
    %360 = arith.addf %358, %359 : vector<2x32xf32>
    %361 = arith.negf %360 : vector<2x32xf32>
    %362 = math.exp %361 : vector<2x32xf32>
    %cst_91 = arith.constant 1.000000e+00 : f32
    %363 = vector.broadcast %cst_91 : f32 to vector<2x32xf32>
    %364 = arith.addf %363, %362 : vector<2x32xf32>
    %365 = arith.divf %363, %364 : vector<2x32xf32>
    %366 = vector.extract_strided_slice %346 {offsets = [0, 64], sizes = [2, 32], strides = [1, 1]} : vector<2x96xf32> to vector<2x32xf32>
    %367 = vector.extract_strided_slice %349 {offsets = [0, 64], sizes = [2, 32], strides = [1, 1]} : vector<2x96xf32> to vector<2x32xf32>
    %368 = arith.mulf %357, %367 : vector<2x32xf32>
    %369 = arith.addf %366, %368 : vector<2x32xf32>
    %370 = math.tanh %369 : vector<2x32xf32>
    %cst_92 = arith.constant 1.000000e+00 : f32
    %371 = vector.broadcast %cst_92 : f32 to vector<2x32xf32>
    %372 = arith.subf %371, %365 : vector<2x32xf32>
    %373 = arith.mulf %372, %370 : vector<2x32xf32>
    %374 = arith.mulf %365, %344 : vector<2x32xf32>
    %375 = arith.addf %373, %374 : vector<2x32xf32>
    %c14 = arith.constant 14 : index
    %c0_93 = arith.constant 0 : index
    %376 = vector.load %arg5[%c14, %c0_93] : memref<42x32xf32, #tpu.memory_space<vmem>>, vector<2x32xf32>
    tpu.vector_store %arg5[%c14, %c0_93], %375 {strides = array<i32>} : memref<42x32xf32, #tpu.memory_space<vmem>>, vector<2x32xf32>,
    %377 = vector.extract_strided_slice %125 {offsets = [16, 0], sizes = [2, 96], strides = [1, 1]} : vector<42x96xf32> to vector<2x96xf32>
    %cst_94 = arith.constant dense<0.000000e+00> : vector<2x96xf32>
    %378 = tpu.matmul %375, %126, %cst_94 {dimension_numbers = #tpu.dot_dimension_numbers<[1], [0], [0], [1], [0, 0, 1, 1], [], []>} : vector<2x32xf32>, vector<32x96xf32>, vector<2x96xf32> -> vector<2x96xf32>
    %379 = vector.broadcast %127 : vector<1x96xf32> to vector<2x96xf32>
    %380 = arith.addf %378, %379 : vector<2x96xf32>
    %381 = vector.extract_strided_slice %377 {offsets = [0, 0], sizes = [2, 32], strides = [1, 1]} : vector<2x96xf32> to vector<2x32xf32>
    %382 = vector.extract_strided_slice %380 {offsets = [0, 0], sizes = [2, 32], strides = [1, 1]} : vector<2x96xf32> to vector<2x32xf32>
    %383 = arith.addf %381, %382 : vector<2x32xf32>
    %384 = arith.negf %383 : vector<2x32xf32>
    %385 = math.exp %384 : vector<2x32xf32>
    %cst_95 = arith.constant 1.000000e+00 : f32
    %386 = vector.broadcast %cst_95 : f32 to vector<2x32xf32>
    %387 = arith.addf %386, %385 : vector<2x32xf32>
    %388 = arith.divf %386, %387 : vector<2x32xf32>
    %389 = vector.extract_strided_slice %377 {offsets = [0, 32], sizes = [2, 32], strides = [1, 1]} : vector<2x96xf32> to vector<2x32xf32>
    %390 = vector.extract_strided_slice %380 {offsets = [0, 32], sizes = [2, 32], strides = [1, 1]} : vector<2x96xf32> to vector<2x32xf32>
    %391 = arith.addf %389, %390 : vector<2x32xf32>
    %392 = arith.negf %391 : vector<2x32xf32>
    %393 = math.exp %392 : vector<2x32xf32>
    %cst_96 = arith.constant 1.000000e+00 : f32
    %394 = vector.broadcast %cst_96 : f32 to vector<2x32xf32>
    %395 = arith.addf %394, %393 : vector<2x32xf32>
    %396 = arith.divf %394, %395 : vector<2x32xf32>
    %397 = vector.extract_strided_slice %377 {offsets = [0, 64], sizes = [2, 32], strides = [1, 1]} : vector<2x96xf32> to vector<2x32xf32>
    %398 = vector.extract_strided_slice %380 {offsets = [0, 64], sizes = [2, 32], strides = [1, 1]} : vector<2x96xf32> to vector<2x32xf32>
    %399 = arith.mulf %388, %398 : vector<2x32xf32>
    %400 = arith.addf %397, %399 : vector<2x32xf32>
    %401 = math.tanh %400 : vector<2x32xf32>
    %cst_97 = arith.constant 1.000000e+00 : f32
    %402 = vector.broadcast %cst_97 : f32 to vector<2x32xf32>
    %403 = arith.subf %402, %396 : vector<2x32xf32>
    %404 = arith.mulf %403, %401 : vector<2x32xf32>
    %405 = arith.mulf %396, %375 : vector<2x32xf32>
    %406 = arith.addf %404, %405 : vector<2x32xf32>
    %c16_98 = arith.constant 16 : index
    %c0_99 = arith.constant 0 : index
    %407 = vector.load %arg5[%c16_98, %c0_99] : memref<42x32xf32, #tpu.memory_space<vmem>>, vector<2x32xf32>
    tpu.vector_store %arg5[%c16_98, %c0_99], %406 {strides = array<i32>} : memref<42x32xf32, #tpu.memory_space<vmem>>, vector<2x32xf32>,
    %408 = vector.extract_strided_slice %125 {offsets = [18, 0], sizes = [2, 96], strides = [1, 1]} : vector<42x96xf32> to vector<2x96xf32>
    %cst_100 = arith.constant dense<0.000000e+00> : vector<2x96xf32>
    %409 = tpu.matmul %406, %126, %cst_100 {dimension_numbers = #tpu.dot_dimension_numbers<[1], [0], [0], [1], [0, 0, 1, 1], [], []>} : vector<2x32xf32>, vector<32x96xf32>, vector<2x96xf32> -> vector<2x96xf32>
    %410 = vector.broadcast %127 : vector<1x96xf32> to vector<2x96xf32>
    %411 = arith.addf %409, %410 : vector<2x96xf32>
    %412 = vector.extract_strided_slice %408 {offsets = [0, 0], sizes = [2, 32], strides = [1, 1]} : vector<2x96xf32> to vector<2x32xf32>
    %413 = vector.extract_strided_slice %411 {offsets = [0, 0], sizes = [2, 32], strides = [1, 1]} : vector<2x96xf32> to vector<2x32xf32>
    %414 = arith.addf %412, %413 : vector<2x32xf32>
    %415 = arith.negf %414 : vector<2x32xf32>
    %416 = math.exp %415 : vector<2x32xf32>
    %cst_101 = arith.constant 1.000000e+00 : f32
    %417 = vector.broadcast %cst_101 : f32 to vector<2x32xf32>
    %418 = arith.addf %417, %416 : vector<2x32xf32>
    %419 = arith.divf %417, %418 : vector<2x32xf32>
    %420 = vector.extract_strided_slice %408 {offsets = [0, 32], sizes = [2, 32], strides = [1, 1]} : vector<2x96xf32> to vector<2x32xf32>
    %421 = vector.extract_strided_slice %411 {offsets = [0, 32], sizes = [2, 32], strides = [1, 1]} : vector<2x96xf32> to vector<2x32xf32>
    %422 = arith.addf %420, %421 : vector<2x32xf32>
    %423 = arith.negf %422 : vector<2x32xf32>
    %424 = math.exp %423 : vector<2x32xf32>
    %cst_102 = arith.constant 1.000000e+00 : f32
    %425 = vector.broadcast %cst_102 : f32 to vector<2x32xf32>
    %426 = arith.addf %425, %424 : vector<2x32xf32>
    %427 = arith.divf %425, %426 : vector<2x32xf32>
    %428 = vector.extract_strided_slice %408 {offsets = [0, 64], sizes = [2, 32], strides = [1, 1]} : vector<2x96xf32> to vector<2x32xf32>
    %429 = vector.extract_strided_slice %411 {offsets = [0, 64], sizes = [2, 32], strides = [1, 1]} : vector<2x96xf32> to vector<2x32xf32>
    %430 = arith.mulf %419, %429 : vector<2x32xf32>
    %431 = arith.addf %428, %430 : vector<2x32xf32>
    %432 = math.tanh %431 : vector<2x32xf32>
    %cst_103 = arith.constant 1.000000e+00 : f32
    %433 = vector.broadcast %cst_103 : f32 to vector<2x32xf32>
    %434 = arith.subf %433, %427 : vector<2x32xf32>
    %435 = arith.mulf %434, %432 : vector<2x32xf32>
    %436 = arith.mulf %427, %406 : vector<2x32xf32>
    %437 = arith.addf %435, %436 : vector<2x32xf32>
    %c18 = arith.constant 18 : index
    %c0_104 = arith.constant 0 : index
    %438 = vector.load %arg5[%c18, %c0_104] : memref<42x32xf32, #tpu.memory_space<vmem>>, vector<2x32xf32>
    tpu.vector_store %arg5[%c18, %c0_104], %437 {strides = array<i32>} : memref<42x32xf32, #tpu.memory_space<vmem>>, vector<2x32xf32>,
    %439 = vector.extract_strided_slice %125 {offsets = [20, 0], sizes = [2, 96], strides = [1, 1]} : vector<42x96xf32> to vector<2x96xf32>
    %cst_105 = arith.constant dense<0.000000e+00> : vector<2x96xf32>
    %440 = tpu.matmul %437, %126, %cst_105 {dimension_numbers = #tpu.dot_dimension_numbers<[1], [0], [0], [1], [0, 0, 1, 1], [], []>} : vector<2x32xf32>, vector<32x96xf32>, vector<2x96xf32> -> vector<2x96xf32>
    %441 = vector.broadcast %127 : vector<1x96xf32> to vector<2x96xf32>
    %442 = arith.addf %440, %441 : vector<2x96xf32>
    %443 = vector.extract_strided_slice %439 {offsets = [0, 0], sizes = [2, 32], strides = [1, 1]} : vector<2x96xf32> to vector<2x32xf32>
    %444 = vector.extract_strided_slice %442 {offsets = [0, 0], sizes = [2, 32], strides = [1, 1]} : vector<2x96xf32> to vector<2x32xf32>
    %445 = arith.addf %443, %444 : vector<2x32xf32>
    %446 = arith.negf %445 : vector<2x32xf32>
    %447 = math.exp %446 : vector<2x32xf32>
    %cst_106 = arith.constant 1.000000e+00 : f32
    %448 = vector.broadcast %cst_106 : f32 to vector<2x32xf32>
    %449 = arith.addf %448, %447 : vector<2x32xf32>
    %450 = arith.divf %448, %449 : vector<2x32xf32>
    %451 = vector.extract_strided_slice %439 {offsets = [0, 32], sizes = [2, 32], strides = [1, 1]} : vector<2x96xf32> to vector<2x32xf32>
    %452 = vector.extract_strided_slice %442 {offsets = [0, 32], sizes = [2, 32], strides = [1, 1]} : vector<2x96xf32> to vector<2x32xf32>
    %453 = arith.addf %451, %452 : vector<2x32xf32>
    %454 = arith.negf %453 : vector<2x32xf32>
    %455 = math.exp %454 : vector<2x32xf32>
    %cst_107 = arith.constant 1.000000e+00 : f32
    %456 = vector.broadcast %cst_107 : f32 to vector<2x32xf32>
    %457 = arith.addf %456, %455 : vector<2x32xf32>
    %458 = arith.divf %456, %457 : vector<2x32xf32>
    %459 = vector.extract_strided_slice %439 {offsets = [0, 64], sizes = [2, 32], strides = [1, 1]} : vector<2x96xf32> to vector<2x32xf32>
    %460 = vector.extract_strided_slice %442 {offsets = [0, 64], sizes = [2, 32], strides = [1, 1]} : vector<2x96xf32> to vector<2x32xf32>
    %461 = arith.mulf %450, %460 : vector<2x32xf32>
    %462 = arith.addf %459, %461 : vector<2x32xf32>
    %463 = math.tanh %462 : vector<2x32xf32>
    %cst_108 = arith.constant 1.000000e+00 : f32
    %464 = vector.broadcast %cst_108 : f32 to vector<2x32xf32>
    %465 = arith.subf %464, %458 : vector<2x32xf32>
    %466 = arith.mulf %465, %463 : vector<2x32xf32>
    %467 = arith.mulf %458, %437 : vector<2x32xf32>
    %468 = arith.addf %466, %467 : vector<2x32xf32>
    %c20 = arith.constant 20 : index
    %c0_109 = arith.constant 0 : index
    %469 = vector.load %arg5[%c20, %c0_109] : memref<42x32xf32, #tpu.memory_space<vmem>>, vector<2x32xf32>
    tpu.vector_store %arg5[%c20, %c0_109], %468 {strides = array<i32>} : memref<42x32xf32, #tpu.memory_space<vmem>>, vector<2x32xf32>,
    %470 = vector.extract_strided_slice %125 {offsets = [22, 0], sizes = [2, 96], strides = [1, 1]} : vector<42x96xf32> to vector<2x96xf32>
    %cst_110 = arith.constant dense<0.000000e+00> : vector<2x96xf32>
    %471 = tpu.matmul %468, %126, %cst_110 {dimension_numbers = #tpu.dot_dimension_numbers<[1], [0], [0], [1], [0, 0, 1, 1], [], []>} : vector<2x32xf32>, vector<32x96xf32>, vector<2x96xf32> -> vector<2x96xf32>
    %472 = vector.broadcast %127 : vector<1x96xf32> to vector<2x96xf32>
    %473 = arith.addf %471, %472 : vector<2x96xf32>
    %474 = vector.extract_strided_slice %470 {offsets = [0, 0], sizes = [2, 32], strides = [1, 1]} : vector<2x96xf32> to vector<2x32xf32>
    %475 = vector.extract_strided_slice %473 {offsets = [0, 0], sizes = [2, 32], strides = [1, 1]} : vector<2x96xf32> to vector<2x32xf32>
    %476 = arith.addf %474, %475 : vector<2x32xf32>
    %477 = arith.negf %476 : vector<2x32xf32>
    %478 = math.exp %477 : vector<2x32xf32>
    %cst_111 = arith.constant 1.000000e+00 : f32
    %479 = vector.broadcast %cst_111 : f32 to vector<2x32xf32>
    %480 = arith.addf %479, %478 : vector<2x32xf32>
    %481 = arith.divf %479, %480 : vector<2x32xf32>
    %482 = vector.extract_strided_slice %470 {offsets = [0, 32], sizes = [2, 32], strides = [1, 1]} : vector<2x96xf32> to vector<2x32xf32>
    %483 = vector.extract_strided_slice %473 {offsets = [0, 32], sizes = [2, 32], strides = [1, 1]} : vector<2x96xf32> to vector<2x32xf32>
    %484 = arith.addf %482, %483 : vector<2x32xf32>
    %485 = arith.negf %484 : vector<2x32xf32>
    %486 = math.exp %485 : vector<2x32xf32>
    %cst_112 = arith.constant 1.000000e+00 : f32
    %487 = vector.broadcast %cst_112 : f32 to vector<2x32xf32>
    %488 = arith.addf %487, %486 : vector<2x32xf32>
    %489 = arith.divf %487, %488 : vector<2x32xf32>
    %490 = vector.extract_strided_slice %470 {offsets = [0, 64], sizes = [2, 32], strides = [1, 1]} : vector<2x96xf32> to vector<2x32xf32>
    %491 = vector.extract_strided_slice %473 {offsets = [0, 64], sizes = [2, 32], strides = [1, 1]} : vector<2x96xf32> to vector<2x32xf32>
    %492 = arith.mulf %481, %491 : vector<2x32xf32>
    %493 = arith.addf %490, %492 : vector<2x32xf32>
    %494 = math.tanh %493 : vector<2x32xf32>
    %cst_113 = arith.constant 1.000000e+00 : f32
    %495 = vector.broadcast %cst_113 : f32 to vector<2x32xf32>
    %496 = arith.subf %495, %489 : vector<2x32xf32>
    %497 = arith.mulf %496, %494 : vector<2x32xf32>
    %498 = arith.mulf %489, %468 : vector<2x32xf32>
    %499 = arith.addf %497, %498 : vector<2x32xf32>
    %c22 = arith.constant 22 : index
    %c0_114 = arith.constant 0 : index
    %500 = vector.load %arg5[%c22, %c0_114] : memref<42x32xf32, #tpu.memory_space<vmem>>, vector<2x32xf32>
    tpu.vector_store %arg5[%c22, %c0_114], %499 {strides = array<i32>} : memref<42x32xf32, #tpu.memory_space<vmem>>, vector<2x32xf32>,
    %501 = vector.extract_strided_slice %125 {offsets = [24, 0], sizes = [2, 96], strides = [1, 1]} : vector<42x96xf32> to vector<2x96xf32>
    %cst_115 = arith.constant dense<0.000000e+00> : vector<2x96xf32>
    %502 = tpu.matmul %499, %126, %cst_115 {dimension_numbers = #tpu.dot_dimension_numbers<[1], [0], [0], [1], [0, 0, 1, 1], [], []>} : vector<2x32xf32>, vector<32x96xf32>, vector<2x96xf32> -> vector<2x96xf32>
    %503 = vector.broadcast %127 : vector<1x96xf32> to vector<2x96xf32>
    %504 = arith.addf %502, %503 : vector<2x96xf32>
    %505 = vector.extract_strided_slice %501 {offsets = [0, 0], sizes = [2, 32], strides = [1, 1]} : vector<2x96xf32> to vector<2x32xf32>
    %506 = vector.extract_strided_slice %504 {offsets = [0, 0], sizes = [2, 32], strides = [1, 1]} : vector<2x96xf32> to vector<2x32xf32>
    %507 = arith.addf %505, %506 : vector<2x32xf32>
    %508 = arith.negf %507 : vector<2x32xf32>
    %509 = math.exp %508 : vector<2x32xf32>
    %cst_116 = arith.constant 1.000000e+00 : f32
    %510 = vector.broadcast %cst_116 : f32 to vector<2x32xf32>
    %511 = arith.addf %510, %509 : vector<2x32xf32>
    %512 = arith.divf %510, %511 : vector<2x32xf32>
    %513 = vector.extract_strided_slice %501 {offsets = [0, 32], sizes = [2, 32], strides = [1, 1]} : vector<2x96xf32> to vector<2x32xf32>
    %514 = vector.extract_strided_slice %504 {offsets = [0, 32], sizes = [2, 32], strides = [1, 1]} : vector<2x96xf32> to vector<2x32xf32>
    %515 = arith.addf %513, %514 : vector<2x32xf32>
    %516 = arith.negf %515 : vector<2x32xf32>
    %517 = math.exp %516 : vector<2x32xf32>
    %cst_117 = arith.constant 1.000000e+00 : f32
    %518 = vector.broadcast %cst_117 : f32 to vector<2x32xf32>
    %519 = arith.addf %518, %517 : vector<2x32xf32>
    %520 = arith.divf %518, %519 : vector<2x32xf32>
    %521 = vector.extract_strided_slice %501 {offsets = [0, 64], sizes = [2, 32], strides = [1, 1]} : vector<2x96xf32> to vector<2x32xf32>
    %522 = vector.extract_strided_slice %504 {offsets = [0, 64], sizes = [2, 32], strides = [1, 1]} : vector<2x96xf32> to vector<2x32xf32>
    %523 = arith.mulf %512, %522 : vector<2x32xf32>
    %524 = arith.addf %521, %523 : vector<2x32xf32>
    %525 = math.tanh %524 : vector<2x32xf32>
    %cst_118 = arith.constant 1.000000e+00 : f32
    %526 = vector.broadcast %cst_118 : f32 to vector<2x32xf32>
    %527 = arith.subf %526, %520 : vector<2x32xf32>
    %528 = arith.mulf %527, %525 : vector<2x32xf32>
    %529 = arith.mulf %520, %499 : vector<2x32xf32>
    %530 = arith.addf %528, %529 : vector<2x32xf32>
    %c24 = arith.constant 24 : index
    %c0_119 = arith.constant 0 : index
    %531 = vector.load %arg5[%c24, %c0_119] : memref<42x32xf32, #tpu.memory_space<vmem>>, vector<2x32xf32>
    tpu.vector_store %arg5[%c24, %c0_119], %530 {strides = array<i32>} : memref<42x32xf32, #tpu.memory_space<vmem>>, vector<2x32xf32>,
    %532 = vector.extract_strided_slice %125 {offsets = [26, 0], sizes = [2, 96], strides = [1, 1]} : vector<42x96xf32> to vector<2x96xf32>
    %cst_120 = arith.constant dense<0.000000e+00> : vector<2x96xf32>
    %533 = tpu.matmul %530, %126, %cst_120 {dimension_numbers = #tpu.dot_dimension_numbers<[1], [0], [0], [1], [0, 0, 1, 1], [], []>} : vector<2x32xf32>, vector<32x96xf32>, vector<2x96xf32> -> vector<2x96xf32>
    %534 = vector.broadcast %127 : vector<1x96xf32> to vector<2x96xf32>
    %535 = arith.addf %533, %534 : vector<2x96xf32>
    %536 = vector.extract_strided_slice %532 {offsets = [0, 0], sizes = [2, 32], strides = [1, 1]} : vector<2x96xf32> to vector<2x32xf32>
    %537 = vector.extract_strided_slice %535 {offsets = [0, 0], sizes = [2, 32], strides = [1, 1]} : vector<2x96xf32> to vector<2x32xf32>
    %538 = arith.addf %536, %537 : vector<2x32xf32>
    %539 = arith.negf %538 : vector<2x32xf32>
    %540 = math.exp %539 : vector<2x32xf32>
    %cst_121 = arith.constant 1.000000e+00 : f32
    %541 = vector.broadcast %cst_121 : f32 to vector<2x32xf32>
    %542 = arith.addf %541, %540 : vector<2x32xf32>
    %543 = arith.divf %541, %542 : vector<2x32xf32>
    %544 = vector.extract_strided_slice %532 {offsets = [0, 32], sizes = [2, 32], strides = [1, 1]} : vector<2x96xf32> to vector<2x32xf32>
    %545 = vector.extract_strided_slice %535 {offsets = [0, 32], sizes = [2, 32], strides = [1, 1]} : vector<2x96xf32> to vector<2x32xf32>
    %546 = arith.addf %544, %545 : vector<2x32xf32>
    %547 = arith.negf %546 : vector<2x32xf32>
    %548 = math.exp %547 : vector<2x32xf32>
    %cst_122 = arith.constant 1.000000e+00 : f32
    %549 = vector.broadcast %cst_122 : f32 to vector<2x32xf32>
    %550 = arith.addf %549, %548 : vector<2x32xf32>
    %551 = arith.divf %549, %550 : vector<2x32xf32>
    %552 = vector.extract_strided_slice %532 {offsets = [0, 64], sizes = [2, 32], strides = [1, 1]} : vector<2x96xf32> to vector<2x32xf32>
    %553 = vector.extract_strided_slice %535 {offsets = [0, 64], sizes = [2, 32], strides = [1, 1]} : vector<2x96xf32> to vector<2x32xf32>
    %554 = arith.mulf %543, %553 : vector<2x32xf32>
    %555 = arith.addf %552, %554 : vector<2x32xf32>
    %556 = math.tanh %555 : vector<2x32xf32>
    %cst_123 = arith.constant 1.000000e+00 : f32
    %557 = vector.broadcast %cst_123 : f32 to vector<2x32xf32>
    %558 = arith.subf %557, %551 : vector<2x32xf32>
    %559 = arith.mulf %558, %556 : vector<2x32xf32>
    %560 = arith.mulf %551, %530 : vector<2x32xf32>
    %561 = arith.addf %559, %560 : vector<2x32xf32>
    %c26 = arith.constant 26 : index
    %c0_124 = arith.constant 0 : index
    %562 = vector.load %arg5[%c26, %c0_124] : memref<42x32xf32, #tpu.memory_space<vmem>>, vector<2x32xf32>
    tpu.vector_store %arg5[%c26, %c0_124], %561 {strides = array<i32>} : memref<42x32xf32, #tpu.memory_space<vmem>>, vector<2x32xf32>,
    %563 = vector.extract_strided_slice %125 {offsets = [28, 0], sizes = [2, 96], strides = [1, 1]} : vector<42x96xf32> to vector<2x96xf32>
    %cst_125 = arith.constant dense<0.000000e+00> : vector<2x96xf32>
    %564 = tpu.matmul %561, %126, %cst_125 {dimension_numbers = #tpu.dot_dimension_numbers<[1], [0], [0], [1], [0, 0, 1, 1], [], []>} : vector<2x32xf32>, vector<32x96xf32>, vector<2x96xf32> -> vector<2x96xf32>
    %565 = vector.broadcast %127 : vector<1x96xf32> to vector<2x96xf32>
    %566 = arith.addf %564, %565 : vector<2x96xf32>
    %567 = vector.extract_strided_slice %563 {offsets = [0, 0], sizes = [2, 32], strides = [1, 1]} : vector<2x96xf32> to vector<2x32xf32>
    %568 = vector.extract_strided_slice %566 {offsets = [0, 0], sizes = [2, 32], strides = [1, 1]} : vector<2x96xf32> to vector<2x32xf32>
    %569 = arith.addf %567, %568 : vector<2x32xf32>
    %570 = arith.negf %569 : vector<2x32xf32>
    %571 = math.exp %570 : vector<2x32xf32>
    %cst_126 = arith.constant 1.000000e+00 : f32
    %572 = vector.broadcast %cst_126 : f32 to vector<2x32xf32>
    %573 = arith.addf %572, %571 : vector<2x32xf32>
    %574 = arith.divf %572, %573 : vector<2x32xf32>
    %575 = vector.extract_strided_slice %563 {offsets = [0, 32], sizes = [2, 32], strides = [1, 1]} : vector<2x96xf32> to vector<2x32xf32>
    %576 = vector.extract_strided_slice %566 {offsets = [0, 32], sizes = [2, 32], strides = [1, 1]} : vector<2x96xf32> to vector<2x32xf32>
    %577 = arith.addf %575, %576 : vector<2x32xf32>
    %578 = arith.negf %577 : vector<2x32xf32>
    %579 = math.exp %578 : vector<2x32xf32>
    %cst_127 = arith.constant 1.000000e+00 : f32
    %580 = vector.broadcast %cst_127 : f32 to vector<2x32xf32>
    %581 = arith.addf %580, %579 : vector<2x32xf32>
    %582 = arith.divf %580, %581 : vector<2x32xf32>
    %583 = vector.extract_strided_slice %563 {offsets = [0, 64], sizes = [2, 32], strides = [1, 1]} : vector<2x96xf32> to vector<2x32xf32>
    %584 = vector.extract_strided_slice %566 {offsets = [0, 64], sizes = [2, 32], strides = [1, 1]} : vector<2x96xf32> to vector<2x32xf32>
    %585 = arith.mulf %574, %584 : vector<2x32xf32>
    %586 = arith.addf %583, %585 : vector<2x32xf32>
    %587 = math.tanh %586 : vector<2x32xf32>
    %cst_128 = arith.constant 1.000000e+00 : f32
    %588 = vector.broadcast %cst_128 : f32 to vector<2x32xf32>
    %589 = arith.subf %588, %582 : vector<2x32xf32>
    %590 = arith.mulf %589, %587 : vector<2x32xf32>
    %591 = arith.mulf %582, %561 : vector<2x32xf32>
    %592 = arith.addf %590, %591 : vector<2x32xf32>
    %c28 = arith.constant 28 : index
    %c0_129 = arith.constant 0 : index
    %593 = vector.load %arg5[%c28, %c0_129] : memref<42x32xf32, #tpu.memory_space<vmem>>, vector<2x32xf32>
    tpu.vector_store %arg5[%c28, %c0_129], %592 {strides = array<i32>} : memref<42x32xf32, #tpu.memory_space<vmem>>, vector<2x32xf32>,
    %594 = vector.extract_strided_slice %125 {offsets = [30, 0], sizes = [2, 96], strides = [1, 1]} : vector<42x96xf32> to vector<2x96xf32>
    %cst_130 = arith.constant dense<0.000000e+00> : vector<2x96xf32>
    %595 = tpu.matmul %592, %126, %cst_130 {dimension_numbers = #tpu.dot_dimension_numbers<[1], [0], [0], [1], [0, 0, 1, 1], [], []>} : vector<2x32xf32>, vector<32x96xf32>, vector<2x96xf32> -> vector<2x96xf32>
    %596 = vector.broadcast %127 : vector<1x96xf32> to vector<2x96xf32>
    %597 = arith.addf %595, %596 : vector<2x96xf32>
    %598 = vector.extract_strided_slice %594 {offsets = [0, 0], sizes = [2, 32], strides = [1, 1]} : vector<2x96xf32> to vector<2x32xf32>
    %599 = vector.extract_strided_slice %597 {offsets = [0, 0], sizes = [2, 32], strides = [1, 1]} : vector<2x96xf32> to vector<2x32xf32>
    %600 = arith.addf %598, %599 : vector<2x32xf32>
    %601 = arith.negf %600 : vector<2x32xf32>
    %602 = math.exp %601 : vector<2x32xf32>
    %cst_131 = arith.constant 1.000000e+00 : f32
    %603 = vector.broadcast %cst_131 : f32 to vector<2x32xf32>
    %604 = arith.addf %603, %602 : vector<2x32xf32>
    %605 = arith.divf %603, %604 : vector<2x32xf32>
    %606 = vector.extract_strided_slice %594 {offsets = [0, 32], sizes = [2, 32], strides = [1, 1]} : vector<2x96xf32> to vector<2x32xf32>
    %607 = vector.extract_strided_slice %597 {offsets = [0, 32], sizes = [2, 32], strides = [1, 1]} : vector<2x96xf32> to vector<2x32xf32>
    %608 = arith.addf %606, %607 : vector<2x32xf32>
    %609 = arith.negf %608 : vector<2x32xf32>
    %610 = math.exp %609 : vector<2x32xf32>
    %cst_132 = arith.constant 1.000000e+00 : f32
    %611 = vector.broadcast %cst_132 : f32 to vector<2x32xf32>
    %612 = arith.addf %611, %610 : vector<2x32xf32>
    %613 = arith.divf %611, %612 : vector<2x32xf32>
    %614 = vector.extract_strided_slice %594 {offsets = [0, 64], sizes = [2, 32], strides = [1, 1]} : vector<2x96xf32> to vector<2x32xf32>
    %615 = vector.extract_strided_slice %597 {offsets = [0, 64], sizes = [2, 32], strides = [1, 1]} : vector<2x96xf32> to vector<2x32xf32>
    %616 = arith.mulf %605, %615 : vector<2x32xf32>
    %617 = arith.addf %614, %616 : vector<2x32xf32>
    %618 = math.tanh %617 : vector<2x32xf32>
    %cst_133 = arith.constant 1.000000e+00 : f32
    %619 = vector.broadcast %cst_133 : f32 to vector<2x32xf32>
    %620 = arith.subf %619, %613 : vector<2x32xf32>
    %621 = arith.mulf %620, %618 : vector<2x32xf32>
    %622 = arith.mulf %613, %592 : vector<2x32xf32>
    %623 = arith.addf %621, %622 : vector<2x32xf32>
    %c30 = arith.constant 30 : index
    %c0_134 = arith.constant 0 : index
    %624 = vector.load %arg5[%c30, %c0_134] : memref<42x32xf32, #tpu.memory_space<vmem>>, vector<2x32xf32>
    tpu.vector_store %arg5[%c30, %c0_134], %623 {strides = array<i32>} : memref<42x32xf32, #tpu.memory_space<vmem>>, vector<2x32xf32>,
    %625 = vector.extract_strided_slice %125 {offsets = [32, 0], sizes = [2, 96], strides = [1, 1]} : vector<42x96xf32> to vector<2x96xf32>
    %cst_135 = arith.constant dense<0.000000e+00> : vector<2x96xf32>
    %626 = tpu.matmul %623, %126, %cst_135 {dimension_numbers = #tpu.dot_dimension_numbers<[1], [0], [0], [1], [0, 0, 1, 1], [], []>} : vector<2x32xf32>, vector<32x96xf32>, vector<2x96xf32> -> vector<2x96xf32>
    %627 = vector.broadcast %127 : vector<1x96xf32> to vector<2x96xf32>
    %628 = arith.addf %626, %627 : vector<2x96xf32>
    %629 = vector.extract_strided_slice %625 {offsets = [0, 0], sizes = [2, 32], strides = [1, 1]} : vector<2x96xf32> to vector<2x32xf32>
    %630 = vector.extract_strided_slice %628 {offsets = [0, 0], sizes = [2, 32], strides = [1, 1]} : vector<2x96xf32> to vector<2x32xf32>
    %631 = arith.addf %629, %630 : vector<2x32xf32>
    %632 = arith.negf %631 : vector<2x32xf32>
    %633 = math.exp %632 : vector<2x32xf32>
    %cst_136 = arith.constant 1.000000e+00 : f32
    %634 = vector.broadcast %cst_136 : f32 to vector<2x32xf32>
    %635 = arith.addf %634, %633 : vector<2x32xf32>
    %636 = arith.divf %634, %635 : vector<2x32xf32>
    %637 = vector.extract_strided_slice %625 {offsets = [0, 32], sizes = [2, 32], strides = [1, 1]} : vector<2x96xf32> to vector<2x32xf32>
    %638 = vector.extract_strided_slice %628 {offsets = [0, 32], sizes = [2, 32], strides = [1, 1]} : vector<2x96xf32> to vector<2x32xf32>
    %639 = arith.addf %637, %638 : vector<2x32xf32>
    %640 = arith.negf %639 : vector<2x32xf32>
    %641 = math.exp %640 : vector<2x32xf32>
    %cst_137 = arith.constant 1.000000e+00 : f32
    %642 = vector.broadcast %cst_137 : f32 to vector<2x32xf32>
    %643 = arith.addf %642, %641 : vector<2x32xf32>
    %644 = arith.divf %642, %643 : vector<2x32xf32>
    %645 = vector.extract_strided_slice %625 {offsets = [0, 64], sizes = [2, 32], strides = [1, 1]} : vector<2x96xf32> to vector<2x32xf32>
    %646 = vector.extract_strided_slice %628 {offsets = [0, 64], sizes = [2, 32], strides = [1, 1]} : vector<2x96xf32> to vector<2x32xf32>
    %647 = arith.mulf %636, %646 : vector<2x32xf32>
    %648 = arith.addf %645, %647 : vector<2x32xf32>
    %649 = math.tanh %648 : vector<2x32xf32>
    %cst_138 = arith.constant 1.000000e+00 : f32
    %650 = vector.broadcast %cst_138 : f32 to vector<2x32xf32>
    %651 = arith.subf %650, %644 : vector<2x32xf32>
    %652 = arith.mulf %651, %649 : vector<2x32xf32>
    %653 = arith.mulf %644, %623 : vector<2x32xf32>
    %654 = arith.addf %652, %653 : vector<2x32xf32>
    %c32 = arith.constant 32 : index
    %c0_139 = arith.constant 0 : index
    %655 = vector.load %arg5[%c32, %c0_139] : memref<42x32xf32, #tpu.memory_space<vmem>>, vector<2x32xf32>
    tpu.vector_store %arg5[%c32, %c0_139], %654 {strides = array<i32>} : memref<42x32xf32, #tpu.memory_space<vmem>>, vector<2x32xf32>,
    %656 = vector.extract_strided_slice %125 {offsets = [34, 0], sizes = [2, 96], strides = [1, 1]} : vector<42x96xf32> to vector<2x96xf32>
    %cst_140 = arith.constant dense<0.000000e+00> : vector<2x96xf32>
    %657 = tpu.matmul %654, %126, %cst_140 {dimension_numbers = #tpu.dot_dimension_numbers<[1], [0], [0], [1], [0, 0, 1, 1], [], []>} : vector<2x32xf32>, vector<32x96xf32>, vector<2x96xf32> -> vector<2x96xf32>
    %658 = vector.broadcast %127 : vector<1x96xf32> to vector<2x96xf32>
    %659 = arith.addf %657, %658 : vector<2x96xf32>
    %660 = vector.extract_strided_slice %656 {offsets = [0, 0], sizes = [2, 32], strides = [1, 1]} : vector<2x96xf32> to vector<2x32xf32>
    %661 = vector.extract_strided_slice %659 {offsets = [0, 0], sizes = [2, 32], strides = [1, 1]} : vector<2x96xf32> to vector<2x32xf32>
    %662 = arith.addf %660, %661 : vector<2x32xf32>
    %663 = arith.negf %662 : vector<2x32xf32>
    %664 = math.exp %663 : vector<2x32xf32>
    %cst_141 = arith.constant 1.000000e+00 : f32
    %665 = vector.broadcast %cst_141 : f32 to vector<2x32xf32>
    %666 = arith.addf %665, %664 : vector<2x32xf32>
    %667 = arith.divf %665, %666 : vector<2x32xf32>
    %668 = vector.extract_strided_slice %656 {offsets = [0, 32], sizes = [2, 32], strides = [1, 1]} : vector<2x96xf32> to vector<2x32xf32>
    %669 = vector.extract_strided_slice %659 {offsets = [0, 32], sizes = [2, 32], strides = [1, 1]} : vector<2x96xf32> to vector<2x32xf32>
    %670 = arith.addf %668, %669 : vector<2x32xf32>
    %671 = arith.negf %670 : vector<2x32xf32>
    %672 = math.exp %671 : vector<2x32xf32>
    %cst_142 = arith.constant 1.000000e+00 : f32
    %673 = vector.broadcast %cst_142 : f32 to vector<2x32xf32>
    %674 = arith.addf %673, %672 : vector<2x32xf32>
    %675 = arith.divf %673, %674 : vector<2x32xf32>
    %676 = vector.extract_strided_slice %656 {offsets = [0, 64], sizes = [2, 32], strides = [1, 1]} : vector<2x96xf32> to vector<2x32xf32>
    %677 = vector.extract_strided_slice %659 {offsets = [0, 64], sizes = [2, 32], strides = [1, 1]} : vector<2x96xf32> to vector<2x32xf32>
    %678 = arith.mulf %667, %677 : vector<2x32xf32>
    %679 = arith.addf %676, %678 : vector<2x32xf32>
    %680 = math.tanh %679 : vector<2x32xf32>
    %cst_143 = arith.constant 1.000000e+00 : f32
    %681 = vector.broadcast %cst_143 : f32 to vector<2x32xf32>
    %682 = arith.subf %681, %675 : vector<2x32xf32>
    %683 = arith.mulf %682, %680 : vector<2x32xf32>
    %684 = arith.mulf %675, %654 : vector<2x32xf32>
    %685 = arith.addf %683, %684 : vector<2x32xf32>
    %c34 = arith.constant 34 : index
    %c0_144 = arith.constant 0 : index
    %686 = vector.load %arg5[%c34, %c0_144] : memref<42x32xf32, #tpu.memory_space<vmem>>, vector<2x32xf32>
    tpu.vector_store %arg5[%c34, %c0_144], %685 {strides = array<i32>} : memref<42x32xf32, #tpu.memory_space<vmem>>, vector<2x32xf32>,
    %687 = vector.extract_strided_slice %125 {offsets = [36, 0], sizes = [2, 96], strides = [1, 1]} : vector<42x96xf32> to vector<2x96xf32>
    %cst_145 = arith.constant dense<0.000000e+00> : vector<2x96xf32>
    %688 = tpu.matmul %685, %126, %cst_145 {dimension_numbers = #tpu.dot_dimension_numbers<[1], [0], [0], [1], [0, 0, 1, 1], [], []>} : vector<2x32xf32>, vector<32x96xf32>, vector<2x96xf32> -> vector<2x96xf32>
    %689 = vector.broadcast %127 : vector<1x96xf32> to vector<2x96xf32>
    %690 = arith.addf %688, %689 : vector<2x96xf32>
    %691 = vector.extract_strided_slice %687 {offsets = [0, 0], sizes = [2, 32], strides = [1, 1]} : vector<2x96xf32> to vector<2x32xf32>
    %692 = vector.extract_strided_slice %690 {offsets = [0, 0], sizes = [2, 32], strides = [1, 1]} : vector<2x96xf32> to vector<2x32xf32>
    %693 = arith.addf %691, %692 : vector<2x32xf32>
    %694 = arith.negf %693 : vector<2x32xf32>
    %695 = math.exp %694 : vector<2x32xf32>
    %cst_146 = arith.constant 1.000000e+00 : f32
    %696 = vector.broadcast %cst_146 : f32 to vector<2x32xf32>
    %697 = arith.addf %696, %695 : vector<2x32xf32>
    %698 = arith.divf %696, %697 : vector<2x32xf32>
    %699 = vector.extract_strided_slice %687 {offsets = [0, 32], sizes = [2, 32], strides = [1, 1]} : vector<2x96xf32> to vector<2x32xf32>
    %700 = vector.extract_strided_slice %690 {offsets = [0, 32], sizes = [2, 32], strides = [1, 1]} : vector<2x96xf32> to vector<2x32xf32>
    %701 = arith.addf %699, %700 : vector<2x32xf32>
    %702 = arith.negf %701 : vector<2x32xf32>
    %703 = math.exp %702 : vector<2x32xf32>
    %cst_147 = arith.constant 1.000000e+00 : f32
    %704 = vector.broadcast %cst_147 : f32 to vector<2x32xf32>
    %705 = arith.addf %704, %703 : vector<2x32xf32>
    %706 = arith.divf %704, %705 : vector<2x32xf32>
    %707 = vector.extract_strided_slice %687 {offsets = [0, 64], sizes = [2, 32], strides = [1, 1]} : vector<2x96xf32> to vector<2x32xf32>
    %708 = vector.extract_strided_slice %690 {offsets = [0, 64], sizes = [2, 32], strides = [1, 1]} : vector<2x96xf32> to vector<2x32xf32>
    %709 = arith.mulf %698, %708 : vector<2x32xf32>
    %710 = arith.addf %707, %709 : vector<2x32xf32>
    %711 = math.tanh %710 : vector<2x32xf32>
    %cst_148 = arith.constant 1.000000e+00 : f32
    %712 = vector.broadcast %cst_148 : f32 to vector<2x32xf32>
    %713 = arith.subf %712, %706 : vector<2x32xf32>
    %714 = arith.mulf %713, %711 : vector<2x32xf32>
    %715 = arith.mulf %706, %685 : vector<2x32xf32>
    %716 = arith.addf %714, %715 : vector<2x32xf32>
    %c36 = arith.constant 36 : index
    %c0_149 = arith.constant 0 : index
    %717 = vector.load %arg5[%c36, %c0_149] : memref<42x32xf32, #tpu.memory_space<vmem>>, vector<2x32xf32>
    tpu.vector_store %arg5[%c36, %c0_149], %716 {strides = array<i32>} : memref<42x32xf32, #tpu.memory_space<vmem>>, vector<2x32xf32>,
    %718 = vector.extract_strided_slice %125 {offsets = [38, 0], sizes = [2, 96], strides = [1, 1]} : vector<42x96xf32> to vector<2x96xf32>
    %cst_150 = arith.constant dense<0.000000e+00> : vector<2x96xf32>
    %719 = tpu.matmul %716, %126, %cst_150 {dimension_numbers = #tpu.dot_dimension_numbers<[1], [0], [0], [1], [0, 0, 1, 1], [], []>} : vector<2x32xf32>, vector<32x96xf32>, vector<2x96xf32> -> vector<2x96xf32>
    %720 = vector.broadcast %127 : vector<1x96xf32> to vector<2x96xf32>
    %721 = arith.addf %719, %720 : vector<2x96xf32>
    %722 = vector.extract_strided_slice %718 {offsets = [0, 0], sizes = [2, 32], strides = [1, 1]} : vector<2x96xf32> to vector<2x32xf32>
    %723 = vector.extract_strided_slice %721 {offsets = [0, 0], sizes = [2, 32], strides = [1, 1]} : vector<2x96xf32> to vector<2x32xf32>
    %724 = arith.addf %722, %723 : vector<2x32xf32>
    %725 = arith.negf %724 : vector<2x32xf32>
    %726 = math.exp %725 : vector<2x32xf32>
    %cst_151 = arith.constant 1.000000e+00 : f32
    %727 = vector.broadcast %cst_151 : f32 to vector<2x32xf32>
    %728 = arith.addf %727, %726 : vector<2x32xf32>
    %729 = arith.divf %727, %728 : vector<2x32xf32>
    %730 = vector.extract_strided_slice %718 {offsets = [0, 32], sizes = [2, 32], strides = [1, 1]} : vector<2x96xf32> to vector<2x32xf32>
    %731 = vector.extract_strided_slice %721 {offsets = [0, 32], sizes = [2, 32], strides = [1, 1]} : vector<2x96xf32> to vector<2x32xf32>
    %732 = arith.addf %730, %731 : vector<2x32xf32>
    %733 = arith.negf %732 : vector<2x32xf32>
    %734 = math.exp %733 : vector<2x32xf32>
    %cst_152 = arith.constant 1.000000e+00 : f32
    %735 = vector.broadcast %cst_152 : f32 to vector<2x32xf32>
    %736 = arith.addf %735, %734 : vector<2x32xf32>
    %737 = arith.divf %735, %736 : vector<2x32xf32>
    %738 = vector.extract_strided_slice %718 {offsets = [0, 64], sizes = [2, 32], strides = [1, 1]} : vector<2x96xf32> to vector<2x32xf32>
    %739 = vector.extract_strided_slice %721 {offsets = [0, 64], sizes = [2, 32], strides = [1, 1]} : vector<2x96xf32> to vector<2x32xf32>
    %740 = arith.mulf %729, %739 : vector<2x32xf32>
    %741 = arith.addf %738, %740 : vector<2x32xf32>
    %742 = math.tanh %741 : vector<2x32xf32>
    %cst_153 = arith.constant 1.000000e+00 : f32
    %743 = vector.broadcast %cst_153 : f32 to vector<2x32xf32>
    %744 = arith.subf %743, %737 : vector<2x32xf32>
    %745 = arith.mulf %744, %742 : vector<2x32xf32>
    %746 = arith.mulf %737, %716 : vector<2x32xf32>
    %747 = arith.addf %745, %746 : vector<2x32xf32>
    %c38 = arith.constant 38 : index
    %c0_154 = arith.constant 0 : index
    %748 = vector.load %arg5[%c38, %c0_154] : memref<42x32xf32, #tpu.memory_space<vmem>>, vector<2x32xf32>
    tpu.vector_store %arg5[%c38, %c0_154], %747 {strides = array<i32>} : memref<42x32xf32, #tpu.memory_space<vmem>>, vector<2x32xf32>,
    %749 = vector.extract_strided_slice %125 {offsets = [40, 0], sizes = [2, 96], strides = [1, 1]} : vector<42x96xf32> to vector<2x96xf32>
    %cst_155 = arith.constant dense<0.000000e+00> : vector<2x96xf32>
    %750 = tpu.matmul %747, %126, %cst_155 {dimension_numbers = #tpu.dot_dimension_numbers<[1], [0], [0], [1], [0, 0, 1, 1], [], []>} : vector<2x32xf32>, vector<32x96xf32>, vector<2x96xf32> -> vector<2x96xf32>
    %751 = vector.broadcast %127 : vector<1x96xf32> to vector<2x96xf32>
    %752 = arith.addf %750, %751 : vector<2x96xf32>
    %753 = vector.extract_strided_slice %749 {offsets = [0, 0], sizes = [2, 32], strides = [1, 1]} : vector<2x96xf32> to vector<2x32xf32>
    %754 = vector.extract_strided_slice %752 {offsets = [0, 0], sizes = [2, 32], strides = [1, 1]} : vector<2x96xf32> to vector<2x32xf32>
    %755 = arith.addf %753, %754 : vector<2x32xf32>
    %756 = arith.negf %755 : vector<2x32xf32>
    %757 = math.exp %756 : vector<2x32xf32>
    %cst_156 = arith.constant 1.000000e+00 : f32
    %758 = vector.broadcast %cst_156 : f32 to vector<2x32xf32>
    %759 = arith.addf %758, %757 : vector<2x32xf32>
    %760 = arith.divf %758, %759 : vector<2x32xf32>
    %761 = vector.extract_strided_slice %749 {offsets = [0, 32], sizes = [2, 32], strides = [1, 1]} : vector<2x96xf32> to vector<2x32xf32>
    %762 = vector.extract_strided_slice %752 {offsets = [0, 32], sizes = [2, 32], strides = [1, 1]} : vector<2x96xf32> to vector<2x32xf32>
    %763 = arith.addf %761, %762 : vector<2x32xf32>
    %764 = arith.negf %763 : vector<2x32xf32>
    %765 = math.exp %764 : vector<2x32xf32>
    %cst_157 = arith.constant 1.000000e+00 : f32
    %766 = vector.broadcast %cst_157 : f32 to vector<2x32xf32>
    %767 = arith.addf %766, %765 : vector<2x32xf32>
    %768 = arith.divf %766, %767 : vector<2x32xf32>
    %769 = vector.extract_strided_slice %749 {offsets = [0, 64], sizes = [2, 32], strides = [1, 1]} : vector<2x96xf32> to vector<2x32xf32>
    %770 = vector.extract_strided_slice %752 {offsets = [0, 64], sizes = [2, 32], strides = [1, 1]} : vector<2x96xf32> to vector<2x32xf32>
    %771 = arith.mulf %760, %770 : vector<2x32xf32>
    %772 = arith.addf %769, %771 : vector<2x32xf32>
    %773 = math.tanh %772 : vector<2x32xf32>
    %cst_158 = arith.constant 1.000000e+00 : f32
    %774 = vector.broadcast %cst_158 : f32 to vector<2x32xf32>
    %775 = arith.subf %774, %768 : vector<2x32xf32>
    %776 = arith.mulf %775, %773 : vector<2x32xf32>
    %777 = arith.mulf %768, %747 : vector<2x32xf32>
    %778 = arith.addf %776, %777 : vector<2x32xf32>
    %c40 = arith.constant 40 : index
    %c0_159 = arith.constant 0 : index
    %779 = vector.load %arg5[%c40, %c0_159] : memref<42x32xf32, #tpu.memory_space<vmem>>, vector<2x32xf32>
    tpu.vector_store %arg5[%c40, %c0_159], %778 {strides = array<i32>} : memref<42x32xf32, #tpu.memory_space<vmem>>, vector<2x32xf32>,
    %c0_160 = arith.constant 0 : index
    %c0_161 = arith.constant 0 : index
    %780 = vector.load %arg5[%c0_160, %c0_161] : memref<42x32xf32, #tpu.memory_space<vmem>>, vector<42x32xf32>
    %c5 = arith.constant 5 : index
    %c0_162 = arith.constant 0 : index
    %781 = vector.load %arg3[%c5, %c0_162] : memref<352x128xf32, #tpu.memory_space<vmem>>, vector<1x32xf32>
    %c6_163 = arith.constant 6 : index
    %c0_164 = arith.constant 0 : index
    %782 = vector.load %arg3[%c6_163, %c0_164] : memref<352x128xf32, #tpu.memory_space<vmem>>, vector<1x1xf32>
    %783 = vector.broadcast %781 : vector<1x32xf32> to vector<42x32xf32>
    %784 = arith.mulf %780, %783 : vector<42x32xf32>
    %cst_165 = arith.constant dense<0.000000e+00> : vector<42xf32>
    %785 = vector.multi_reduction <add>, %784, %cst_165 [1] : vector<42x32xf32> to vector<42xf32>
    %786 = vector.shape_cast %785 : vector<42xf32> to vector<42x1xf32>
    %787 = vector.broadcast %782 : vector<1x1xf32> to vector<42x1xf32>
    %788 = arith.addf %786, %787 : vector<42x1xf32>
    %c304_166 = arith.constant 304 : index
    %c0_167 = arith.constant 0 : index
    %789 = vector.load %arg3[%c304_166, %c0_167] : memref<352x128xf32, #tpu.memory_space<vmem>>, vector<42x1xf32>
    %cst_168 = arith.constant 1.000000e+00 : f32
    %790 = vector.broadcast %cst_168 : f32 to vector<42x1xf32>
    %791 = arith.subf %789, %790 : vector<42x1xf32>
    %cst_169 = arith.constant 1.000000e+30 : f32
    %792 = vector.broadcast %cst_169 : f32 to vector<42x1xf32>
    %793 = arith.mulf %791, %792 : vector<42x1xf32>
    %794 = arith.addf %788, %793 : vector<42x1xf32>
    %cst_170 = arith.constant dense<0xFF800000> : vector<1xf32>
    %795 = vector.multi_reduction <maximumf>, %794, %cst_170 [0] : vector<42x1xf32> to vector<1xf32>
    %796 = vector.shape_cast %795 : vector<1xf32> to vector<1x1xf32>
    %797 = vector.broadcast %796 : vector<1x1xf32> to vector<42x1xf32>
    %798 = arith.subf %794, %797 : vector<42x1xf32>
    %799 = math.exp %798 : vector<42x1xf32>
    %800 = arith.mulf %799, %789 : vector<42x1xf32>
    %cst_171 = arith.constant dense<0.000000e+00> : vector<1xf32>
    %801 = vector.multi_reduction <add>, %800, %cst_171 [0] : vector<42x1xf32> to vector<1xf32>
    %802 = vector.shape_cast %801 : vector<1xf32> to vector<1x1xf32>
    %803 = vector.broadcast %800 : vector<42x1xf32> to vector<42x32xf32>
    %804 = arith.mulf %803, %780 : vector<42x32xf32>
    %cst_172 = arith.constant dense<0.000000e+00> : vector<32xf32>
    %805 = vector.multi_reduction <add>, %804, %cst_172 [0] : vector<42x32xf32> to vector<32xf32>
    %806 = vector.shape_cast %805 : vector<32xf32> to vector<1x32xf32>
    %807 = vector.broadcast %802 : vector<1x1xf32> to vector<1x32xf32>
    %808 = arith.divf %806, %807 : vector<1x32xf32>
    %c304_173 = arith.constant 304 : index
    %c1_174 = arith.constant 1 : index
    %809 = vector.load %arg3[%c304_173, %c1_174] : memref<352x128xf32, #tpu.memory_space<vmem>>, vector<42x1xf32>
    %cst_175 = arith.constant 1.000000e+00 : f32
    %810 = vector.broadcast %cst_175 : f32 to vector<42x1xf32>
    %811 = arith.subf %809, %810 : vector<42x1xf32>
    %cst_176 = arith.constant 1.000000e+30 : f32
    %812 = vector.broadcast %cst_176 : f32 to vector<42x1xf32>
    %813 = arith.mulf %811, %812 : vector<42x1xf32>
    %814 = arith.addf %788, %813 : vector<42x1xf32>
    %cst_177 = arith.constant dense<0xFF800000> : vector<1xf32>
    %815 = vector.multi_reduction <maximumf>, %814, %cst_177 [0] : vector<42x1xf32> to vector<1xf32>
    %816 = vector.shape_cast %815 : vector<1xf32> to vector<1x1xf32>
    %817 = vector.broadcast %816 : vector<1x1xf32> to vector<42x1xf32>
    %818 = arith.subf %814, %817 : vector<42x1xf32>
    %819 = math.exp %818 : vector<42x1xf32>
    %820 = arith.mulf %819, %809 : vector<42x1xf32>
    %cst_178 = arith.constant dense<0.000000e+00> : vector<1xf32>
    %821 = vector.multi_reduction <add>, %820, %cst_178 [0] : vector<42x1xf32> to vector<1xf32>
    %822 = vector.shape_cast %821 : vector<1xf32> to vector<1x1xf32>
    %823 = vector.broadcast %820 : vector<42x1xf32> to vector<42x32xf32>
    %824 = arith.mulf %823, %780 : vector<42x32xf32>
    %cst_179 = arith.constant dense<0.000000e+00> : vector<32xf32>
    %825 = vector.multi_reduction <add>, %824, %cst_179 [0] : vector<42x32xf32> to vector<32xf32>
    %826 = vector.shape_cast %825 : vector<32xf32> to vector<1x32xf32>
    %827 = vector.broadcast %822 : vector<1x1xf32> to vector<1x32xf32>
    %828 = arith.divf %826, %827 : vector<1x32xf32>
    %829 = tpu.concatenate %808, %828 in 0 : vector<1x32xf32>, vector<1x32xf32> -> vector<2x32xf32>
    %c1280 = arith.constant 1280 : index
    %c0_180 = arith.constant 0 : index
    %830 = vector.load %arg2[%c1280, %c0_180] : memref<1312x128xbf16, #tpu.memory_space<vmem>>, vector<32x128xbf16>
    %c7 = arith.constant 7 : index
    %c0_181 = arith.constant 0 : index
    %831 = vector.load %arg3[%c7, %c0_181] : memref<352x128xf32, #tpu.memory_space<vmem>>, vector<1x128xf32>
    %832 = arith.truncf %829 : vector<2x32xf32> to vector<2x32xbf16>
    %cst_182 = arith.constant dense<0.000000e+00> : vector<2x128xf32>
    %833 = tpu.matmul %832, %830, %cst_182 {dimension_numbers = #tpu.dot_dimension_numbers<[1], [0], [0], [1], [0, 0, 1, 1], [], []>} : vector<2x32xbf16>, vector<32x128xbf16>, vector<2x128xf32> -> vector<2x128xf32>
    %834 = vector.broadcast %831 : vector<1x128xf32> to vector<2x128xf32>
    %835 = arith.addf %833, %834 : vector<2x128xf32>
    %c0_183 = arith.constant 0 : index
    %c0_184 = arith.constant 0 : index
    %c0_185 = arith.constant 0 : index
    %836 = vector.load %arg4[%c0_183, %c0_184, %c0_185] : memref<1x2x128xf32, #tpu.memory_space<vmem>>, vector<1x2x128xf32>
    %837 = vector.shape_cast %836 : vector<1x2x128xf32> to vector<2x128xf32>
    %838 = vector.shape_cast %835 : vector<2x128xf32> to vector<1x2x128xf32>
    tpu.vector_store %arg4[%c0_183, %c0_184, %c0_185], %838 {strides = array<i32>} : memref<1x2x128xf32, #tpu.memory_space<vmem>>, vector<1x2x128xf32>,
    return
  }
  func.func @transform_0(%arg0: i32) -> (i32, i32, i32) {
    %c0_i32 = arith.constant 0 : i32
    %c0_i32_0 = arith.constant 0 : i32
    %c0_i32_1 = arith.constant 0 : i32
    return %arg0, %c0_i32, %c0_i32_0 : i32, i32, i32
  }
  func.func @transform_1(%arg0: i32) -> (i32, i32) {
    %c0_i32 = arith.constant 0 : i32
    %c0_i32_0 = arith.constant 0 : i32
    %c0_i32_1 = arith.constant 0 : i32
    return %c0_i32, %c0_i32_0 : i32, i32
  }
  func.func @transform_2(%arg0: i32) -> (i32, i32) {
    %c0_i32 = arith.constant 0 : i32
    %c0_i32_0 = arith.constant 0 : i32
    %c0_i32_1 = arith.constant 0 : i32
    return %c0_i32, %c0_i32_0 : i32, i32
  }
  func.func @transform_3(%arg0: i32) -> (i32, i32, i32) {
    %c0_i32 = arith.constant 0 : i32
    %c0_i32_0 = arith.constant 0 : i32
    %c0_i32_1 = arith.constant 0 : i32
    return %arg0, %c0_i32, %c0_i32_0 : i32, i32, i32
  }
}

</mosaic_0001>

<bundles_post_ra>
// kernel: reverse
= control target key start
LH: loop header
LB: loop body
LE: loop exit
PB: predicated region body
PF: predicated region fallthrough
CT: control target
= control target key end

     0   :  { %v2_v0 = vlaneseq  ;;  %s315_s0 = inlined_call_operand.vmem [shape: f32[4,256], index: 0, kind: input, shape index: {}]   ;;  %s316_s1 = inlined_call_operand.vmem [shape: f32[4,256], index: 1, kind: output, shape index: {}]  }
   0x2   :  { %v3_v1 = vsub.s32 127, %v2_v0 }
   0x4   :  { %4 = vset.pattern.permute.xlu0 %v3_v1 }
   0x5   :  { %s275_s6 = smov 0   ;;  %s277_s7 = smov 0  }
   0x6   :  { %s279_s8 = smov 0  }
   0x7 LB: > { %s205_s9 = sadd.s32 4294967295, %s263_s8   ;;  %s19_s10 = sadd.s32 1, %s259_s7  ;;  %s263_s8 = sphi %s279_s8, %s10_s8   ;;  %s259_s7 = sphi %s277_s7, %s318_s7   ;;  %s255_s6 = sphi %s275_s6, %s317_s6  }
   0x8   : > { %p20_p0 = scmp.ge.s32.totalorder %s19_s10, 2  ;;  %p207_p1 = scmp.ge.s32.totalorder %s263_s8, 2 }
   0x9   : > { %s38_s11 = sand.u32 (!%p207_p1), 1, %s263_s8   ;;  %s41_s12 = ssub.s32 (!%p207_p1), 1, %s259_s7 }
   0xa   : > { %s320_s10 = smov (%p20_p0, %s19_s10), 0  ;;  %36 = sbr.rel (%p207_p1) target bundleno = 17 (0x11), region = 16 }
   0xb   : > { %s208_s13 = sshll.u32 (!%p207_p1), %s38_s11, 2  ;;  %s209_s14 = sshll.u32 (!%p207_p1), %s41_s12, 2 }
   0xc   : > { %s45_s17 = scalar_lea.vmem (!%p207_p1), %s315_s0, %s209_s14  ;;  %s40_s18 = scalar_lea.vmem (!%p207_p1), [#allocation1], %s208_s13 }
   0xf   : > { %v62_v2 = vld [vmem:[%s45_s17] sm:$0xf] }
  0x10   : > { %63 = vst [vmem:[%s40_s18] sm:$0xf] %v62_v2 }
  0x11 PF: > { %p210_p2 = scmp.ge.s32.totalorder %s263_s8, 1  ;;  %p80_p3 = scmp.lt.s32.totalorder %s263_s8, 3 }
  0x13   : > { %p81_p4 = pnand %p210_p2, %p80_p3 }
  0x14   : > { %s91_s19 = sand.u32 (!%p81_p4), 1, %s205_s9   ;;  %s214_s23 = sshll.u32 (!%p81_p4), %s255_s6, 2 }
  0x15   : > { %84 = sbr.rel (%p81_p4) target bundleno = 167 (0xa7), region = 50  ;;  %s211_s20 = sshll.u32 (!%p81_p4), %s91_s19, 2 }
  0x16   : > { %s93_s21 = scalar_lea.vmem (!%p81_p4), [#allocation1], %s211_s20  ;;  %s97_s22 = scalar_lea.vmem (!%p81_p4), [#allocation3], %s211_s20 }
  0x17   : > { %s120_s26 = scalar_lea.vmem (!%p81_p4), %s316_s1, %s214_s23 }
  0x1a   : > { %v100_v3 = vld [vmem:[%s93_s21] sm:$0xf] }
  0x1b   : > { %101 = vst [vmem:[#allocation0] sm:$0xf] %v100_v3 }
  0x22   : > { %v103_v4 = vld [vmem:[#allocation0] sm:$0xff] }
  0x23   : > { %104 = vperm.xlu0 %4, %v103_v4  }
  0x95   : > { %v105_v5 = vpop.permute.xlu0 %104 }
  0x96   : > { %106 = vst [vmem:[#allocation2] sm:$0xff] %v105_v5 }
  0x9d   : > { %v109_v6 = vld [vmem:[#allocation2] sm:$0xf] }
  0x9e   : > { %112 = vst [vmem:[%s97_s22] sm:$0xf] %v109_v6 }
  0xa5   : > { %v137_v7 = vld [vmem:[%s97_s22] sm:$0xf] }
  0xa6   : > { %138 = vst [vmem:[%s120_s26] sm:$0xf] %v137_v7 }
  0xa7 PF: > { %s10_s8 = sadd.s32 1, %s263_s8   ;;  %s317_s6 = smov %s259_s7 }
  0xa8   : > { %p7_p5 = scmp.ge.s32.totalorder %s10_s8, 4   ;;  %s318_s7 = smov %s320_s10 }
  0xaa   :  { %9 = sbr.rel (!%p7_p5) target bundleno = 7 (0x7), region = 110 }

// kernel: forward.1
= control target key start
LH: loop header
LB: loop body
LE: loop exit
PB: predicated region body
PF: predicated region fallthrough
CT: control target
= control target key end

     0   :  { %8 = vsyncpa [#allocation4], 0  ;;  %s5864_s0 = inlined_call_operand.vmem [shape: f32[2,42,256], index: 0, kind: input, shape index: {}]   ;;  %s5865_s1 = inlined_call_operand.vmem [shape: bf16[1312,128], index: 1, kind: input, shape index: {}]   ;;  %s5866_s2 = inlined_call_operand.vmem [shape: f32[352,128], index: 2, kind: input, shape index: {}]   ;;  %s5867_s3 = inlined_call_operand.hbm [shape: f32[2,2,128], index: 3, kind: output, shape index: {}]  }
   0x1   :  { %10 = vsyncpa [#allocation4 + $0x1], 0  ;;  %s4496_s12 = smov 0   ;;  %s4498_s13 = smov 0  }
   0x2   :  { %s4500_s14 = smov 0   ;;  %s4502_s15 = smov 0  }
   0x3 LB: > { %s4517_s16 = sadd.s32 4294967295, %s4467_s15   ;;  %s3681_s17 = sadd.s32 4294967294, %s4467_s15   ;;  %s4467_s15 = sphi %s4502_s15, %s5875_s15   ;;  %s4463_s14 = sphi %s4500_s14, %s5874_s14   ;;  %s4459_s13 = sphi %s4498_s13, %s5873_s13   ;;  %s4455_s12 = sphi %s4496_s12, %s5872_s12  }
   0x4   : > { %s4521_s18 = sadd.s32 1, %s4467_s15   ;;  %s91_s19 = sadd.s32 1, %s4463_s14 }
   0x5   : > { %s88_s20 = ssub.s32 %s4467_s15, %s4521_s18  ;;  %p101_p0 = scmp.ne.s32.totalorder %s4463_s14, %s4459_s13 }
   0x6   : > { %p89_p1 = scmp.eq.s32.totalorder %s88_s20, 0  ;;  %p102_p2 = scmp.eq.s32.totalorder %s4517_s16, 1 }
   0x7   : > { %p107_p3 = scmp.ne.s32.totalorder %s4459_s13, %s4455_s12  ;;  %p108_p4 = scmp.eq.s32.totalorder %s3681_s17, 1 }
   0x8   : > { %s4532_s21 = scalar_select %p89_p1, %s4463_s14, %s91_s19  }
   0x9   : > { %p4534_p5 = por %p102_p2, %p101_p0  ;;  %p4538_p6 = por %p108_p4, %p107_p3 }
   0xa   : > { %p3684_p7 = scmp.ge.s32.totalorder %s4467_s15, 1  ;;  %p140_p8 = scmp.lt.s32.totalorder %s4467_s15, 3 }
   0xc   : > { %p141_p9 = pnand %p3684_p7, %p140_p8 }
   0xd   : > { %p164_p10 = scmp.lt.s32.totalorder (!%p141_p9), %s4517_s16, 1  ;;  %s4473_s4 = smov (!%p141_p9), 64  }
   0xe   : > { %144 = sbr.rel (%p141_p9) target bundleno = 13626 (0x353a), region = 32  ;;  %s4474_s8 = smov (!%p141_p9), 96  }
   0xf   : > { %s4475_s6 = smov (!%p141_p9), 127   ;;  %s161_s5 = sand.u32 (!%p141_p9), 1, %s4459_s13  }
  0x10   : > { %s3685_s9 = sshll.u32 (!%p141_p9), %s161_s5, 1  ;;  %s3607_s25 = scalar_lea.sflag (!%p141_p9), [#allocation4], %s161_s5 }
  0x11   : > { %s163_s20 = scalar_lea.vmem (!%p141_p9), [#allocation3], %s3685_s9  ;;  %s4425_s29 = scalar_lea.hbm (!%p141_p9), %s5867_s3, 4 }
  0x12   : > { %s3619_s24 = sshll.u32 (!%p141_p9), %s163_s20, 4  ;;  %s3620_s24 = int_to_ptr.vmem [resolvable:$true] %s3619_s24 }
  0x13   : > { %v197_v0 = vld [vmem:[%s5866_s2 + $0xa8] sm:$0xff]  ;;  %v196_v2 = vld [vmem:[%s5866_s2 + $0xa0] sm:$0xff]  ;;  %v195_v4 = vld [vmem:[%s5866_s2 + $0x98] sm:$0xff]  ;;  %v4469_v14 = vmov 0   ;;  %s165_s7 = scalar_select %p164_p10, %s4517_s16, 1  ;;  %v4470_v24 = vmov 1  }
  0x14   : > { %v213_v1 = vld [vmem:[%s5866_s2 + $0x128] sm:$0xff]  ;;  %214 = vmatpush.msra.mxu0 %v197_v0  ;;  %v212_v3 = vld [vmem:[%s5866_s2 + $0x120] sm:$0xff]  ;;  %v211_v5 = vld [vmem:[%s5866_s2 + $0x118] sm:$0xff]  ;;  %4208 = vset.pattern.permute.xlu0 %v4469_v14  ;;  %vm374_vm0 = vcmask 1041408   ;;  %vm643_vm14 = vcmask 1045504   ;;  %vm4471_vm15 = vmmov 1  }
  0x15   : > { %249 = vmatpush.msra.mxu1 %v213_v1  ;;  %v194_v6 = vld [vmem:[%s5866_s2 + $0x90] sm:$0xff]  ;;  %v193_v8 = vld [vmem:[%s5866_s2 + $0x88] sm:$0xff]  ;;  %v192_v10 = vld [vmem:[%s5866_s2 + $0x80] sm:$0xff]  ;;  %4210 = vset.pattern.permute.xlu2 %v4469_v14  ;;  %s4161_s27 = smul.u32 96, %s165_s7 }
  0x16   : > { %215 = vmatpush.msra.mxu0 %v196_v2  ;;  %v210_v7 = vld [vmem:[%s5866_s2 + $0x110] sm:$0xff]  ;;  %v209_v9 = vld [vmem:[%s5866_s2 + $0x108] sm:$0xff]  ;;  %v208_v11 = vld [vmem:[%s5866_s2 + $0x100] sm:$0xff]  ;;  %4209 = vset.pattern.permute.xlu1 %v4470_v24 }
  0x17   : > { %250 = vmatpush.msra.mxu1 %v212_v3  ;;  %v191_v12 = vld [vmem:[%s5866_s2 + $0x78] sm:$0xff]  ;;  %v190_v15 = vld [vmem:[%s5866_s2 + $0x70] sm:$0xff]  ;;  %v189_v17 = vld [vmem:[%s5866_s2 + $0x68] sm:$0xff]  ;;  %s4648_s11 = scalar_lea.vmem %s5864_s0, %s4161_s27 }
  0x18   : > { %216 = vmatpush.msra.mxu0 %v195_v4  ;;  %v207_v13 = vld [vmem:[%s5866_s2 + $0xf8] sm:$0xff]  ;;  %v206_v16 = vld [vmem:[%s5866_s2 + $0xf0] sm:$0xff]  ;;  %v205_v18 = vld [vmem:[%s5866_s2 + $0xe8] sm:$0xff] }
  0x19   : > { %251 = vmatpush.msra.mxu1 %v211_v5  ;;  %v315_v19 = vld [vmem:[%s5866_s2 + $0x130] sm:$0xff]  ;;  %v188_v20 = vld [vmem:[%s5866_s2 + $0x60] sm:$0xff]  ;;  %v187_v22 = vld [vmem:[%s5866_s2 + $0x58] sm:$0xff] }
  0x1a   : > { %217 = vmatpush.msra.mxu0 %v194_v6  ;;  %323 = vperm.xlu0 %4208, %v315_v19   ;;  %v204_v21 = vld [vmem:[%s5866_s2 + $0xe0] sm:$0xff]  ;;  %v203_v23 = vld [vmem:[%s5866_s2 + $0xd8] sm:$0xff]  ;;  %v186_v26 = vld [vmem:[%s5866_s2 + $0x50] sm:$0xff] }
  0x1b   : > { %252 = vmatpush.msra.mxu1 %v210_v7  ;;  %v316_v25 = vld [vmem:[%s5866_s2 + $0x138] sm:$0xff]  ;;  %v202_v27 = vld [vmem:[%s5866_s2 + $0xd0] sm:$0xff]  ;;  %476 = vperm.xlu1 %4209, %v315_v19   ;;  %v185_v28 = vld [vmem:[%s5866_s2 + $0x48] sm:$0xff] }
  0x1c   : > { %218 = vmatpush.msra.mxu0 %v193_v8  ;;  %v201_v29 = vld [vmem:[%s5866_s2 + $0xc8] sm:$0xff]  ;;  %v184_v30 = vld [vmem:[%s5866_s2 + $0x40] sm:$0xff]  ;;  %v183_v32 = vld [vmem:[%s5866_s2 + $0x38] sm:$0xff] }
  0x1d   : > { %253 = vmatpush.msra.mxu1 %v209_v9  ;;  %v200_v31 = vld [vmem:[%s5866_s2 + $0xc0] sm:$0xff]  ;;  %v199_v33 = vld [vmem:[%s5866_s2 + $0xb8] sm:$0xff]  ;;  %v318_v34 = vld [vmem:[%s5866_s2 + $0x148] sm:$0xff] }
  0x1e   : > { %219 = vmatpush.msra.mxu0 %v192_v10  ;;  %v182_v35 = vld [vmem:[%s5866_s2 + $0x30] sm:$0xff]  ;;  %v170_v37 = vld [vmem:[%s4648_s11] sm:$0xff]  ;;  %v171_v38 = vld [vmem:[%s4648_s11 + $0x8] sm:$0xff] }
  0x1f   : > { %254 = vmatpush.msra.mxu1 %v208_v11  ;;  %v198_v36 = vld [vmem:[%s5866_s2 + $0xb0] sm:$0xff]  ;;  %v320_v39 = vld [vmem:[%s5866_s2 + $0x158] sm:$0x3]  ;;  %v317_v42 = vld [vmem:[%s5866_s2 + $0x140] sm:$0xff] }
  0x20   : > { %220 = vmatpush.msra.mxu0 %v191_v12  ;;  %v172_v40 = vld [vmem:[%s4648_s11 + $0x10] sm:$0xff]  ;;  %v173_v41 = vld [vmem:[%s4648_s11 + $0x18] sm:$0xff]  ;;  %333 = vperm.xlu2 %4210, %v317_v42   ;;  %v174_v44 = vld [vmem:[%s4648_s11 + $0x20] sm:$0xff] }
  0x21   : > { %255 = vmatpush.msra.mxu1 %v207_v13  ;;  %v319_v43 = vld [vmem:[%s5866_s2 + $0x150] sm:$0xff]  ;;  %v175_v45 = vld [vmem:[%s4648_s11 + $0x28] sm:$0xff]  ;;  %v177_v47 = vld [vmem:[%s4648_s11 + $0x38] sm:$0xff] }
  0x22   : > { %221 = vmatpush.msra.mxu0 %v190_v15  ;;  %328 = vperm.xlu0 %4208, %v316_v25   ;;  %v176_v46 = vld [vmem:[%s4648_s11 + $0x30] sm:$0xff]  ;;  %v178_v48 = vld [vmem:[%s4648_s11 + $0x40] sm:$0xff]  ;;  %v179_v49 = vld [vmem:[%s4648_s11 + $0x48] sm:$0xff] }
  0x23   : > { %256 = vmatpush.msra.mxu1 %v206_v16  ;;  %480 = vperm.xlu1 %4209, %v316_v25   ;;  %v180_v50 = vld [vmem:[%s4648_s11 + $0x50] sm:$0x3]  ;;  %v181_v51 = vld [vmem:[%s4648_s11 + $0x58] sm:$0x3]  ;;  %v4688_v59 = vld [vmem:[%s5866_s2 + $0x8] ss:$0 sm:$0xff] }
  0x24   : > { %222 = vmatpush.msra.mxu0 %v189_v17  ;;  %vm3783_vm13 = vmneg %vm374_vm0 }
  0x25   : > { %257 = vmatpush.msra.mxu1 %v205_v18 }
  0x26   : > { %223 = vmatpush.msra.mxu0 %v188_v20 }
  0x27   : > { %258 = vmatpush.msra.mxu1 %v204_v21 }
  0x28   : > { %224 = vmatpush.msra.mxu0 %v187_v22  ;;  %4211 = vset.pattern.permute.xlu2 %v4470_v24 }
  0x29   : > { %259 = vmatpush.msra.mxu1 %v203_v23  ;;  %484 = vperm.xlu2 %4211, %v317_v42  }
  0x2a   : > { %225 = vmatpush.msra.mxu0 %v186_v26  ;;  %338 = vperm.xlu0 %4208, %v318_v34  }
  0x2b   : > { %260 = vmatpush.msra.mxu1 %v202_v27  ;;  %488 = vperm.xlu1 %4209, %v318_v34  }
  0x2c   : > { %226 = vmatpush.msra.mxu0 %v185_v28 }
  0x2d   : > { %261 = vmatpush.msra.mxu1 %v201_v29 }
  0x2e   : > { %227 = vmatpush.msra.mxu0 %v184_v30 }
  0x2f   : > { %262 = vmatpush.msra.mxu1 %v200_v31 }
  0x30   : > { %228 = vmatpush.msra.mxu0 %v183_v32 }
  0x31   : > { %263 = vmatpush.msra.mxu1 %v199_v33  ;;  %4212 = vset.pattern.permute.xlu2 %v4469_v14 }
  0x32   : > { %229 = vmatpush.msra.mxu0 %v182_v35  ;;  %348 = vperm.xlu0 %4208, %v320_v39  }
  0x33   : > { %264 = vmatpush.msra.mxu1 %v198_v36  ;;  %230 = vmatmul.f32.vlgmr.msra.gmra.mxu0 %v170_v37 }
  0x34   : > { %265 = vmatmul.f32.vlgmr.msra.gmra.mxu1 %v171_v38  ;;  %492 = vperm.xlu1 %4209, %v319_v43  }
  0x35   : > { %343 = vperm.xlu2 %4212, %v319_v43  }
  0x3b   : > { %233 = vmatmul.f32.gmra.mxu0 %v172_v40 }
  0x3c   : > { %268 = vmatmul.f32.gmra.mxu1 %v173_v41  ;;  %4214 = vset.pattern.permute.xlu1 %v4469_v14 }
  0x3d   : > { %4213 = vset.pattern.permute.xlu2 %v4470_v24 }
  0x3e   : > { %496 = vperm.xlu2 %4213, %v320_v39  }
  0x43   : > { %236 = vmatmul.f32.gmra.mxu0 %v174_v44 }
  0x44   : > { %271 = vmatmul.f32.gmra.mxu1 %v175_v45 }
  0x46   : > { %4215 = vset.pattern.permute.xlu2 %v4469_v14 }
  0x4b   : > { %239 = vmatmul.f32.gmra.mxu0 %v176_v46 }
  0x4c   : > { %274 = vmatmul.f32.gmra.mxu1 %v177_v47 }
  0x53   : > { %242 = vmatmul.f32.gmra.mxu0 %v178_v48 }
  0x54   : > { %277 = vmatmul.f32.gmra.mxu1 %v179_v49 }
  0x5b   : > { %245 = vmatmul.f32.gmra.mxu0 %v180_v50 }
  0x5c   : > { %280 = vmatmul.f32.gmra.mxu1 %v181_v51 }
  0x7a   : > { %v334_v8 = vpop.permute.xlu2 %333 }
  0x7b   : > { %v4720_v32 = vmul.f32 %v4688_v59, %v334_v8 }
  0x83   : > { %v485_v27 = vpop.permute.xlu2 %484 }
  0x84   : > { %v4715_v30 = vmul.f32 %v4688_v59, %v485_v27 }
  0x8c   : > { %v324_v61 = vpop.permute.xlu0 %323 }
  0x8d   : > { %v477_v62 = vpop.permute.xlu1 %476  ;;  %v4691_v2 = vmul.f32 %v4688_v59, %v324_v61 }
  0x8e   : > { %v4694_v3 = vmul.f32 %v4688_v59, %v477_v62 }
  0x8f   : > { %v344_v50 = vpop.permute.xlu2 %343 }
  0x94   : > { %v329_v14 = vpop.permute.xlu0 %328 }
  0x95   : > { %v481_v15 = vpop.permute.xlu1 %480  ;;  %v4703_v17 = vmul.f32 %v4688_v59, %v329_v14 }
  0x96   : > { %v4706_v18 = vmul.f32 %v4688_v59, %v481_v15 }
  0x9c   : > { %v339_v43 = vpop.permute.xlu0 %338 }
  0x9d   : > { %v489_v39 = vpop.permute.xlu1 %488  ;;  %v4727_v44 = vmul.f32 %v4688_v59, %v339_v43 }
  0x9e   : > { %v4730_v45 = vmul.f32 %v4688_v59, %v489_v39 }
  0xb0   : > { %v231_v52 = vpop.f32.mrf.mxu0 }
  0xb1   : > { %v266_v53 = vpop.f32.mrf.mxu1 }
  0xb2   : > { %v267_v54 = vadd.f32 %v266_v53, %v231_v52 }
  0xb4   : > { %v284_v55 = vmax.f32 %v267_v54, 1e-10 }
  0xb6   : > { %4225 = vlog2.f32 %v284_v55 }
  0xb8   : > { %v234_v56 = vpop.f32.mrf.mxu0 }
  0xb9   : > { %v269_v57 = vpop.f32.mrf.mxu1 }
  0xba   : > { %v270_v58 = vadd.f32 %v269_v57, %v234_v56  ;;  %v493_v56 = vpop.permute.xlu1 %492 }
  0xbc   : > { %v4226_v60 = vpop.eup %4225  ;;  %v285_v63 = vmax.f32 %v270_v58, 1e-10  ;;  %v4739_v58 = vmul.f32 %v4688_v59, %v344_v50 }
  0xbd   : > { %v291_v0 = vmul.f32 0.6931472, %v4226_v60  ;;  %v4742_v60 = vmul.f32 %v4688_v59, %v493_v56 }
  0xbe   : > { %4227 = vlog2.f32 %v285_v63 }
  0xbf   : > { %v302_v1 = vmul.f32 0.4342945, %v291_v0 }
  0xc0   : > { %v237_v5 = vpop.f32.mrf.mxu0 }
  0xc1   : > { %v4696_v4 = vmul.f32 10.0, %v302_v1  ;;  %v272_v6 = vpop.f32.mrf.mxu1  ;;  %v497_v1 = vpop.permute.xlu2 %496 }
  0xc2   : > { %v273_v7 = vadd.f32 %v272_v6, %v237_v5  ;;  %v349_v6 = vpop.permute.xlu0 %348  ;;  %v4751_v8 = vmul.f32 %v4688_v59, %v497_v1 }
  0xc3   : > { %v505_v9 = vmul.f32 %v4694_v3, %v4696_v4  ;;  %v358_v10 = vmul.f32 %v4691_v2, %v4696_v4 }
  0xc4   : > { %v4228_v11 = vpop.eup %4227  ;;  %v286_v12 = vmax.f32 %v273_v7, 1e-10 }
  0xc5   : > { %v293_v13 = vmul.f32 0.6931472, %v4228_v11  ;;  %511 = vadd.xlane.f32.xlu2 %v505_v9  ;;  %364 = vadd.xlane.f32.xlu0 %v358_v10  ;;  %v4754_v9 = vmul.f32 %v4688_v59, %v349_v6 }
  0xc6   : > { %4229 = vlog2.f32 %v286_v12 }
  0xc7   : > { %v303_v16 = vmul.f32 0.4342945, %v293_v13 }
  0xc8   : > { %v240_v20 = vpop.f32.mrf.mxu0 }
  0xc9   : > { %v4708_v19 = vmul.f32 10.0, %v303_v16  ;;  %v275_v21 = vpop.f32.mrf.mxu1 }
  0xca   : > { %v276_v22 = vadd.f32 %v275_v21, %v240_v20 }
  0xcb   : > { %v506_v23 = vmul.f32 %v4706_v18, %v4708_v19  ;;  %v359_v24 = vmul.f32 %v4703_v17, %v4708_v19 }
  0xcc   : > { %v4230_v25 = vpop.eup %4229  ;;  %v287_v26 = vmax.f32 %v276_v22, 1e-10 }
  0xcd   : > { %v295_v28 = vmul.f32 0.6931472, %v4230_v25  ;;  %513 = vadd.xlane.f32.xlu2 %v506_v23  ;;  %366 = vadd.xlane.f32.xlu1 %v359_v24 }
  0xce   : > { %4231 = vlog2.f32 %v287_v26 }
  0xcf   : > { %v304_v29 = vmul.f32 0.4342945, %v295_v28 }
  0xd0   : > { %v243_v33 = vpop.f32.mrf.mxu0 }
  0xd1   : > { %v4717_v31 = vmul.f32 10.0, %v304_v29  ;;  %v278_v34 = vpop.f32.mrf.mxu1 }
  0xd2   : > { %v279_v35 = vadd.f32 %v278_v34, %v243_v33 }
  0xd3   : > { %v507_v36 = vmul.f32 %v4715_v30, %v4717_v31  ;;  %v360_v37 = vmul.f32 %v4720_v32, %v4717_v31 }
  0xd4   : > { %v4232_v38 = vpop.eup %4231  ;;  %v288_v40 = vmax.f32 %v279_v35, 1e-10 }
  0xd5   : > { %v297_v41 = vmul.f32 0.6931472, %v4232_v38  ;;  %515 = vadd.xlane.f32.xlu1 %v507_v36  ;;  %368 = vadd.xlane.f32.xlu0 %v360_v37 }
  0xd6   : > { %4233 = vlog2.f32 %v288_v40 }
  0xd7   : > { %v305_v42 = vmul.f32 0.4342945, %v297_v41 }
  0xd8   : > { %v246_v47 = vpop.f32.mrf.mxu0 }
  0xd9   : > { %v4732_v46 = vmul.f32 10.0, %v305_v42  ;;  %v281_v48 = vpop.f32.mrf.mxu1 }
  0xda   : > { %v282_v49 = vadd.f32 %v281_v48, %v246_v47 }
  0xdb   : > { %v508_v51 = vmul.f32 %v4730_v45, %v4732_v46  ;;  %v361_v52 = vmul.f32 %v4727_v44, %v4732_v46 }
  0xdc   : > { %v4234_v53 = vpop.eup %4233  ;;  %v289_v54 = vmax.f32 %v282_v49, 1e-10 }
  0xdd   : > { %v299_v55 = vmul.f32 0.6931472, %v4234_v53  ;;  %517 = vadd.xlane.f32.xlu0 %v508_v51  ;;  %370 = vadd.xlane.f32.xlu2 %v361_v52 }
  0xde   : > { %4235 = vlog2.f32 %v289_v54 }
  0xdf   : > { %v306_v57 = vmul.f32 0.4342945, %v299_v55 }
  0xe1   : > { %v4744_v61 = vmul.f32 10.0, %v306_v57 }
  0xe3   : > { %v509_v62 = vmul.f32 %v4742_v60, %v4744_v61  ;;  %v362_v63 = vmul.f32 %v4739_v58, %v4744_v61 }
  0xe4   : > { %v4236_v0 = vpop.eup %4235 }
  0xe5   : > { %v301_v5 = vmul.f32 0.6931472, %v4236_v0  ;;  %519 = vadd.xlane.f32.xlu2 %v509_v62  ;;  %372 = vadd.xlane.f32.xlu1 %v362_v63 }
  0xe7   : > { %v307_v7 = vmul.f32 0.4342945, %v301_v5 }
  0xe9   : > { %v4756_v10 = vmul.f32 10.0, %v307_v7 }
  0xeb   : > { %v510_v11 = vmul.f32 %v4751_v8, %v4756_v10  ;;  %v363_v12 = vmul.f32 %v4754_v9, %v4756_v10 }
  0xed   : > { %v521_v13 = vsel %vm374_vm0, %v510_v11, 0.0  ;;  %v375_v14 = vsel %vm374_vm0, %v363_v12, 0.0 }
  0xee   : > { %522 = vadd.xlane.f32.xlu1 %v521_v13  ;;  %376 = vadd.xlane.f32.xlu0 %v375_v14 }
 0x138   : > { %v512_v15 = vpop.xlane.xlu2 %511  ;;  %v365_v20 = vpop.xlane.xlu0 %364 }
 0x140   : > { %v367_v16 = vpop.xlane.xlu1 %366  ;;  %v514_v59 = vpop.xlane.xlu2 %513 }
 0x141   : > { %v524_v26 = vadd.f32 %v514_v59, %v512_v15  ;;  %v378_v27 = vadd.f32 %v367_v16, %v365_v20 }
 0x148   : > { %v369_v21 = vpop.xlane.xlu0 %368  ;;  %v516_v22 = vpop.xlane.xlu1 %515 }
 0x149   : > { %v525_v28 = vadd.f32 %v524_v26, %v516_v22  ;;  %v379_v29 = vadd.f32 %v378_v27, %v369_v21 }
 0x150   : > { %v371_v23 = vpop.xlane.xlu2 %370  ;;  %v518_v25 = vpop.xlane.xlu0 %517 }
 0x151   : > { %v526_v34 = vadd.f32 %v525_v28, %v518_v25  ;;  %v380_v35 = vadd.f32 %v379_v29, %v371_v23 }
 0x158   : > { %v373_v24 = vpop.xlane.xlu1 %372  ;;  %v520_v33 = vpop.xlane.xlu2 %519 }
 0x159   : > { %v527_v36 = vadd.f32 %v526_v34, %v520_v33  ;;  %v381_v37 = vadd.f32 %v380_v35, %v373_v24 }
 0x161   : > { %v523_v38 = vpop.xlane.xlu1 %522  ;;  %v377_v39 = vpop.xlane.xlu0 %376 }
 0x162   : > { %v528_v40 = vsel %vm374_vm0, %v523_v38, 0.0  ;;  %v382_v41 = vsel %vm374_vm0, %v377_v39, 0.0 }
 0x163   : > { %v529_v42 = vadd.f32 %v528_v40, %v527_v36  ;;  %v383_v43 = vadd.f32 %v382_v41, %v381_v37 }
 0x165   : > { %v530_v47 = vrot.slane %v529_v42, 4  ;;  %v384_v48 = vrot.slane %v383_v43, 4 }
 0x167   : > { %v531_v49 = vadd.f32 %v530_v47, %v529_v42  ;;  %v385_v50 = vadd.f32 %v384_v48, %v383_v43 }
 0x169   : > { %v532_v51 = vrot.slane %v531_v49, 2  ;;  %v386_v52 = vrot.slane %v385_v50, 2 }
 0x16b   : > { %v533_v53 = vadd.f32 %v532_v51, %v531_v49  ;;  %v387_v54 = vadd.f32 %v386_v52, %v385_v50 }
 0x16d   : > { %v534_v55 = vrot.slane %v533_v53, 1  ;;  %v388_v56 = vrot.slane %v387_v54, 1 }
 0x16f   : > { %v535_v57 = vadd.f32 %v534_v55, %v533_v53  ;;  %v389_v62 = vadd.f32 %v388_v56, %v387_v54 }
 0x171   : > { %v536_v63 = vmul.f32 0.00074404763, %v535_v57  ;;  %v390_v0 = vmul.f32 0.00074404763, %v389_v62 }
 0x173   : > { %v537_v1 = vsub.f32 %v4696_v4, %v536_v63  ;;  %v392_v5 = vsub.f32 %v4708_v19, %v390_v0  ;;  %v391_v6 = vsub.f32 %v4696_v4, %v390_v0  ;;  %v539_v13 = vsub.f32 %v4717_v31, %v536_v63 }
 0x174   : > { %v538_v16 = vsub.f32 %v4708_v19, %v536_v63  ;;  %v395_v19 = vsub.f32 %v4744_v61, %v390_v0  ;;  %v540_v21 = vsub.f32 %v4732_v46, %v536_v63  ;;  %v394_v22 = vsub.f32 %v4732_v46, %v390_v0 }
 0x175   : > { %v4770_v7 = vmul.f32 %v537_v1, %v4694_v3  ;;  %v4773_v11 = vmul.f32 %v392_v5, %v4703_v17  ;;  %v4776_v12 = vmul.f32 %v391_v6, %v4691_v2  ;;  %v393_v3 = vsub.f32 %v4717_v31, %v390_v0  ;;  %v4094_v5 = vld [vmem:[%s5865_s1 + $0x78] sm:$0xff] }
 0x176   : > { %v4788_v2 = vmul.f32 %v539_v13, %v4715_v30  ;;  %v4794_v20 = vmul.f32 %v538_v16, %v4706_v18  ;;  %v4806_v18 = vmul.f32 %v395_v19, %v4739_v58  ;;  %v4812_v23 = vmul.f32 %v394_v22, %v4727_v44  ;;  %887 = vmatpush.bf16.msra.mxu3 %v4094_v5 }
 0x177   : > { %v549_v14 = vmul.f32 %v4770_v7, %v4770_v7  ;;  %v404_v15 = vmul.f32 %v4773_v11, %v4773_v11  ;;  %v403_v4 = vmul.f32 %v4776_v12, %v4776_v12  ;;  %v4791_v17 = vmul.f32 %v393_v3, %v4720_v32 }
 0x178   : > { %v551_v59 = vmul.f32 %v4788_v2, %v4788_v2  ;;  %v550_v30 = vmul.f32 %v4794_v20, %v4794_v20  ;;  %v4809_v32 = vmul.f32 %v540_v21, %v4730_v45  ;;  %v542_v24 = vsub.f32 %v4756_v10, %v536_v63 }
 0x179   : > { %555 = vadd.xlane.f32.xlu1 %v549_v14  ;;  %411 = vadd.xlane.f32.xlu0 %v404_v15  ;;  %v405_v31 = vmul.f32 %v4791_v17, %v4791_v17  ;;  %v396_v25 = vsub.f32 %v4756_v10, %v390_v0  ;;  %v407_v26 = vmul.f32 %v4806_v18, %v4806_v18  ;;  %v4102_v14 = vld [vmem:[%s5865_s1 + $0xb8] sm:$0xff] }
 0x17a   : > { %409 = vadd.xlane.f32.xlu2 %v403_v4  ;;  %v552_v46 = vmul.f32 %v4809_v32, %v4809_v32  ;;  %v406_v58 = vmul.f32 %v4812_v23, %v4812_v23  ;;  %v4823_v27 = vmul.f32 %v542_v24, %v4751_v8  ;;  %v541_v44 = vsub.f32 %v4744_v61, %v536_v63  ;;  %v4086_v15 = vld [vmem:[%s5865_s1 + $0x38] sm:$0xff]  ;;  %v4093_v4 = vld [vmem:[%s5865_s1 + $0x70] sm:$0xff] }
 0x17b   : > { %v4826_v45 = vmul.f32 %v396_v25, %v4754_v9  ;;  %911 = vmatpush.bf16.msrb.mxu0 %v4102_v14  ;;  %863 = vmatpush.bf16.msra.mxu2 %v4086_v15  ;;  %v4100_v25 = vld [vmem:[%s5865_s1 + $0xa8] sm:$0xff] }
 0x17c   : > { %v554_v10 = vmul.f32 %v4823_v27, %v4823_v27  ;;  %v4834_v29 = vmul.f32 %v541_v44, %v4742_v60  ;;  %888 = vmatpush.bf16.msra.mxu3 %v4093_v4  ;;  %v4091_v44 = vld [vmem:[%s5865_s1 + $0x60] sm:$0xff] }
 0x17d   : > { %v408_v28 = vmul.f32 %v4826_v45, %v4826_v45 }
 0x17e   : > { %v565_v8 = vsel %vm374_vm0, %v554_v10, 0.0  ;;  %v553_v9 = vmul.f32 %v4834_v29, %v4834_v29  ;;  %v4099_v10 = vld [vmem:[%s5865_s1 + $0xa0] sm:$0xff] }
 0x17f   : > { %v419_v33 = vsel %vm374_vm0, %v408_v28, 0.0  ;;  %v4083_v28 = vld [vmem:[%s5865_s1 + $0x20] sm:$0xff] }
 0x181   : > { %559 = vadd.xlane.f32.xlu1 %v551_v59  ;;  %413 = vadd.xlane.f32.xlu0 %v405_v31  ;;  %v4101_v59 = vld [vmem:[%s5865_s1 + $0xb0] sm:$0xff] }
 0x182   : > { %557 = vadd.xlane.f32.xlu2 %v550_v30  ;;  %v4085_v31 = vld [vmem:[%s5865_s1 + $0x30] sm:$0xff]  ;;  %v4092_v30 = vld [vmem:[%s5865_s1 + $0x68] sm:$0xff]  ;;  %912 = vmatpush.bf16.msrb.mxu0 %v4101_v59 }
 0x183   : > { %864 = vmatpush.bf16.msra.mxu2 %v4085_v31  ;;  %889 = vmatpush.bf16.msra.mxu3 %v4092_v30 }
 0x186   : > { %913 = vmatpush.bf16.msrb.mxu0 %v4100_v25 }
 0x187   : > { %890 = vmatpush.bf16.msra.mxu3 %v4091_v44 }
 0x189   : > { %417 = vadd.xlane.f32.xlu1 %v407_v26  ;;  %561 = vadd.xlane.f32.xlu0 %v552_v46  ;;  %v4084_v26 = vld [vmem:[%s5865_s1 + $0x28] sm:$0xff] }
 0x18a   : > { %415 = vadd.xlane.f32.xlu2 %v406_v58  ;;  %865 = vmatpush.bf16.msra.mxu2 %v4084_v26 }
 0x18b   : > { %914 = vmatpush.bf16.msrb.mxu0 %v4099_v10 }
 0x18e   : > { %866 = vmatpush.bf16.msra.mxu2 %v4083_v28 }
 0x191   : > { %566 = vadd.xlane.f32.xlu1 %v565_v8  ;;  %420 = vadd.xlane.f32.xlu0 %v419_v33  ;;  %v4090_v33 = vld [vmem:[%s5865_s1 + $0x58] sm:$0xff] }
 0x192   : > { %563 = vadd.xlane.f32.xlu2 %v553_v9  ;;  %v4082_v9 = vld [vmem:[%s5865_s1 + $0x18] sm:$0xff]  ;;  %891 = vmatpush.bf16.msra.mxu3 %v4090_v33 }
 0x193   : > { %867 = vmatpush.bf16.msra.mxu2 %v4082_v9 }
 0x1ec   : > { %v556_v61 = vpop.xlane.xlu1 %555  ;;  %v412_v34 = vpop.xlane.xlu0 %411 }
 0x1ed   : > { %v410_v35 = vpop.xlane.xlu2 %409 }
 0x1ee   : > { %v422_v39 = vadd.f32 %v412_v34, %v410_v35 }
 0x1f4   : > { %v560_v36 = vpop.xlane.xlu1 %559  ;;  %v414_v37 = vpop.xlane.xlu0 %413 }
 0x1f5   : > { %v558_v38 = vpop.xlane.xlu2 %557  ;;  %v423_v42 = vadd.f32 %v422_v39, %v414_v37  ;;  %v4081_v37 = vld [vmem:[%s5865_s1 + $0x10] sm:$0xff] }
 0x1f6   : > { %v568_v43 = vadd.f32 %v558_v38, %v556_v61  ;;  %v4098_v61 = vld [vmem:[%s5865_s1 + $0x98] sm:$0xff]  ;;  %v4097_v38 = vld [vmem:[%s5865_s1 + $0x90] sm:$0xff]  ;;  %868 = vmatpush.bf16.msra.mxu2 %v4081_v37 }
 0x1f7   : > { %915 = vmatpush.bf16.msrb.mxu0 %v4098_v61 }
 0x1f8   : > { %v569_v48 = vadd.f32 %v568_v43, %v560_v36  ;;  %v4089_v36 = vld [vmem:[%s5865_s1 + $0x50] sm:$0xff] }
 0x1f9   : > { %892 = vmatpush.bf16.msra.mxu3 %v4089_v36 }
 0x1fb   : > { %916 = vmatpush.bf16.msrb.mxu0 %v4097_v38 }
 0x1fc   : > { %v418_v40 = vpop.xlane.xlu1 %417  ;;  %v562_v60 = vpop.xlane.xlu0 %561 }
 0x1fd   : > { %v416_v41 = vpop.xlane.xlu2 %415  ;;  %v570_v49 = vadd.f32 %v569_v48, %v562_v60  ;;  %v4096_v48 = vld [vmem:[%s5865_s1 + $0x88] sm:$0xff] }
 0x1fe   : > { %v424_v47 = vadd.f32 %v423_v42, %v416_v41  ;;  %v4088_v42 = vld [vmem:[%s5865_s1 + $0x48] sm:$0xff] }
 0x1ff   : > { %893 = vmatpush.bf16.msra.mxu3 %v4088_v42  ;;  %917 = vmatpush.bf16.msrb.mxu0 %v4096_v48 }
 0x200   : > { %v425_v50 = vadd.f32 %v424_v47, %v418_v40  ;;  %v4080_v47 = vld [vmem:[%s5865_s1 + $0x8] sm:$0xff] }
 0x201   : > { %869 = vmatpush.bf16.msra.mxu2 %v4080_v47 }
 0x204   : > { %v567_v51 = vpop.xlane.xlu1 %566  ;;  %v421_v52 = vpop.xlane.xlu0 %420 }
 0x205   : > { %v572_v53 = vsel %vm374_vm0, %v567_v51, 0.0  ;;  %v426_v54 = vsel %vm374_vm0, %v421_v52, 0.0  ;;  %v564_v55 = vpop.xlane.xlu2 %563  ;;  %v4087_v52 = vld [vmem:[%s5865_s1 + $0x40] sm:$0xff] }
 0x206   : > { %v427_v56 = vadd.f32 %v426_v54, %v425_v50  ;;  %v571_v57 = vadd.f32 %v570_v49, %v564_v55  ;;  %v4079_v54 = vld [vmem:[%s5865_s1] sm:$0xff]  ;;  %894 = vmatpush.bf16.msra.mxu3 %v4087_v52 }
 0x207   : > { %870 = vmatpush.bf16.msra.mxu2 %v4079_v54  ;;  %v4118_v54 = vld [vmem:[%s5865_s1 + $0x138] sm:$0xff] }
 0x208   : > { %v428_v62 = vrot.slane %v427_v56, 4  ;;  %v573_v63 = vadd.f32 %v572_v53, %v571_v57 }
 0x20a   : > { %v429_v0 = vadd.f32 %v428_v62, %v427_v56  ;;  %v574_v1 = vrot.slane %v573_v63, 4  ;;  %v4095_v62 = vld [vmem:[%s5865_s1 + $0x80] sm:$0xff] }
 0x20b   : > { %918 = vmatpush.bf16.msrb.mxu0 %v4095_v62  ;;  %1206 = vmatpush.bf16.msrb.mxu2 %v4118_v54 }
 0x20c   : > { %v430_v6 = vrot.slane %v429_v0, 2  ;;  %v575_v13 = vadd.f32 %v574_v1, %v573_v63 }
 0x20e   : > { %v431_v3 = vadd.f32 %v430_v6, %v429_v0  ;;  %v576_v16 = vrot.slane %v575_v13, 2 }
 0x210   : > { %v432_v19 = vrot.slane %v431_v3, 1  ;;  %v577_v21 = vadd.f32 %v576_v16, %v575_v13 }
 0x212   : > { %v433_v22 = vadd.f32 %v432_v19, %v431_v3  ;;  %v578_v24 = vrot.slane %v577_v21, 1 }
 0x214   : > { %v434_v46 = vmul.f32 0.00074460165, %v433_v22  ;;  %v579_v58 = vadd.f32 %v578_v24, %v577_v21 }
 0x216   : > { %4237 = vrsqrt.f32 %v434_v46  ;;  %v580_v8 = vmul.f32 0.00074460165, %v579_v58  ;;  %vm442_vm1 = vcmp.eq.f32.partialorder %v434_v46, inf  ;;  %v445_v56 = vand.u32 2147483648, %v434_v46 }
 0x217   : > { %vm444_vm2 = vcmp.eq.f32.partialorder %v434_v46, 0.0 }
 0x218   : > { %4239 = vrsqrt.f32 %v580_v8  ;;  %vm588_vm3 = vcmp.eq.f32.partialorder %v580_v8, inf  ;;  %v591_v13 = vand.u32 2147483648, %v580_v8  ;;  %vm590_vm4 = vcmp.eq.f32.partialorder %v580_v8, 0.0 }
 0x21c   : > { %v4238_v34 = vpop.eup %4237 }
 0x21d   : > { %v436_v35 = vmul.f32 %v4238_v34, %v434_v46 }
 0x21e   : > { %v4240_v39 = vpop.eup %4239 }
 0x21f   : > { %v437_v40 = vmul.f32 %v4238_v34, %v436_v35  ;;  %v582_v60 = vmul.f32 %v4240_v39, %v580_v8 }
 0x221   : > { %v438_v41 = vmul.f32 0.5, %v437_v40  ;;  %v583_v43 = vmul.f32 %v4240_v39, %v582_v60 }
 0x223   : > { %v439_v49 = vsub.f32 1.5, %v438_v41  ;;  %v584_v50 = vmul.f32 0.5, %v583_v43 }
 0x225   : > { %v440_v51 = vmul.f32 %v4238_v34, %v439_v49  ;;  %v585_v53 = vsub.f32 1.5, %v584_v50 }
 0x227   : > { %v441_v55 = vmul.f32 %v440_v51, %v434_v46  ;;  %v586_v57 = vmul.f32 %v4240_v39, %v585_v53 }
 0x229   : > { %v443_v63 = vsel %vm442_vm1, %v434_v46, %v441_v55  ;;  %v587_v0 = vmul.f32 %v586_v57, %v580_v8  ;;  %vm4927_vm1 = vmpackc.low %vm4471_vm15, %vm3783_vm13  ;;  %v4126_v55 = vld [vmem:[%s5865_s1 + $0x178] sm:$0xff]  ;;  %v4109_v57 = vld [vmem:[%s5865_s1 + $0xf0] sm:$0xff] }
 0x22a   : > { %v446_v1 = vsel %vm444_vm2, %v445_v56, %v443_v63  ;;  %1230 = vmatpush.bf16.msrb.mxu3 %v4126_v55 }
 0x22b   : > { %v447_v5 = vadd.f32 1e-05, %v446_v1  ;;  %v589_v6 = vsel %vm588_vm3, %v580_v8, %v587_v0  ;;  %v4116_v0 = vld [vmem:[%s5865_s1 + $0x128] sm:$0xff] }
 0x22c   : > { %v592_v14 = vsel %vm590_vm4, %v591_v13, %v589_v6 }
 0x22d   : > { %4241 = vrcp.f32 %v447_v5  ;;  %v593_v15 = vadd.f32 1e-05, %v592_v14  ;;  %v459_v31 = vand.u32 2147483648, %v447_v5  ;;  %v457_v21 = vand.u32 2147483647, %v447_v5 }
 0x22e   : > { %vm453_vm6 = vweird.f32 %v447_v5 }
 0x22f   : > { %4243 = vrcp.f32 %v593_v15  ;;  %v460_v25 = vor.u32 1.1754944e-38, %v459_v31  ;;  %v603_v26 = vand.u32 2147483647, %v593_v15  ;;  %v605_v46 = vand.u32 2147483648, %v593_v15 }
 0x230   : > { %vm458_vm8 = vcmp.eq.f32.partialorder %v457_v21, 8.507059e+37  ;;  %vm599_vm10 = vweird.f32 %v593_v15 }
 0x231   : > { %vm604_vm12 = vcmp.eq.f32.partialorder %v603_v26, 8.507059e+37  ;;  %v606_v8 = vor.u32 1.1754944e-38, %v605_v46 }
 0x233   : > { %v4242_v4 = vpop.eup %4241 }
 0x234   : > { %v449_v3 = vmul.f32 %v4242_v4, %v447_v5  ;;  %vm454_vm5 = vweird.f32 %v4242_v4 }
 0x235   : > { %v4244_v59 = vpop.eup %4243  ;;  %vm455_vm7 = vmor %vm453_vm6, %vm454_vm5  ;;  %vm1751_vm5 = vcmask 254976   ;;  %vm1684_vm6 = vcmask 261120  }
 0x236   : > { %v450_v16 = vsub.f32 1.0, %v449_v3  ;;  %v595_v30 = vmul.f32 %v4244_v59, %v593_v15  ;;  %vm600_vm9 = vweird.f32 %v4244_v59 }
 0x237   : > { %vm601_vm11 = vmor %vm599_vm10, %vm600_vm9 }
 0x238   : > { %v451_v19 = vmul.f32 %v4242_v4, %v450_v16  ;;  %v596_v24 = vsub.f32 1.0, %v595_v30 }
 0x23a   : > { %v452_v22 = vadd.f32 %v4242_v4, %v451_v19  ;;  %v597_v44 = vmul.f32 %v4244_v59, %v596_v24 }
 0x23c   : > { %v456_v58 = vsel %vm455_vm7, %v4242_v4, %v452_v22  ;;  %v598_v28 = vadd.f32 %v4244_v59, %v597_v44  ;;  %v4123_v44 = vld [vmem:[%s5865_s1 + $0x160] sm:$0xff] }
 0x23d   : > { %v4914_v10 = vsel %vm458_vm8, %v460_v25, %v456_v58  ;;  %v4115_v58 = vld [vmem:[%s5865_s1 + $0x120] sm:$0xff] }
 0x23e   : > { %v463_v33 = vmul.f32 %v4914_v10, %v4776_v12  ;;  %v464_v9 = vmul.f32 %v4914_v10, %v4773_v11  ;;  %v602_v61 = vsel %vm601_vm11, %v4244_v59, %v598_v28  ;;  %v465_v34 = vmul.f32 %v4914_v10, %v4791_v17  ;;  %v4114_v28 = vld [vmem:[%s5865_s1 + $0x118] sm:$0xff] }
 0x23f   : > { %v607_v35 = vsel %vm604_vm12, %v606_v8, %v602_v61  ;;  %v466_v50 = vmul.f32 %v4914_v10, %v4812_v23  ;;  %v467_v52 = vmul.f32 %v4914_v10, %v4806_v18  ;;  %v4117_v18 = vld [vmem:[%s5865_s1 + $0x130] sm:$0xff]  ;;  %v468_v59 = vmul.f32 %v4914_v10, %v4826_v45  ;;  %v4124_v45 = vld [vmem:[%s5865_s1 + $0x168] sm:$0xff]  ;;  %v4107_v10 = vld [vmem:[%s5865_s1 + $0xe0] sm:$0xff] }
 0x240   : > { %v609_v36 = vmul.f32 %v607_v35, %v4770_v7  ;;  %v610_v37 = vmul.f32 %v607_v35, %v4794_v20  ;;  %v611_v38 = vmul.f32 %v607_v35, %v4788_v2  ;;  %v612_v51 = vmul.f32 %v607_v35, %v4809_v32  ;;  %v4110_v32 = vld [vmem:[%s5865_s1 + $0xf8] sm:$0xff]  ;;  %1207 = vmatpush.bf16.msrb.mxu2 %v4117_v18  ;;  %v4105_v61 = vld [vmem:[%s5865_s1 + $0xd0] sm:$0xff]  ;;  %v5162_v7 = vld [vmem:[%s5866_s2 + $0x28] sm:$0xff] }
 0x241   : > { %v613_v53 = vmul.f32 %v607_v35, %v4834_v29  ;;  %v4125_v29 = vld [vmem:[%s5865_s1 + $0x170] sm:$0xff]  ;;  %1182 = vmatpush.bf16.msrb.mxu1 %v4110_v32  ;;  %v614_v31 = vmul.f32 %v607_v35, %v4823_v27  ;;  %v4108_v27 = vld [vmem:[%s5865_s1 + $0xe8] sm:$0xff]  ;;  %v4122_v8 = vld [vmem:[%s5865_s1 + $0x158] sm:$0xff] }
 0x242   : > { %v615_v39 = vadd.f32 %v609_v36, %v463_v33  ;;  %v616_v40 = vadd.f32 %v610_v37, %v464_v9  ;;  %v617_v60 = vadd.f32 %v611_v38, %v465_v34  ;;  %v618_v23 = vadd.f32 %v612_v51, %v466_v50  ;;  %1231 = vmatpush.bf16.msrb.mxu3 %v4125_v29  ;;  %v4106_v33 = vld [vmem:[%s5865_s1 + $0xd8] sm:$0xff]  ;;  %v4113_v9 = vld [vmem:[%s5865_s1 + $0x110] sm:$0xff]  ;;  %v4112_v34 = vld [vmem:[%s5865_s1 + $0x108] sm:$0xff] }
 0x243   : > { %v619_v56 = vadd.f32 %v613_v53, %v467_v52  ;;  %v620_v19 = vadd.f32 %v614_v31, %v468_v59  ;;  %v4121_v35 = vld [vmem:[%s5865_s1 + $0x150] sm:$0xff]  ;;  %v4104_v36 = vld [vmem:[%s5865_s1 + $0xc8] sm:$0xff]  ;;  %v4111_v37 = vld [vmem:[%s5865_s1 + $0x100] sm:$0xff] }
 0x244   : > { %v709_v12 = vpack.c.bf16 %v616_v40, %v615_v39  ;;  %v626_v41 = vrot.slane %v615_v39, 6  ;;  %v627_v11 = vrot.slane %v616_v40, 6  ;;  %v644_v42 = vrot.slane %v615_v39, 2  ;;  %1208 = vmatpush.bf16.msrb.mxu2 %v4116_v0  ;;  %v4120_v38 = vld [vmem:[%s5865_s1 + $0x148] sm:$0xff]  ;;  %v4103_v39 = vld [vmem:[%s5865_s1 + $0xc0] sm:$0xff] }
 0x245   : > { %v645_v43 = vrot.slane %v616_v40, 2  ;;  %v647_v47 = vrot.slane %v617_v60, 2  ;;  %v629_v62 = vrot.slane %v617_v60, 6  ;;  %v631_v63 = vrot.slane %v618_v23, 6  ;;  %1183 = vmatpush.bf16.msrb.mxu1 %v4109_v57 }
 0x246   : > { %895 = vmatmul.bf16.vlgmr.msra.gmra.mxu3 %v709_v12  ;;  %v628_v17 = vsel %vm374_vm0, %v626_v41, %v627_v11  ;;  %v649_v1 = vrot.slane %v618_v23, 2  ;;  %v651_v5 = vrot.slane %v619_v56, 2  ;;  %v712_v6 = vpack.c.bf16 %v618_v23, %v617_v60  ;;  %v5022_v12 = vld [vmem:[%s5866_s2] ss:$0 sm:$0xff] }
 0x247   : > { %v3785_v2 = vpack.c.bf16 %v628_v17, %v626_v41  ;;  %v646_v20 = vsel %vm643_vm14, %v644_v42, %v645_v43  ;;  %v648_v48 = vsel %vm643_vm14, %v645_v43, %v647_v47  ;;  %v630_v13 = vsel %vm374_vm0, %v627_v11, %v629_v62  ;;  %1232 = vmatpush.bf16.msrb.mxu3 %v4124_v45  ;;  %v4119_v41 = vld [vmem:[%s5865_s1 + $0x140] sm:$0xff]  ;;  %v4149_v45 = vld [vmem:[%s5865_s1 + $0x230] sm:$0xff] }
 0x248   : > { %v710_v49 = vpack.c.bf16 %v648_v48, %v646_v20  ;;  %v632_v14 = vsel %vm374_vm0, %v629_v62, %v631_v63  ;;  %v650_v15 = vsel %vm643_vm14, %v647_v47, %v649_v1  ;;  %v652_v4 = vsel %vm643_vm14, %v649_v1, %v651_v5  ;;  %1209 = vmatpush.bf16.msrb.mxu2 %v4115_v58 }
 0x249   : > { %3786 = vmatmul.msk.bf16.vlgmr.msra.gmra.mxu2 %vm4927_vm1, %v3785_v2  ;;  %v711_v3 = vpack.c.bf16 %v632_v14, %v630_v13  ;;  %v713_v16 = vpack.c.bf16 %v652_v4, %v650_v15  ;;  %v633_v21 = vrot.slane %v619_v56, 6  ;;  %v653_v30 = vrot.slane %v620_v19, 2  ;;  %1184 = vmatpush.bf16.msrb.mxu1 %v4108_v27 }
 0x24a   : > { %919 = vmatmul.bf16.vlgmr.msrb.gmra.mxu0 %v710_v49  ;;  %v715_v22 = vpack.c.bf16 %v620_v19, %v619_v56 }
 0x24b   : > { %v634_v24 = vsel %vm374_vm0, %v631_v63, %v633_v21  ;;  %v654_v25 = vsel %vm643_vm14, %v651_v5, %v653_v30  ;;  %1233 = vmatpush.bf16.msrb.mxu3 %v4123_v44  ;;  %v4134_v30 = vld [vmem:[%s5865_s1 + $0x1b8] sm:$0xff] }
 0x24c   : > { %v714_v26 = vpack.c.bf16 %v633_v21, %v634_v24  ;;  %v716_v46 = vpack.c.bf16 0.0, %v654_v25  ;;  %1210 = vmatpush.bf16.msrb.mxu2 %v4114_v28  ;;  %v4150_v21 = vld [vmem:[%s5865_s1 + $0x238] sm:$0xff]  ;;  %1501 = vmatpush.bf16.msra.mxu0 %v4134_v30 }
 0x24d   : > { %1185 = vmatpush.bf16.msrb.mxu1 %v4107_v10 }
 0x24f   : > { %1234 = vmatpush.bf16.msrb.mxu3 %v4122_v8 }
 0x250   : > { %1211 = vmatpush.bf16.msrb.mxu2 %v4113_v9 }
 0x251   : > { %1186 = vmatpush.bf16.msrb.mxu1 %v4106_v33 }
 0x253   : > { %1235 = vmatpush.bf16.msrb.mxu3 %v4121_v35 }
 0x254   : > { %1212 = vmatpush.bf16.msrb.mxu2 %v4112_v34 }
 0x255   : > { %1187 = vmatpush.bf16.msrb.mxu1 %v4105_v61 }
 0x256   : > { %900 = vmatmul.bf16.gmra.mxu3 %v712_v6 }
 0x257   : > { %1236 = vmatpush.bf16.msrb.mxu3 %v4120_v38 }
 0x258   : > { %1213 = vmatpush.bf16.msrb.mxu2 %v4111_v37 }
 0x259   : > { %876 = vmatmul.bf16.gmra.mxu2 %v711_v3  ;;  %1188 = vmatpush.bf16.msrb.mxu1 %v4104_v36 }
 0x25a   : > { %924 = vmatmul.bf16.gmra.mxu0 %v713_v16 }
 0x25b   : > { %1237 = vmatpush.bf16.msrb.mxu3 %v4119_v41 }
 0x25c   : > { %1549 = vmatpush.bf16.msra.mxu2 %v4150_v21  ;;  %v5148_v21 = vld [vmem:[%s5866_s2 + $0x1] ss:$0 sm:$0xff] }
 0x25d   : > { %1189 = vmatpush.bf16.msrb.mxu1 %v4103_v39 }
 0x260   : > { %1550 = vmatpush.bf16.msra.mxu2 %v4149_v45 }
 0x266   : > { %905 = vmatmul.bf16.gmra.mxu3 %v715_v22  ;;  %v4142_v22 = vld [vmem:[%s5865_s1 + $0x1f8] sm:$0xff] }
 0x267   : > { %1525 = vmatpush.bf16.msra.mxu1 %v4142_v22 }
 0x269   : > { %881 = vmatmul.bf16.gmra.mxu2 %v714_v26 }
 0x26a   : > { %929 = vmatmul.bf16.gmra.mxu0 %v716_v46 }
 0x2c7   : > { %v920_v40 = vpop.f32.mrf.mxu0 }
 0x2c9   : > { %v896_v60 = vpop.f32.mrf.mxu3 }
 0x2cc   : > { %v872_v11 = vpop.f32.mrf.mxu2 }
 0x2cd   : > { %v873_v42 = vadd.f32 %v5022_v12, %v872_v11 }
 0x2cf   : > { %v922_v43 = vpop.f32.mrf.mxu0  ;;  %v897_v47 = vadd.f32 %v896_v60, %v873_v42 }
 0x2d1   : > { %v898_v17 = vpop.f32.mrf.mxu3  ;;  %v921_v20 = vadd.f32 %v920_v40, %v897_v47 }
 0x2d3   : > { %v5029_v50 = vmax.f32 %v921_v20, 0.0 }
 0x2d4   : > { %v874_v2 = vpop.f32.mrf.mxu2 }
 0x2d5   : > { %v875_v48 = vadd.f32 %v5022_v12, %v874_v2  ;;  %v946_v18 = vrot.slane %v5029_v50, 6  ;;  %v963_v15 = vrot.slane %v5029_v50, 2 }
 0x2d7   : > { %v899_v49 = vadd.f32 %v898_v17, %v875_v48  ;;  %v925_v53 = vpop.f32.mrf.mxu0 }
 0x2d9   : > { %v923_v51 = vadd.f32 %v922_v43, %v899_v49  ;;  %v901_v52 = vpop.f32.mrf.mxu3 }
 0x2db   : > { %v5031_v54 = vmax.f32 %v923_v51, 0.0 }
 0x2dc   : > { %v877_v55 = vpop.f32.mrf.mxu2 }
 0x2dd   : > { %v878_v32 = vadd.f32 %v5022_v12, %v877_v55  ;;  %v1028_v23 = vpack.c.bf16 %v5031_v54, %v5029_v50  ;;  %v947_v29 = vrot.slane %v5031_v54, 6  ;;  %v964_v5 = vrot.slane %v5031_v54, 2  ;;  %v4148_v55 = vld [vmem:[%s5865_s1 + $0x228] sm:$0xff] }
 0x2de   : > { %1551 = vmatpush.bf16.msra.mxu2 %v4148_v55 }
 0x2df   : > { %v902_v56 = vadd.f32 %v901_v52, %v878_v32  ;;  %1214 = vmatmul.bf16.vlgmr.msrb.gmra.mxu2 %v1028_v23  ;;  %v948_v57 = vsel %vm374_vm0, %v946_v18, %v947_v29  ;;  %v927_v6 = vpop.f32.mrf.mxu0  ;;  %v965_v16 = vsel %vm643_vm14, %v963_v15, %v964_v5  ;;  %v4133_v52 = vld [vmem:[%s5865_s1 + $0x1b0] sm:$0xff]  ;;  %v4132_v32 = vld [vmem:[%s5865_s1 + $0x1a8] sm:$0xff]  ;;  %v4135_v15 = vld [vmem:[%s5865_s1 + $0x1c0] sm:$0xff] }
 0x2e0   : > { %v3885_v62 = vpack.c.bf16 %v948_v57, %v946_v18  ;;  %1502 = vmatpush.bf16.msra.mxu0 %v4133_v52  ;;  %v4140_v23 = vld [vmem:[%s5865_s1 + $0x1e8] sm:$0xff]  ;;  %v4139_v18 = vld [vmem:[%s5865_s1 + $0x1e0] sm:$0xff]  ;;  %v4138_v57 = vld [vmem:[%s5865_s1 + $0x1d8] sm:$0xff] }
 0x2e1   : > { %v926_v63 = vadd.f32 %v925_v53, %v902_v56  ;;  %v903_v0 = vpop.f32.mrf.mxu3  ;;  %v4141_v53 = vld [vmem:[%s5865_s1 + $0x1f0] sm:$0xff]  ;;  %v4131_v56 = vld [vmem:[%s5865_s1 + $0x1a0] sm:$0xff] }
 0x2e2   : > { %3886 = vmatmul.msk.bf16.vlgmr.msrb.gmra.mxu1 %vm4927_vm1, %v3885_v62  ;;  %v4146_v62 = vld [vmem:[%s5865_s1 + $0x218] sm:$0xff] }
 0x2e3   : > { %v5041_v1 = vmax.f32 %v926_v63, 0.0  ;;  %1526 = vmatpush.bf16.msra.mxu1 %v4141_v53  ;;  %v4130_v63 = vld [vmem:[%s5865_s1 + $0x198] sm:$0xff] }
 0x2e4   : > { %v879_v13 = vpop.f32.mrf.mxu2  ;;  %1503 = vmatpush.bf16.msra.mxu0 %v4132_v32 }
 0x2e5   : > { %v880_v14 = vadd.f32 %v5022_v12, %v879_v13  ;;  %v966_v4 = vrot.slane %v5041_v1, 2  ;;  %v949_v25 = vrot.slane %v5041_v1, 6  ;;  %v4128_v13 = vld [vmem:[%s5865_s1 + $0x188] sm:$0xff] }
 0x2e7   : > { %v904_v3 = vadd.f32 %v903_v0, %v880_v14  ;;  %v967_v59 = vsel %vm643_vm14, %v964_v5, %v966_v4  ;;  %v930_v10 = vpop.f32.mrf.mxu0  ;;  %v950_v8 = vsel %vm374_vm0, %v947_v29, %v949_v25  ;;  %1527 = vmatpush.bf16.msra.mxu1 %v4140_v23  ;;  %v4147_v29 = vld [vmem:[%s5865_s1 + $0x220] sm:$0xff]  ;;  %v4137_v0 = vld [vmem:[%s5865_s1 + $0x1d0] sm:$0xff] }
 0x2e8   : > { %v1029_v31 = vpack.c.bf16 %v967_v59, %v965_v16  ;;  %1552 = vmatpush.bf16.msra.mxu2 %v4147_v29  ;;  %1504 = vmatpush.bf16.msra.mxu0 %v4131_v56  ;;  %v4129_v5 = vld [vmem:[%s5865_s1 + $0x190] sm:$0xff]  ;;  %v4144_v16 = vld [vmem:[%s5865_s1 + $0x208] sm:$0xff]  ;;  %v5167_v23 = vld [vmem:[%s5866_s2 + $0x20] sm:$0xff] }
 0x2e9   : > { %v928_v19 = vadd.f32 %v927_v6, %v904_v3  ;;  %v906_v26 = vpop.f32.mrf.mxu3  ;;  %v4136_v6 = vld [vmem:[%s5865_s1 + $0x1c8] sm:$0xff]  ;;  %v4145_v14 = vld [vmem:[%s5865_s1 + $0x210] sm:$0xff] }
 0x2ea   : > { %1238 = vmatmul.bf16.vlgmr.msrb.gmra.mxu3 %v1029_v31  ;;  %v4143_v31 = vld [vmem:[%s5865_s1 + $0x200] sm:$0xff] }
 0x2eb   : > { %v5058_v24 = vmax.f32 %v928_v19, 0.0  ;;  %1528 = vmatpush.bf16.msra.mxu1 %v4139_v18 }
 0x2ec   : > { %v882_v46 = vpop.f32.mrf.mxu2  ;;  %1553 = vmatpush.bf16.msra.mxu2 %v4146_v62  ;;  %1505 = vmatpush.bf16.msra.mxu0 %v4130_v63 }
 0x2ed   : > { %v883_v27 = vadd.f32 %v5022_v12, %v882_v46  ;;  %v1031_v58 = vpack.c.bf16 %v5058_v24, %v5041_v1  ;;  %v951_v44 = vrot.slane %v5058_v24, 6  ;;  %v968_v35 = vrot.slane %v5058_v24, 2 }
 0x2ef   : > { %v907_v28 = vadd.f32 %v906_v26, %v883_v27  ;;  %1219 = vmatmul.bf16.gmra.mxu2 %v1031_v58  ;;  %v952_v33 = vsel %vm374_vm0, %v949_v25, %v951_v44  ;;  %v969_v60 = vsel %vm643_vm14, %v966_v4, %v968_v35  ;;  %v932_v11 = vpop.f32.mrf.mxu0  ;;  %1529 = vmatpush.bf16.msra.mxu1 %v4138_v57  ;;  %v4127_v4 = vld [vmem:[%s5865_s1 + $0x180] sm:$0xff]  ;;  %v5175_v57 = vld [vmem:[%s5866_s2 + $0x18] sm:$0xff] }
 0x2f0   : > { %v1030_v9 = vpack.c.bf16 %v952_v33, %v950_v8  ;;  %1506 = vmatpush.bf16.msra.mxu0 %v4129_v5  ;;  %1554 = vmatpush.bf16.msra.mxu2 %v4145_v14 }
 0x2f1   : > { %v931_v61 = vadd.f32 %v930_v10, %v907_v28  ;;  %v908_v39 = vpop.f32.mrf.mxu3 }
 0x2f2   : > { %1195 = vmatmul.bf16.gmra.mxu1 %v1030_v9 }
 0x2f3   : > { %v5070_v34 = vmax.f32 %v931_v61, 0.0  ;;  %1530 = vmatpush.bf16.msra.mxu1 %v4137_v0  ;;  %v5183_v0 = vld [vmem:[%s5866_s2 + $0x10] sm:$0xff] }
 0x2f4   : > { %v884_v36 = vpop.f32.mrf.mxu2  ;;  %1507 = vmatpush.bf16.msra.mxu0 %v4128_v13  ;;  %1555 = vmatpush.bf16.msra.mxu2 %v4144_v16  ;;  %v4158_v16 = vld [vmem:[%s5865_s1 + $0x278] sm:$0xff] }
 0x2f5   : > { %v885_v37 = vadd.f32 %v5022_v12, %v884_v36  ;;  %v970_v38 = vrot.slane %v5070_v34, 2  ;;  %v953_v47 = vrot.slane %v5070_v34, 6  ;;  %1654 = vmatpush.bf16.msra.mxu3 %v4158_v16 }
 0x2f7   : > { %v909_v40 = vadd.f32 %v908_v39, %v885_v37  ;;  %v971_v41 = vsel %vm643_vm14, %v968_v35, %v970_v38  ;;  %v954_v12 = vsel %vm374_vm0, %v951_v44, %v953_v47  ;;  %1531 = vmatpush.bf16.msra.mxu1 %v4136_v6 }
 0x2f8   : > { %v1032_v42 = vpack.c.bf16 %v971_v41, %v969_v60  ;;  %v1033_v20 = vpack.c.bf16 %v953_v47, %v954_v12  ;;  %1508 = vmatpush.bf16.msra.mxu0 %v4127_v4  ;;  %1556 = vmatpush.bf16.msra.mxu2 %v4143_v31 }
 0x2f9   : > { %v933_v43 = vadd.f32 %v932_v11, %v909_v40 }
 0x2fa   : > { %1243 = vmatmul.bf16.gmra.mxu3 %v1032_v42 }
 0x2fb   : > { %v5078_v17 = vmax.f32 %v933_v43, 0.0  ;;  %1532 = vmatpush.bf16.msra.mxu1 %v4135_v15 }
 0x2fc   : > { %1700 = vmatpush.msrb.mxu0 %v5162_v7  ;;  %1767 = vmatpush.msrb.mxu2 %v5162_v7 }
 0x2fd   : > { %v1034_v2 = vpack.c.bf16 %v5078_v17, %v5070_v34  ;;  %v972_v48 = vrot.slane %v5078_v17, 2 }
 0x2fe   : > { %1701 = vmatpush.msrb.mxu0 %v5167_v23  ;;  %1768 = vmatpush.msrb.mxu2 %v5167_v23 }
 0x2ff   : > { %1224 = vmatmul.bf16.gmra.mxu2 %v1034_v2  ;;  %v973_v49 = vsel %vm643_vm14, %v970_v38, %v972_v48  ;;  %2056 = vmatpush.msrb.mxu1 %v5162_v7 }
 0x300   : > { %v1035_v51 = vpack.c.bf16 0.0, %v973_v49  ;;  %1702 = vmatpush.msrb.mxu0 %v5175_v57  ;;  %1769 = vmatpush.msrb.mxu2 %v5175_v57 }
 0x301   : > { %2057 = vmatpush.msrb.mxu1 %v5167_v23 }
 0x302   : > { %1200 = vmatmul.bf16.gmra.mxu1 %v1033_v20  ;;  %1703 = vmatpush.msrb.mxu0 %v5183_v0 }
 0x303   : > { %2058 = vmatpush.msrb.mxu1 %v5175_v57  ;;  %1770 = vmatpush.msrb.mxu2 %v5183_v0 }
 0x305   : > { %2059 = vmatpush.msrb.mxu1 %v5183_v0 }
 0x30a   : > { %1248 = vmatmul.bf16.gmra.mxu3 %v1035_v51 }
 0x35f   : > { %v1191_v3 = vpop.f32.mrf.mxu1 }
 0x360   : > { %v1192_v22 = vadd.f32 %v5148_v21, %v1191_v3 }
 0x362   : > { %v1215_v59 = vpop.f32.mrf.mxu2 }
 0x363   : > { %v1216_v46 = vadd.f32 %v1215_v59, %v1192_v22  ;;  %v4157_v22 = vld [vmem:[%s5865_s1 + $0x270] sm:$0xff] }
 0x364   : > { %1655 = vmatpush.bf16.msra.mxu3 %v4157_v22 }
 0x367   : > { %v1193_v19 = vpop.f32.mrf.mxu1 }
 0x368   : > { %v1194_v45 = vadd.f32 %v5148_v21, %v1193_v19 }
 0x36a   : > { %v1217_v30 = vpop.f32.mrf.mxu2 }
 0x36b   : > { %v1218_v44 = vadd.f32 %v1217_v30, %v1194_v45 }
 0x36d   : > { %v1239_v25 = vpop.f32.mrf.mxu3 }
 0x36e   : > { %v1240_v27 = vadd.f32 %v1239_v25, %v1216_v46 }
 0x36f   : > { %v1196_v26 = vpop.f32.mrf.mxu1 }
 0x370   : > { %v1254_v28 = vmax.f32 %v1240_v27, 0.0  ;;  %v1197_v33 = vadd.f32 %v5148_v21, %v1196_v26 }
 0x372   : > { %v1220_v58 = vpop.f32.mrf.mxu2  ;;  %v1265_v35 = vrot.slane %v1254_v28, 6  ;;  %v1282_v2 = vrot.slane %v1254_v28, 2 }
 0x373   : > { %v1221_v38 = vadd.f32 %v1220_v58, %v1197_v33  ;;  %v4156_v58 = vld [vmem:[%s5865_s1 + $0x268] sm:$0xff] }
 0x374   : > { %1656 = vmatpush.bf16.msra.mxu3 %v4156_v58 }
 0x375   : > { %v1241_v10 = vpop.f32.mrf.mxu3 }
 0x376   : > { %v1242_v8 = vadd.f32 %v1241_v10, %v1218_v44 }
 0x377   : > { %v1198_v61 = vpop.f32.mrf.mxu1 }
 0x378   : > { %v1255_v9 = vmax.f32 %v1242_v8, 0.0  ;;  %v1199_v43 = vadd.f32 %v5148_v21, %v1198_v61 }
 0x37a   : > { %v1266_v36 = vrot.slane %v1255_v9, 6  ;;  %v1347_v37 = vpack.c.bf16 %v1255_v9, %v1254_v28  ;;  %v1222_v60 = vpop.f32.mrf.mxu2  ;;  %v1283_v42 = vrot.slane %v1255_v9, 2 }
 0x37b   : > { %v1223_v48 = vadd.f32 %v1222_v60, %v1199_v43  ;;  %v4152_v60 = vld [vmem:[%s5865_s1 + $0x248] sm:$0xff] }
 0x37c   : > { %v1267_v39 = vsel %vm374_vm0, %v1265_v35, %v1266_v36  ;;  %1533 = vmatmul.bf16.vlgmr.msra.gmra.mxu1 %v1347_v37  ;;  %v1284_v49 = vsel %vm643_vm14, %v1282_v2, %v1283_v42  ;;  %v4472_v37 = vmov 0.0  }
 0x37d   : > { %v3985_v40 = vpack.c.bf16 %v1267_v39, %v1265_v35  ;;  %v1244_v41 = vpop.f32.mrf.mxu3  ;;  %2342 = vmatpush.msra.mxu1 %v5162_v7  ;;  %v4154_v39 = vld [vmem:[%s5865_s1 + $0x258] sm:$0xff] }
 0x37e   : > { %v1245_v11 = vadd.f32 %v1244_v41, %v1221_v38  ;;  %v4155_v38 = vld [vmem:[%s5865_s1 + $0x260] sm:$0xff] }
 0x37f   : > { %3986 = vmatmul.msk.bf16.vlgmr.msra.gmra.mxu0 %vm4927_vm1, %v3985_v40  ;;  %v1201_v20 = vpop.f32.mrf.mxu1  ;;  %2343 = vmatpush.msra.mxu1 %v5167_v23  ;;  %v4153_v40 = vld [vmem:[%s5865_s1 + $0x250] sm:$0xff]  ;;  %v4151_v41 = vld [vmem:[%s5865_s1 + $0x240] sm:$0xff] }
 0x380   : > { %v1256_v47 = vmax.f32 %v1245_v11, 0.0  ;;  %v1202_v29 = vadd.f32 %v5148_v21, %v1201_v20  ;;  %1989 = vmatpush.msra.mxu0 %v5162_v7  ;;  %1657 = vmatpush.bf16.msra.mxu3 %v4155_v38 }
 0x381   : > { %2344 = vmatpush.msra.mxu1 %v5175_v57 }
 0x382   : > { %v1285_v12 = vrot.slane %v1256_v47, 2  ;;  %v1225_v32 = vpop.f32.mrf.mxu2  ;;  %v1268_v18 = vrot.slane %v1256_v47, 6  ;;  %1990 = vmatpush.msra.mxu0 %v5167_v23 }
 0x383   : > { %v1226_v5 = vadd.f32 %v1225_v32, %v1202_v29  ;;  %2345 = vmatpush.msra.mxu1 %v5183_v0 }
 0x384   : > { %v1286_v51 = vsel %vm643_vm14, %v1283_v42, %v1285_v12  ;;  %v1269_v6 = vsel %vm374_vm0, %v1266_v36, %v1268_v18  ;;  %1991 = vmatpush.msra.mxu0 %v5175_v57  ;;  %1658 = vmatpush.bf16.msra.mxu3 %v4154_v39 }
 0x385   : > { %v1246_v52 = vpop.f32.mrf.mxu3  ;;  %v1348_v53 = vpack.c.bf16 %v1286_v51, %v1284_v49 }
 0x386   : > { %v1247_v55 = vadd.f32 %v1246_v52, %v1223_v48  ;;  %1992 = vmatpush.msra.mxu0 %v5183_v0 }
 0x387   : > { %1557 = vmatmul.bf16.vlgmr.msra.gmra.mxu2 %v1348_v53  ;;  %v1203_v14 = vpop.f32.mrf.mxu1 }
 0x388   : > { %v1257_v56 = vmax.f32 %v1247_v55, 0.0  ;;  %v1204_v31 = vadd.f32 %v5148_v21, %v1203_v14  ;;  %1841 = vmatpush.msra.mxu2 %v5162_v7  ;;  %1659 = vmatpush.bf16.msra.mxu3 %v4153_v40  ;;  %v4221_v40 = vld [vmem:[%s5866_s2 + $0x3] ss:$0 sm:$0xff] }
 0x38a   : > { %v1270_v62 = vrot.slane %v1257_v56, 6  ;;  %v1350_v63 = vpack.c.bf16 %v1257_v56, %v1256_v47  ;;  %v1287_v59 = vrot.slane %v1257_v56, 2  ;;  %v1227_v30 = vpop.f32.mrf.mxu2  ;;  %1842 = vmatpush.msra.mxu2 %v5167_v23  ;;  %v4219_v47 = vld [vmem:[%s5866_s2 + $0x2] ss:$0 sm:$0xff] }
 0x38b   : > { %v1228_v21 = vadd.f32 %v1227_v30, %v1204_v31 }
 0x38c   : > { %1538 = vmatmul.bf16.gmra.mxu1 %v1350_v63  ;;  %v1271_v13 = vsel %vm374_vm0, %v1268_v18, %v1270_v62  ;;  %v1288_v26 = vsel %vm643_vm14, %v1285_v12, %v1287_v59  ;;  %1843 = vmatpush.msra.mxu2 %v5175_v57 }
 0x38d   : > { %v1249_v15 = vpop.f32.mrf.mxu3  ;;  %v1349_v4 = vpack.c.bf16 %v1271_v13, %v1269_v6  ;;  %1660 = vmatpush.bf16.msra.mxu3 %v4152_v60 }
 0x38e   : > { %v1250_v3 = vadd.f32 %v1249_v15, %v1226_v5  ;;  %1844 = vmatpush.msra.mxu2 %v5183_v0 }
 0x38f   : > { %1514 = vmatmul.bf16.gmra.mxu0 %v1349_v4 }
 0x390   : > { %v1258_v19 = vmax.f32 %v1250_v3, 0.0 }
 0x391   : > { %1661 = vmatpush.bf16.msra.mxu3 %v4151_v41 }
 0x392   : > { %v1289_v25 = vrot.slane %v1258_v19, 2  ;;  %v1272_v10 = vrot.slane %v1258_v19, 6 }
 0x394   : > { %v1290_v46 = vsel %vm643_vm14, %v1287_v59, %v1289_v25  ;;  %v1273_v33 = vsel %vm374_vm0, %v1270_v62, %v1272_v10 }
 0x395   : > { %v1251_v45 = vpop.f32.mrf.mxu3  ;;  %v1351_v27 = vpack.c.bf16 %v1290_v46, %v1288_v26  ;;  %v1352_v9 = vpack.c.bf16 %v1272_v10, %v1273_v33  ;;  %1915 = vmatpush.msrb.mxu3 %v5162_v7 }
 0x396   : > { %v1252_v44 = vadd.f32 %v1251_v45, %v1228_v21 }
 0x397   : > { %1562 = vmatmul.bf16.gmra.mxu2 %v1351_v27  ;;  %1916 = vmatpush.msrb.mxu3 %v5167_v23  ;;  %v5257_v27 = vld [vmem:[%s5866_s2 + $0x4] ss:$0 sm:$0xff] }
 0x398   : > { %v1259_v28 = vmax.f32 %v1252_v44, 0.0 }
 0x399   : > { %1917 = vmatpush.msrb.mxu3 %v5175_v57 }
 0x39a   : > { %v1353_v8 = vpack.c.bf16 %v1259_v28, %v1258_v19  ;;  %v1291_v61 = vrot.slane %v1259_v28, 2 }
 0x39b   : > { %1918 = vmatpush.msrb.mxu3 %v5183_v0 }
 0x39c   : > { %1543 = vmatmul.bf16.gmra.mxu1 %v1353_v8  ;;  %v1292_v35 = vsel %vm643_vm14, %v1289_v25, %v1291_v61 }
 0x39d   : > { %v1354_v36 = vpack.c.bf16 0.0, %v1292_v35 }
 0x39f   : > { %1519 = vmatmul.bf16.gmra.mxu0 %v1352_v9 }
 0x3a7   : > { %1567 = vmatmul.bf16.gmra.mxu2 %v1354_v36 }
 0x3af   : > { %1704 = vmatmul.f32.vlgmr.msrb.gmra.mxu0 %v4472_v37 }
 0x3b0   : > { %2275 = vmatpush.msrb.mxu0 %v5162_v7 }
 0x3b2   : > { %2276 = vmatpush.msrb.mxu0 %v5167_v23 }
 0x3b4   : > { %2277 = vmatpush.msrb.mxu0 %v5175_v57 }
 0x3b6   : > { %2278 = vmatpush.msrb.mxu0 %v5183_v0 }
 0x3f9   : > { %v1534_v42 = vpop.f32.mrf.mxu1 }
 0x3fc   : > { %v1510_v11 = vpop.f32.mrf.mxu0 }
 0x3fd   : > { %v1511_v12 = vadd.f32 %v4219_v47, %v1510_v11 }
 0x3ff   : > { %v1535_v51 = vadd.f32 %v1534_v42, %v1511_v12 }
 0x401   : > { %v1536_v2 = vpop.f32.mrf.mxu1 }
 0x404   : > { %v1512_v43 = vpop.f32.mrf.mxu0 }
 0x405   : > { %v1513_v49 = vadd.f32 %v4219_v47, %v1512_v43 }
 0x407   : > { %v1537_v53 = vadd.f32 %v1536_v2, %v1513_v49 }
 0x409   : > { %v1539_v55 = vpop.f32.mrf.mxu1 }
 0x40a   : > { %v1558_v20 = vpop.f32.mrf.mxu2 }
 0x40b   : > { %v1559_v52 = vadd.f32 %v1558_v20, %v1535_v51 }
 0x40c   : > { %v1515_v48 = vpop.f32.mrf.mxu0 }
 0x40d   : > { %v1573_v18 = vadd.f32 %v1559_v52, %v5029_v50  ;;  %v1516_v6 = vadd.f32 %v4219_v47, %v1515_v48 }
 0x40f   : > { %v1579_v63 = vmax.f32 %v1573_v18, 0.0  ;;  %v1540_v16 = vadd.f32 %v1539_v55, %v1516_v6 }
 0x411   : > { %v1541_v15 = vpop.f32.mrf.mxu1 }
 0x412   : > { %v1560_v32 = vpop.f32.mrf.mxu2 }
 0x413   : > { %v1561_v29 = vadd.f32 %v1560_v32, %v1537_v53 }
 0x414   : > { %v1517_v56 = vpop.f32.mrf.mxu0 }
 0x415   : > { %v1574_v62 = vadd.f32 %v1561_v29, %v5031_v54  ;;  %v1518_v3 = vadd.f32 %v4219_v47, %v1517_v56 }
 0x417   : > { %v1580_v5 = vmax.f32 %v1574_v62, 0.0  ;;  %v1542_v50 = vadd.f32 %v1541_v15, %v1518_v3 }
 0x419   : > { %v1601_v13 = vpack.c.bf16 %v1580_v5, %v1579_v63  ;;  %v1544_v25 = vpop.f32.mrf.mxu1 }
 0x41a   : > { %v1563_v14 = vpop.f32.mrf.mxu2 }
 0x41b   : > { %1662 = vmatmul.bf16.vlgmr.msra.gmra.mxu3 %v1601_v13  ;;  %v1564_v59 = vadd.f32 %v1563_v14, %v1540_v16 }
 0x41c   : > { %v1520_v4 = vpop.f32.mrf.mxu0  ;;  %2202 = vmatpush.msra.mxu3 %v5162_v7 }
 0x41d   : > { %v1575_v54 = vadd.f32 %v1564_v59, %v5041_v1  ;;  %v1521_v46 = vadd.f32 %v4219_v47, %v1520_v4 }
 0x41e   : > { %2203 = vmatpush.msra.mxu3 %v5167_v23 }
 0x41f   : > { %v1581_v21 = vmax.f32 %v1575_v54, 0.0  ;;  %v1545_v28 = vadd.f32 %v1544_v25, %v1521_v46 }
 0x420   : > { %2204 = vmatpush.msra.mxu3 %v5175_v57 }
 0x422   : > { %v1565_v31 = vpop.f32.mrf.mxu2  ;;  %2205 = vmatpush.msra.mxu3 %v5183_v0 }
 0x423   : > { %v1566_v19 = vadd.f32 %v1565_v31, %v1542_v50 }
 0x424   : > { %v1522_v30 = vpop.f32.mrf.mxu0 }
 0x425   : > { %v1576_v22 = vadd.f32 %v1566_v19, %v5058_v24  ;;  %v1523_v10 = vadd.f32 %v4219_v47, %v1522_v30  ;;  %v1546_v24 = vpop.f32.mrf.mxu1 }
 0x427   : > { %v1582_v26 = vmax.f32 %v1576_v22, 0.0  ;;  %v1547_v33 = vadd.f32 %v1546_v24, %v1523_v10 }
 0x429   : > { %v1602_v45 = vpack.c.bf16 %v1582_v26, %v1581_v21 }
 0x42a   : > { %v1568_v58 = vpop.f32.mrf.mxu2 }
 0x42b   : > { %1667 = vmatmul.bf16.gmra.mxu3 %v1602_v45  ;;  %v1569_v8 = vadd.f32 %v1568_v58, %v1545_v28 }
 0x42c   : > { %v1705_v44 = vpop.f32.mrf.mxu0 }
 0x42d   : > { %v1706_v1 = vadd.f32 %v5257_v27, %v1705_v44  ;;  %v1577_v61 = vadd.f32 %v1569_v8, %v5070_v34 }
 0x42f   : > { %1729 = vrot.lane.b32.xlu2 %v1706_v1, %s4473_s4  ;;  %v1583_v37 = vmax.f32 %v1577_v61, 0.0 }
 0x432   : > { %v1570_v9 = vpop.f32.mrf.mxu2 }
 0x433   : > { %v1571_v35 = vadd.f32 %v1570_v9, %v1547_v33 }
 0x435   : > { %v1578_v36 = vadd.f32 %v1571_v35, %v5078_v17 }
 0x437   : > { %v1584_v38 = vmax.f32 %v1578_v36, 0.0 }
 0x439   : > { %v1603_v39 = vpack.c.bf16 %v1584_v38, %v1583_v37 }
 0x43b   : > { %1672 = vmatmul.bf16.gmra.mxu3 %v1603_v39 }
 0x489   : > { %v1730_v29 = vpop.permute.xlu2 %1729 }
 0x49e   : > { %v1663_v60 = vpop.f32.mrf.mxu3 }
 0x49f   : > { %v5266_v41 = vadd.f32 %v4221_v40, %v1663_v60 }
 0x4a1   : > { %v1708_v11 = vadd.f32 %v1706_v1, %v5266_v41 }
 0x4a3   : > { %v4019_v42 = vmul.f32 -1.442695, %v1708_v11 }
 0x4a5   : > { %4245 = vpow2.f32 %v4019_v42 }
 0x4a6   : > { %v1665_v43 = vpop.f32.mrf.mxu3 }
 0x4a7   : > { %v5269_v34 = vadd.f32 %v4221_v40, %v1665_v43 }
 0x4ab   : > { %v4246_v47 = vpop.eup %4245 }
 0x4ac   : > { %v1712_v17 = vadd.f32 1.0, %v4246_v47 }
 0x4ae   : > { %v1668_v2 = vpop.f32.mrf.mxu3  ;;  %4247 = vrcp.f32 %v1712_v17  ;;  %v1724_v53 = vand.u32 2147483648, %v1712_v17  ;;  %v1722_v32 = vand.u32 2147483647, %v1712_v17  ;;  %vm1718_vm2 = vweird.f32 %v1712_v17 }
 0x4af   : > { %v5271_v12 = vadd.f32 %v4221_v40, %v1668_v2 }
 0x4b0   : > { %v1725_v56 = vor.u32 1.1754944e-38, %v1724_v53  ;;  %vm1723_vm4 = vcmp.eq.f32.partialorder %v1722_v32, 8.507059e+37 }
 0x4b4   : > { %v4248_v20 = vpop.eup %4247 }
 0x4b5   : > { %v1714_v48 = vmul.f32 %v4248_v20, %v1712_v17  ;;  %vm1719_vm0 = vweird.f32 %v4248_v20 }
 0x4b6   : > { %v1670_v49 = vpop.f32.mrf.mxu3  ;;  %vm1720_vm3 = vmor %vm1718_vm2, %vm1719_vm0 }
 0x4b7   : > { %v5273_v51 = vadd.f32 %v4221_v40, %v1670_v49  ;;  %v1715_v52 = vsub.f32 1.0, %v1714_v48 }
 0x4b9   : > { %v1716_v55 = vmul.f32 %v4248_v20, %v1715_v52 }
 0x4bb   : > { %v1717_v18 = vadd.f32 %v4248_v20, %v1716_v55 }
 0x4bd   : > { %v1721_v62 = vsel %vm1720_vm3, %v4248_v20, %v1717_v18 }
 0x4be   : > { %v1726_v63 = vsel %vm1723_vm4, %v1725_v56, %v1721_v62  ;;  %v1673_v5 = vpop.f32.mrf.mxu3 }
 0x4bf   : > { %v1732_v6 = vmul.f32 %v1730_v29, %v1726_v63  ;;  %v5275_v13 = vadd.f32 %v4221_v40, %v1673_v5  ;;  %v1739_v3 = vsub.f32 1.0, %v1726_v63  ;;  %v1745_v59 = vmul.f32 0.0, %v1726_v63 }
 0x4c1   : > { %1734 = vrot.lane.b32.xlu0 %v1732_v6, %s4473_s4 }
 0x533   : > { %v1735_v14 = vpop.permute.xlu0 %1734 }
 0x534   : > { %v1737_v15 = vadd.f32 %v1735_v14, %v5266_v41 }
 0x536   : > { %4249 = vtanh.f32 %v1737_v15 }
 0x53c   : > { %v4250_v4 = vpop.eup %4249 }
 0x53d   : > { %1741 = vrot.lane.b32.xlu1 %v4250_v4, %s4474_s8 }
 0x5af   : > { %v1742_v16 = vpop.permute.xlu1 %1741 }
 0x5b0   : > { %v1744_v50 = vmul.f32 %v1742_v16, %v1739_v3 }
 0x5b2   : > { %v1746_v31 = vadd.f32 %v1745_v59, %v1744_v50 }
 0x5b4   : > { %1748 = vrot.lane.b32.xlu0 %v1746_v31, %s4474_s8  ;;  %v1814_v33 = vrot.slane %v1746_v31, 6 }
 0x626   : > { %v1749_v54 = vpop.permute.xlu0 %1748 }
 0x627   : > { %1752 = vst.msk [vmem:[#allocation2] sm:$0x3] %vm1751_vm5, %v1749_v54  ;;  %4020 = vmatmul.msk.f32.vlgmr.msrb.gmra.mxu2 %vm1684_vm6, %v1749_v54 }
 0x628   : > { %2129 = vmatpush.msrb.mxu2 %v5162_v7 }
 0x62a   : > { %2130 = vmatpush.msrb.mxu2 %v5167_v23 }
 0x62c   : > { %2131 = vmatpush.msrb.mxu2 %v5175_v57 }
 0x62e   : > { %2132 = vmatpush.msrb.mxu2 %v5183_v0 }
 0x6aa   : > { %v1772_v19 = vpop.f32.mrf.mxu2 }
 0x6ab   : > { %v1773_v30 = vadd.f32 %v5257_v27, %v1772_v19 }
 0x6ad   : > { %v1776_v22 = vrot.slane %v1773_v30, 6 }
 0x6af   : > { %v1778_v25 = vadd.f32 %v1776_v22, %v5266_v41  ;;  %1798 = vrot.lane.b32.xlu2 %v1776_v22, %s4473_s4 }
 0x6b1   : > { %v4021_v21 = vmul.f32 -1.442695, %v1778_v25 }
 0x6b3   : > { %4251 = vpow2.f32 %v4021_v21 }
 0x6b9   : > { %v4252_v26 = vpop.eup %4251 }
 0x6ba   : > { %v1782_v46 = vadd.f32 1.0, %v4252_v26 }
 0x6bc   : > { %4253 = vrcp.f32 %v1782_v46  ;;  %v1794_v10 = vand.u32 2147483648, %v1782_v46  ;;  %v1792_v1 = vand.u32 2147483647, %v1782_v46  ;;  %vm1788_vm8 = vweird.f32 %v1782_v46 }
 0x6be   : > { %v1795_v24 = vor.u32 1.1754944e-38, %v1794_v10  ;;  %vm1793_vm10 = vcmp.eq.f32.partialorder %v1792_v1, 8.507059e+37 }
 0x6c2   : > { %v4254_v45 = vpop.eup %4253 }
 0x6c3   : > { %v1784_v58 = vmul.f32 %v4254_v45, %v1782_v46  ;;  %vm1789_vm7 = vweird.f32 %v4254_v45  ;;  %v5318_v46 = vpop.f32.mrf.mxu3 }
 0x6c4   : > { %vm1790_vm9 = vmor %vm1788_vm8, %vm1789_vm7 }
 0x6c5   : > { %v1785_v44 = vsub.f32 1.0, %v1784_v58 }
 0x6c7   : > { %v1786_v28 = vmul.f32 %v4254_v45, %v1785_v44 }
 0x6c9   : > { %v1787_v8 = vadd.f32 %v4254_v45, %v1786_v28 }
 0x6cb   : > { %v1791_v9 = vsel %vm1790_vm9, %v4254_v45, %v1787_v8 }
 0x6cc   : > { %v1796_v61 = vsel %vm1793_vm10, %v1795_v24, %v1791_v9 }
 0x6cd   : > { %v1816_v35 = vmul.f32 %v1814_v33, %v1796_v61  ;;  %v1808_v60 = vsub.f32 1.0, %v1796_v61 }
 0x709   : > { %v1799_v36 = vpop.permute.xlu2 %1798 }
 0x70a   : > { %v1801_v37 = vmul.f32 %v1799_v36, %v1796_v61 }
 0x70c   : > { %1803 = vrot.lane.b32.xlu1 %v1801_v37, %s4473_s4 }
 0x77e   : > { %v1804_v38 = vpop.permute.xlu1 %1803 }
 0x77f   : > { %v1806_v39 = vadd.f32 %v1804_v38, %v5266_v41 }
 0x781   : > { %4255 = vtanh.f32 %v1806_v39 }
 0x787   : > { %v4256_v40 = vpop.eup %4255 }
 0x788   : > { %1810 = vrot.lane.b32.xlu0 %v4256_v40, %s4474_s8 }
 0x7fa   : > { %v1811_v11 = vpop.permute.xlu0 %1810 }
 0x7fb   : > { %v1813_v42 = vmul.f32 %v1811_v11, %v1808_v60 }
 0x7fd   : > { %v5293_v43 = vadd.f32 %v1816_v35, %v1813_v42 }
 0x7ff   : > { %v1824_v47 = vrot.slane %v5293_v43, 2  ;;  %v1888_v54 = vrot.slane %v5293_v43, 6 }
 0x801   : > { %1825 = vrot.lane.b32.xlu2 %v1824_v47, %s4474_s8 }
 0x85b   : > { %v1826_v17 = vpop.permute.xlu2 %1825 }
 0x85c   : > { %4022 = vmatmul.msk.f32.vlgmr.msra.gmra.mxu2 %vm1684_vm6, %v1826_v17 }
 0x85d   : > { %2415 = vmatpush.msra.mxu2 %v5162_v7 }
 0x85f   : > { %2416 = vmatpush.msra.mxu2 %v5167_v23 }
 0x861   : > { %2417 = vmatpush.msra.mxu2 %v5175_v57 }
 0x863   : > { %2418 = vmatpush.msra.mxu2 %v5183_v0 }
 0x8df   : > { %v1846_v2 = vpop.f32.mrf.mxu2 }
 0x8e0   : > { %v1847_v20 = vadd.f32 %v5257_v27, %v1846_v2 }
 0x8e2   : > { %v1850_v48 = vrot.slane %v1847_v20, 4 }
 0x8e4   : > { %1872 = vrot.lane.b32.xlu1 %v1850_v48, %s4473_s4  ;;  %v1852_v49 = vadd.f32 %v1850_v48, %v5266_v41 }
 0x8e6   : > { %v4023_v52 = vmul.f32 -1.442695, %v1852_v49 }
 0x8e8   : > { %4257 = vpow2.f32 %v4023_v52 }
 0x8ee   : > { %v4258_v53 = vpop.eup %4257 }
 0x8ef   : > { %v1856_v55 = vadd.f32 1.0, %v4258_v53 }
 0x8f1   : > { %4259 = vrcp.f32 %v1856_v55  ;;  %v1868_v63 = vand.u32 2147483648, %v1856_v55  ;;  %vm1862_vm12 = vweird.f32 %v1856_v55  ;;  %v1866_v5 = vand.u32 2147483647, %v1856_v55 }
 0x8f3   : > { %v1869_v14 = vor.u32 1.1754944e-38, %v1868_v63  ;;  %vm1867_vm14 = vcmp.eq.f32.partialorder %v1866_v5, 8.507059e+37 }
 0x8f7   : > { %v4260_v32 = vpop.eup %4259 }
 0x8f8   : > { %v1858_v18 = vmul.f32 %v4260_v32, %v1856_v55  ;;  %vm1863_vm11 = vweird.f32 %v4260_v32 }
 0x8f9   : > { %vm1864_vm13 = vmor %vm1862_vm12, %vm1863_vm11 }
 0x8fa   : > { %v1859_v29 = vsub.f32 1.0, %v1858_v18 }
 0x8fc   : > { %v1860_v56 = vmul.f32 %v4260_v32, %v1859_v29 }
 0x8fe   : > { %v1861_v62 = vadd.f32 %v4260_v32, %v1860_v56 }
 0x900   : > { %v1865_v6 = vsel %vm1864_vm13, %v4260_v32, %v1861_v62 }
 0x901   : > { %v1870_v4 = vsel %vm1867_vm14, %v1869_v14, %v1865_v6 }
 0x902   : > { %v1882_v31 = vsub.f32 1.0, %v1870_v4  ;;  %v1890_v30 = vmul.f32 %v1888_v54, %v1870_v4 }
 0x956   : > { %v1873_v15 = vpop.permute.xlu1 %1872 }
 0x957   : > { %v1875_v3 = vmul.f32 %v1873_v15, %v1870_v4 }
 0x959   : > { %1877 = vrot.lane.b32.xlu0 %v1875_v3, %s4473_s4 }
 0x9cb   : > { %v1878_v16 = vpop.permute.xlu0 %1877 }
 0x9cc   : > { %v1880_v59 = vadd.f32 %v1878_v16, %v5266_v41 }
 0x9ce   : > { %4261 = vtanh.f32 %v1880_v59 }
 0x9d4   : > { %v4262_v50 = vpop.eup %4261 }
 0x9d5   : > { %1884 = vrot.lane.b32.xlu2 %v4262_v50, %s4474_s8 }
 0xa2f   : > { %v1885_v19 = vpop.permute.xlu2 %1884 }
 0xa30   : > { %v1887_v22 = vmul.f32 %v1885_v19, %v1882_v31 }
 0xa32   : > { %v5309_v25 = vadd.f32 %v1890_v30, %v1887_v22 }
 0xa34   : > { %v1898_v21 = vrot.slane %v5309_v25, 4  ;;  %v1962_v20 = vrot.slane %v5309_v25, 6 }
 0xa36   : > { %1899 = vrot.lane.b32.xlu1 %v1898_v21, %s4474_s8 }
 0xaa8   : > { %v1900_v26 = vpop.permute.xlu1 %1899 }
 0xaa9   : > { %4024 = vmatmul.msk.f32.vlgmr.msrb.gmra.mxu3 %vm1684_vm6, %v1900_v26 }
 0xaaa   : > { %2488 = vmatpush.msrb.mxu3 %v5162_v7 }
 0xaac   : > { %2489 = vmatpush.msrb.mxu3 %v5167_v23 }
 0xaae   : > { %2490 = vmatpush.msrb.mxu3 %v5175_v57 }
 0xab0   : > { %2491 = vmatpush.msrb.mxu3 %v5183_v0 }
 0xb2c   : > { %v1920_v45 = vpop.f32.mrf.mxu3 }
 0xb2d   : > { %v1921_v58 = vadd.f32 %v5257_v27, %v1920_v45 }
 0xb2f   : > { %v1924_v44 = vrot.slane %v1921_v58, 2 }
 0xb31   : > { %1946 = vrot.lane.b32.xlu0 %v1924_v44, %s4473_s4  ;;  %v1926_v10 = vadd.f32 %v1924_v44, %v5266_v41 }
 0xb33   : > { %v4025_v28 = vmul.f32 -1.442695, %v1926_v10 }
 0xb35   : > { %4263 = vpow2.f32 %v4025_v28 }
 0xb3b   : > { %v4264_v1 = vpop.eup %4263 }
 0xb3c   : > { %v1930_v8 = vadd.f32 1.0, %v4264_v1 }
 0xb3e   : > { %4265 = vrcp.f32 %v1930_v8  ;;  %v1942_v36 = vand.u32 2147483648, %v1930_v8  ;;  %vm1936_vm1 = vweird.f32 %v1930_v8  ;;  %v1940_v37 = vand.u32 2147483647, %v1930_v8 }
 0xb40   : > { %v1943_v39 = vor.u32 1.1754944e-38, %v1942_v36  ;;  %vm1941_vm2 = vcmp.eq.f32.partialorder %v1940_v37, 8.507059e+37 }
 0xb44   : > { %v4266_v24 = vpop.eup %4265 }
 0xb45   : > { %v1932_v33 = vmul.f32 %v4266_v24, %v1930_v8  ;;  %vm1937_vm15 = vweird.f32 %v4266_v24 }
 0xb46   : > { %vm1938_vm0 = vmor %vm1936_vm1, %vm1937_vm15 }
 0xb47   : > { %v1933_v9 = vsub.f32 1.0, %v1932_v33 }
 0xb49   : > { %v1934_v61 = vmul.f32 %v4266_v24, %v1933_v9 }
 0xb4b   : > { %v1935_v35 = vadd.f32 %v4266_v24, %v1934_v61 }
 0xb4d   : > { %v1939_v38 = vsel %vm1938_vm0, %v4266_v24, %v1935_v35 }
 0xb4e   : > { %v1944_v60 = vsel %vm1941_vm2, %v1943_v39, %v1939_v38 }
 0xb4f   : > { %v1956_v2 = vsub.f32 1.0, %v1944_v60  ;;  %v1964_v49 = vmul.f32 %v1962_v20, %v1944_v60 }
 0xba3   : > { %v1947_v40 = vpop.permute.xlu0 %1946 }
 0xba4   : > { %v1949_v11 = vmul.f32 %v1947_v40, %v1944_v60 }
 0xba6   : > { %1951 = vrot.lane.b32.xlu2 %v1949_v11, %s4473_s4 }
 0xc00   : > { %v1952_v42 = vpop.permute.xlu2 %1951 }
 0xc01   : > { %v1954_v47 = vadd.f32 %v1952_v42, %v5266_v41 }
 0xc03   : > { %4267 = vtanh.f32 %v1954_v47 }
 0xc09   : > { %v4268_v17 = vpop.eup %4267 }
 0xc0a   : > { %1958 = vrot.lane.b32.xlu1 %v4268_v17, %s4474_s8 }
 0xc7c   : > { %v1959_v48 = vpop.permute.xlu1 %1958 }
 0xc7d   : > { %v1961_v52 = vmul.f32 %v1959_v48, %v1956_v2 }
 0xc7f   : > { %v5327_v53 = vadd.f32 %v1964_v49, %v1961_v52 }
 0xc81   : > { %v1972_v55 = vrot.slane %v5327_v53, 6 }
 0xc83   : > { %1973 = vrot.lane.b32.xlu0 %v1972_v55, %s4474_s8 }
 0xcf5   : > { %v1974_v32 = vpop.permute.xlu0 %1973 }
 0xcf6   : > { %4026 = vmatmul.msk.f32.vlgmr.msra.gmra.mxu0 %vm1684_vm6, %v1974_v32 }
 0xcf7   : > { %2561 = vmatpush.msra.mxu0 %v5162_v7 }
 0xcf9   : > { %2562 = vmatpush.msra.mxu0 %v5167_v23 }
 0xcfb   : > { %2563 = vmatpush.msra.mxu0 %v5175_v57 }
 0xcfd   : > { %2564 = vmatpush.msra.mxu0 %v5183_v0 }
 0xd73   : > { %v1994_v41 = vpop.f32.mrf.mxu0 }
 0xd74   : > { %v1995_v18 = vadd.f32 %v5257_v27, %v1994_v41 }
 0xd76   : > { %2018 = vrot.lane.b32.xlu2 %v1995_v18, %s4473_s4  ;;  %v1997_v29 = vadd.f32 %v1995_v18, %v5269_v34 }
 0xd78   : > { %v4027_v56 = vmul.f32 -1.442695, %v1997_v29 }
 0xd7a   : > { %4269 = vpow2.f32 %v4027_v56 }
 0xd80   : > { %v4270_v62 = vpop.eup %4269 }
 0xd81   : > { %v2001_v63 = vadd.f32 1.0, %v4270_v62 }
 0xd83   : > { %4271 = vrcp.f32 %v2001_v63  ;;  %v2013_v3 = vand.u32 2147483648, %v2001_v63  ;;  %vm2007_vm4 = vweird.f32 %v2001_v63  ;;  %v2011_v16 = vand.u32 2147483647, %v2001_v63 }
 0xd85   : > { %v2014_v50 = vor.u32 1.1754944e-38, %v2013_v3  ;;  %vm2012_vm8 = vcmp.eq.f32.partialorder %v2011_v16, 8.507059e+37 }
 0xd89   : > { %v4272_v5 = vpop.eup %4271 }
 0xd8a   : > { %v2003_v6 = vmul.f32 %v4272_v5, %v2001_v63  ;;  %vm2008_vm3 = vweird.f32 %v4272_v5 }
 0xd8b   : > { %vm2009_vm7 = vmor %vm2007_vm4, %vm2008_vm3 }
 0xd8c   : > { %v2004_v14 = vsub.f32 1.0, %v2003_v6 }
 0xd8e   : > { %v2005_v15 = vmul.f32 %v4272_v5, %v2004_v14 }
 0xd90   : > { %v2006_v4 = vadd.f32 %v4272_v5, %v2005_v15 }
 0xd92   : > { %v2010_v59 = vsel %vm2009_vm7, %v4272_v5, %v2006_v4 }
 0xd93   : > { %v2015_v54 = vsel %vm2012_vm8, %v2014_v50, %v2010_v59 }
 0xd94   : > { %v2028_v26 = vsub.f32 1.0, %v2015_v54  ;;  %v2035_v58 = vmul.f32 %v2015_v54, %v1972_v55 }
 0xdd0   : > { %v2019_v31 = vpop.permute.xlu2 %2018 }
 0xdd1   : > { %v2021_v19 = vmul.f32 %v2019_v31, %v2015_v54 }
 0xdd3   : > { %2023 = vrot.lane.b32.xlu1 %v2021_v19, %s4473_s4 }
 0xe45   : > { %v2024_v30 = vpop.permute.xlu1 %2023 }
 0xe46   : > { %v2026_v22 = vadd.f32 %v2024_v30, %v5269_v34 }
 0xe48   : > { %4273 = vtanh.f32 %v2026_v22 }
 0xe4e   : > { %v4274_v21 = vpop.eup %4273 }
 0xe4f   : > { %2030 = vrot.lane.b32.xlu0 %v4274_v21, %s4474_s8 }
 0xec1   : > { %v2031_v45 = vpop.permute.xlu0 %2030 }
 0xec2   : > { %v2033_v44 = vmul.f32 %v2031_v45, %v2028_v26 }
 0xec4   : > { %v2036_v10 = vadd.f32 %v2035_v58, %v2033_v44 }
 0xec6   : > { %2038 = vrot.lane.b32.xlu2 %v2036_v10, %s4474_s8  ;;  %v2103_v55 = vrot.slane %v2036_v10, 6 }
 0xf20   : > { %v2039_v28 = vpop.permute.xlu2 %2038 }
 0xf21   : > { %2041 = vst.msk [vmem:[#allocation2 + $0x8] sm:$0x3] %vm1751_vm5, %v2039_v28  ;;  %4028 = vmatmul.msk.f32.vlgmr.msrb.gmra.mxu1 %vm1684_vm6, %v2039_v28 }
 0xf22   : > { %2628 = vmatpush.msrb.mxu1 %v5162_v7 }
 0xf24   : > { %2629 = vmatpush.msrb.mxu1 %v5167_v23 }
 0xf26   : > { %2630 = vmatpush.msrb.mxu1 %v5175_v57 }
 0xf28   : > { %2631 = vmatpush.msrb.mxu1 %v5183_v0 }
 0xf9e   : > { %v2061_v1 = vpop.f32.mrf.mxu1 }
 0xf9f   : > { %v2062_v8 = vadd.f32 %v5257_v27, %v2061_v1 }
 0xfa1   : > { %v2065_v24 = vrot.slane %v2062_v8, 6 }
 0xfa3   : > { %2087 = vrot.lane.b32.xlu1 %v2065_v24, %s4473_s4  ;;  %v2067_v33 = vadd.f32 %v2065_v24, %v5269_v34 }
 0xfa5   : > { %v4029_v9 = vmul.f32 -1.442695, %v2067_v33 }
 0xfa7   : > { %4275 = vpow2.f32 %v4029_v9 }
 0xfad   : > { %v4276_v61 = vpop.eup %4275 }
 0xfae   : > { %v2071_v35 = vadd.f32 1.0, %v4276_v61 }
 0xfb0   : > { %4277 = vrcp.f32 %v2071_v35  ;;  %v2083_v60 = vand.u32 2147483648, %v2071_v35  ;;  %vm2077_vm10 = vweird.f32 %v2071_v35  ;;  %v2081_v11 = vand.u32 2147483647, %v2071_v35 }
 0xfb2   : > { %v2084_v47 = vor.u32 1.1754944e-38, %v2083_v60  ;;  %vm2082_vm12 = vcmp.eq.f32.partialorder %v2081_v11, 8.507059e+37 }
 0xfb6   : > { %v4278_v36 = vpop.eup %4277 }
 0xfb7   : > { %v2073_v37 = vmul.f32 %v4278_v36, %v2071_v35  ;;  %vm2078_vm9 = vweird.f32 %v4278_v36 }
 0xfb8   : > { %vm2079_vm11 = vmor %vm2077_vm10, %vm2078_vm9 }
 0xfb9   : > { %v2074_v38 = vsub.f32 1.0, %v2073_v37 }
 0xfbb   : > { %v2075_v39 = vmul.f32 %v4278_v36, %v2074_v38 }
 0xfbd   : > { %v2076_v40 = vadd.f32 %v4278_v36, %v2075_v39 }
 0xfbf   : > { %v2080_v42 = vsel %vm2079_vm11, %v4278_v36, %v2076_v40 }
 0xfc0   : > { %v2085_v2 = vsel %vm2082_vm12, %v2084_v47, %v2080_v42 }
 0xfc1   : > { %v2097_v32 = vsub.f32 1.0, %v2085_v2  ;;  %v2105_v29 = vmul.f32 %v2103_v55, %v2085_v2 }
0x1015   : > { %v2088_v17 = vpop.permute.xlu1 %2087 }
0x1016   : > { %v2090_v20 = vmul.f32 %v2088_v17, %v2085_v2 }
0x1018   : > { %2092 = vrot.lane.b32.xlu0 %v2090_v20, %s4473_s4 }
0x108a   : > { %v2093_v48 = vpop.permute.xlu0 %2092 }
0x108b   : > { %v2095_v49 = vadd.f32 %v2093_v48, %v5269_v34 }
0x108d   : > { %4279 = vtanh.f32 %v2095_v49 }
0x1093   : > { %v4280_v52 = vpop.eup %4279 }
0x1094   : > { %2099 = vrot.lane.b32.xlu2 %v4280_v52, %s4474_s8 }
0x10ee   : > { %v2100_v41 = vpop.permute.xlu2 %2099 }
0x10ef   : > { %v2102_v18 = vmul.f32 %v2100_v41, %v2097_v32 }
0x10f1   : > { %v5355_v56 = vadd.f32 %v2105_v29, %v2102_v18 }
0x10f3   : > { %v2112_v62 = vrot.slane %v5355_v56, 2  ;;  %v2176_v24 = vrot.slane %v5355_v56, 6 }
0x10f5   : > { %2113 = vrot.lane.b32.xlu1 %v2112_v62, %s4474_s8 }
0x1167   : > { %v2114_v63 = vpop.permute.xlu1 %2113 }
0x1168   : > { %4030 = vmatmul.msk.f32.vlgmr.msrb.gmra.mxu2 %vm1684_vm6, %v2114_v63 }
0x1169   : > { %2701 = vmatpush.msrb.mxu2 %v5162_v7 }
0x116b   : > { %2702 = vmatpush.msrb.mxu2 %v5167_v23 }
0x116d   : > { %2703 = vmatpush.msrb.mxu2 %v5175_v57 }
0x116f   : > { %2704 = vmatpush.msrb.mxu2 %v5183_v0 }
0x11eb   : > { %v2134_v5 = vpop.f32.mrf.mxu2 }
0x11ec   : > { %v2135_v6 = vadd.f32 %v5257_v27, %v2134_v5 }
0x11ee   : > { %v2138_v14 = vrot.slane %v2135_v6, 4 }
0x11f0   : > { %2160 = vrot.lane.b32.xlu0 %v2138_v14, %s4473_s4  ;;  %v2140_v15 = vadd.f32 %v2138_v14, %v5269_v34 }
0x11f2   : > { %v4031_v4 = vmul.f32 -1.442695, %v2140_v15 }
0x11f4   : > { %4281 = vpow2.f32 %v4031_v4 }
0x11fa   : > { %v4282_v3 = vpop.eup %4281 }
0x11fb   : > { %v2144_v16 = vadd.f32 1.0, %v4282_v3 }
0x11fd   : > { %4283 = vrcp.f32 %v2144_v16  ;;  %v2156_v30 = vand.u32 2147483648, %v2144_v16  ;;  %vm2150_vm14 = vweird.f32 %v2144_v16  ;;  %v2154_v22 = vand.u32 2147483647, %v2144_v16 }
0x11ff   : > { %v2157_v26 = vor.u32 1.1754944e-38, %v2156_v30  ;;  %vm2155_vm1 = vcmp.eq.f32.partialorder %v2154_v22, 8.507059e+37 }
0x1203   : > { %v4284_v59 = vpop.eup %4283 }
0x1204   : > { %v2146_v50 = vmul.f32 %v4284_v59, %v2144_v16  ;;  %vm2151_vm13 = vweird.f32 %v4284_v59  ;;  %v5401_v16 = vld [vmem:[%s5866_s2 + $0x20] sm:$0xff] }
0x1205   : > { %vm2152_vm15 = vmor %vm2150_vm14, %vm2151_vm13 }
0x1206   : > { %v2147_v31 = vsub.f32 1.0, %v2146_v50  ;;  %v5413_v50 = vld [vmem:[%s5866_s2 + $0x10] sm:$0xff] }
0x1208   : > { %v2148_v54 = vmul.f32 %v4284_v59, %v2147_v31 }
0x120a   : > { %v2149_v19 = vadd.f32 %v4284_v59, %v2148_v54 }
0x120c   : > { %v2153_v21 = vsel %vm2152_vm15, %v4284_v59, %v2149_v19  ;;  %v5407_v59 = vld [vmem:[%s5866_s2 + $0x18] sm:$0xff] }
0x120d   : > { %v2158_v58 = vsel %vm2155_vm1, %v2157_v26, %v2153_v21 }
0x120e   : > { %v2170_v8 = vsub.f32 1.0, %v2158_v58  ;;  %v2178_v9 = vmul.f32 %v2176_v24, %v2158_v58 }
0x1262   : > { %v2161_v45 = vpop.permute.xlu0 %2160 }
0x1263   : > { %v2163_v44 = vmul.f32 %v2161_v45, %v2158_v58 }
0x1265   : > { %2165 = vrot.lane.b32.xlu2 %v2163_v44, %s4473_s4 }
0x12bf   : > { %v2166_v10 = vpop.permute.xlu2 %2165 }
0x12c0   : > { %v2168_v28 = vadd.f32 %v2166_v10, %v5269_v34 }
0x12c2   : > { %4285 = vtanh.f32 %v2168_v28 }
0x12c8   : > { %v4286_v1 = vpop.eup %4285 }
0x12c9   : > { %2172 = vrot.lane.b32.xlu1 %v4286_v1, %s4474_s8 }
0x133b   : > { %v2173_v33 = vpop.permute.xlu1 %2172 }
0x133c   : > { %v2175_v61 = vmul.f32 %v2173_v33, %v2170_v8 }
0x133e   : > { %v5371_v35 = vadd.f32 %v2178_v9, %v2175_v61 }
0x1340   : > { %v2185_v36 = vrot.slane %v5371_v35, 4  ;;  %v2249_v63 = vrot.slane %v5371_v35, 6 }
0x1342   : > { %2186 = vrot.lane.b32.xlu0 %v2185_v36, %s4474_s8 }
0x13b4   : > { %v2187_v37 = vpop.permute.xlu0 %2186 }
0x13b5   : > { %4032 = vmatmul.msk.f32.vlgmr.msra.gmra.mxu3 %vm1684_vm6, %v2187_v37 }
0x13b6   : > { %2774 = vmatpush.msra.mxu3 %v5162_v7 }
0x13b8   : > { %2775 = vmatpush.msra.mxu3 %v5167_v23 }
0x13ba   : > { %2776 = vmatpush.msra.mxu3 %v5175_v57 }
0x13bc   : > { %2777 = vmatpush.msra.mxu3 %v5183_v0 }
0x1438   : > { %v2207_v38 = vpop.f32.mrf.mxu3 }
0x1439   : > { %v2208_v39 = vadd.f32 %v5257_v27, %v2207_v38 }
0x143b   : > { %v2211_v40 = vrot.slane %v2208_v39, 2 }
0x143d   : > { %2233 = vrot.lane.b32.xlu2 %v2211_v40, %s4473_s4  ;;  %v2213_v60 = vadd.f32 %v2211_v40, %v5269_v34 }
0x143f   : > { %v4033_v11 = vmul.f32 -1.442695, %v2213_v60 }
0x1441   : > { %4287 = vpow2.f32 %v4033_v11 }
0x1447   : > { %v4288_v42 = vpop.eup %4287 }
0x1448   : > { %v2217_v47 = vadd.f32 1.0, %v4288_v42 }
0x144a   : > { %4289 = vrcp.f32 %v2217_v47  ;;  %v2229_v0 = vand.u32 2147483648, %v2217_v47  ;;  %vm2223_vm2 = vweird.f32 %v2217_v47  ;;  %v2227_v20 = vand.u32 2147483647, %v2217_v47 }
0x144c   : > { %v2230_v49 = vor.u32 1.1754944e-38, %v2229_v0  ;;  %vm2228_vm4 = vcmp.eq.f32.partialorder %v2227_v20, 8.507059e+37 }
0x1450   : > { %v4290_v7 = vpop.eup %4289 }
0x1451   : > { %v2219_v17 = vmul.f32 %v4290_v7, %v2217_v47  ;;  %vm2224_vm0 = vweird.f32 %v4290_v7 }
0x1452   : > { %vm2225_vm3 = vmor %vm2223_vm2, %vm2224_vm0 }
0x1453   : > { %v2220_v23 = vsub.f32 1.0, %v2219_v17 }
0x1455   : > { %v2221_v2 = vmul.f32 %v4290_v7, %v2220_v23 }
0x1457   : > { %v2222_v57 = vadd.f32 %v4290_v7, %v2221_v2 }
0x1459   : > { %v2226_v48 = vsel %vm2225_vm3, %v4290_v7, %v2222_v57 }
0x145a   : > { %v2231_v55 = vsel %vm2228_vm4, %v2230_v49, %v2226_v48 }
0x145b   : > { %v2243_v62 = vsub.f32 1.0, %v2231_v55  ;;  %v2251_v6 = vmul.f32 %v2249_v63, %v2231_v55 }
0x1497   : > { %v2234_v52 = vpop.permute.xlu2 %2233 }
0x1498   : > { %v2236_v32 = vmul.f32 %v2234_v52, %v2231_v55 }
0x149a   : > { %2238 = vrot.lane.b32.xlu1 %v2236_v32, %s4473_s4 }
0x150c   : > { %v2239_v41 = vpop.permute.xlu1 %2238 }
0x150d   : > { %v2241_v18 = vadd.f32 %v2239_v41, %v5269_v34  ;;  %v5395_v34 = vld [vmem:[%s5866_s2 + $0x28] sm:$0xff] }
0x150f   : > { %4291 = vtanh.f32 %v2241_v18 }
0x1515   : > { %v4292_v29 = vpop.eup %4291 }
0x1516   : > { %2245 = vrot.lane.b32.xlu0 %v4292_v29, %s4474_s8 }
0x1588   : > { %v2246_v5 = vpop.permute.xlu0 %2245 }
0x1589   : > { %v2248_v14 = vmul.f32 %v2246_v5, %v2243_v62 }
0x158b   : > { %v5387_v15 = vadd.f32 %v2251_v6, %v2248_v14 }
0x158d   : > { %v2258_v4 = vrot.slane %v5387_v15, 6 }
0x158f   : > { %2259 = vrot.lane.b32.xlu2 %v2258_v4, %s4474_s8 }
0x15e9   : > { %v2260_v3 = vpop.permute.xlu2 %2259 }
0x15ea   : > { %4034 = vmatmul.msk.f32.vlgmr.msrb.gmra.mxu0 %vm1684_vm6, %v2260_v3 }
0x15eb   : > { %2847 = vmatpush.msrb.mxu0 %v5395_v34 }
0x15ed   : > { %2848 = vmatpush.msrb.mxu0 %v5401_v16 }
0x15ef   : > { %2849 = vmatpush.msrb.mxu0 %v5407_v59 }
0x15f1   : > { %2850 = vmatpush.msrb.mxu0 %v5413_v50 }
0x1667   : > { %v2280_v31 = vpop.f32.mrf.mxu0 }
0x1668   : > { %v2281_v54 = vadd.f32 %v5257_v27, %v2280_v31 }
0x166a   : > { %2304 = vrot.lane.b32.xlu1 %v2281_v54, %s4473_s4  ;;  %v2283_v19 = vadd.f32 %v2281_v54, %v5271_v12 }
0x166c   : > { %v4035_v30 = vmul.f32 -1.442695, %v2283_v19 }
0x166e   : > { %4293 = vpow2.f32 %v4035_v30 }
0x1674   : > { %v4294_v22 = vpop.eup %4293 }
0x1675   : > { %v2287_v21 = vadd.f32 1.0, %v4294_v22 }
0x1677   : > { %4295 = vrcp.f32 %v2287_v21  ;;  %v2299_v28 = vand.u32 2147483648, %v2287_v21  ;;  %vm2293_vm8 = vweird.f32 %v2287_v21  ;;  %v2297_v1 = vand.u32 2147483647, %v2287_v21 }
0x1679   : > { %v2300_v24 = vor.u32 1.1754944e-38, %v2299_v28  ;;  %vm2298_vm10 = vcmp.eq.f32.partialorder %v2297_v1, 8.507059e+37 }
0x167d   : > { %v4296_v26 = vpop.eup %4295 }
0x167e   : > { %v2289_v45 = vmul.f32 %v4296_v26, %v2287_v21  ;;  %vm2294_vm7 = vweird.f32 %v4296_v26 }
0x167f   : > { %vm2295_vm9 = vmor %vm2293_vm8, %vm2294_vm7 }
0x1680   : > { %v2290_v58 = vsub.f32 1.0, %v2289_v45 }
0x1682   : > { %v2291_v44 = vmul.f32 %v4296_v26, %v2290_v58 }
0x1684   : > { %v2292_v10 = vadd.f32 %v4296_v26, %v2291_v44 }
0x1686   : > { %v2296_v8 = vsel %vm2295_vm9, %v4296_v26, %v2292_v10 }
0x1687   : > { %v2301_v9 = vsel %vm2298_vm10, %v2300_v24, %v2296_v8 }
0x1688   : > { %v2314_v39 = vsub.f32 1.0, %v2301_v9  ;;  %v2321_v60 = vmul.f32 %v2301_v9, %v2258_v4 }
0x16dc   : > { %v2305_v33 = vpop.permute.xlu1 %2304 }
0x16dd   : > { %v2307_v61 = vmul.f32 %v2305_v33, %v2301_v9 }
0x16df   : > { %2309 = vrot.lane.b32.xlu0 %v2307_v61, %s4473_s4 }
0x1751   : > { %v2310_v36 = vpop.permute.xlu0 %2309 }
0x1752   : > { %v2312_v37 = vadd.f32 %v2310_v36, %v5271_v12 }
0x1754   : > { %4297 = vtanh.f32 %v2312_v37 }
0x175a   : > { %v4298_v38 = vpop.eup %4297 }
0x175b   : > { %2316 = vrot.lane.b32.xlu2 %v4298_v38, %s4474_s8 }
0x17b5   : > { %v2317_v40 = vpop.permute.xlu2 %2316 }
0x17b6   : > { %v2319_v11 = vmul.f32 %v2317_v40, %v2314_v39 }
0x17b8   : > { %v2322_v42 = vadd.f32 %v2321_v60, %v2319_v11 }
0x17ba   : > { %2324 = vrot.lane.b32.xlu1 %v2322_v42, %s4474_s8  ;;  %v2389_v31 = vrot.slane %v2322_v42, 6 }
0x182c   : > { %v2325_v47 = vpop.permute.xlu1 %2324 }
0x182d   : > { %2327 = vst.msk [vmem:[#allocation2 + $0x10] sm:$0x3] %vm1751_vm5, %v2325_v47  ;;  %4036 = vmatmul.msk.f32.vlgmr.msra.gmra.mxu1 %vm1684_vm6, %v2325_v47 }
0x182e   : > { %2914 = vmatpush.msra.mxu1 %v5395_v34 }
0x1830   : > { %2915 = vmatpush.msra.mxu1 %v5401_v16 }
0x1832   : > { %2916 = vmatpush.msra.mxu1 %v5407_v59 }
0x1834   : > { %2917 = vmatpush.msra.mxu1 %v5413_v50 }
0x18aa   : > { %v2347_v7 = vpop.f32.mrf.mxu1 }
0x18ab   : > { %v2348_v17 = vadd.f32 %v5257_v27, %v2347_v7 }
0x18ad   : > { %v2351_v23 = vrot.slane %v2348_v17, 6 }
0x18af   : > { %2373 = vrot.lane.b32.xlu0 %v2351_v23, %s4473_s4  ;;  %v2353_v2 = vadd.f32 %v2351_v23, %v5271_v12 }
0x18b1   : > { %v4037_v57 = vmul.f32 -1.442695, %v2353_v2 }
0x18b3   : > { %4299 = vpow2.f32 %v4037_v57 }
0x18b9   : > { %v4300_v0 = vpop.eup %4299 }
0x18ba   : > { %v2357_v20 = vadd.f32 1.0, %v4300_v0 }
0x18bc   : > { %4301 = vrcp.f32 %v2357_v20  ;;  %v2369_v41 = vand.u32 2147483648, %v2357_v20  ;;  %vm2363_vm12 = vweird.f32 %v2357_v20  ;;  %v2367_v18 = vand.u32 2147483647, %v2357_v20 }
0x18be   : > { %v2370_v62 = vor.u32 1.1754944e-38, %v2369_v41  ;;  %vm2368_vm14 = vcmp.eq.f32.partialorder %v2367_v18, 8.507059e+37 }
0x18c2   : > { %v4302_v48 = vpop.eup %4301 }
0x18c3   : > { %v2359_v49 = vmul.f32 %v4302_v48, %v2357_v20  ;;  %vm2364_vm11 = vweird.f32 %v4302_v48 }
0x18c4   : > { %vm2365_vm13 = vmor %vm2363_vm12, %vm2364_vm11 }
0x18c5   : > { %v2360_v52 = vsub.f32 1.0, %v2359_v49 }
0x18c7   : > { %v2361_v55 = vmul.f32 %v4302_v48, %v2360_v52 }
0x18c9   : > { %v2362_v32 = vadd.f32 %v4302_v48, %v2361_v55 }
0x18cb   : > { %v2366_v29 = vsel %vm2365_vm13, %v4302_v48, %v2362_v32  ;;  %v5463_v32 = vld [vmem:[%s5866_s2 + $0x4] ss:$0 sm:$0xff] }
0x18cc   : > { %v2371_v5 = vsel %vm2368_vm14, %v2370_v62, %v2366_v29 }
0x18cd   : > { %v2383_v54 = vsub.f32 1.0, %v2371_v5  ;;  %v2391_v22 = vmul.f32 %v2389_v31, %v2371_v5 }
0x1921   : > { %v2374_v63 = vpop.permute.xlu0 %2373 }
0x1922   : > { %v2376_v6 = vmul.f32 %v2374_v63, %v2371_v5 }
0x1924   : > { %2378 = vrot.lane.b32.xlu2 %v2376_v6, %s4473_s4 }
0x197e   : > { %v2379_v14 = vpop.permute.xlu2 %2378 }
0x197f   : > { %v2381_v4 = vadd.f32 %v2379_v14, %v5271_v12 }
0x1981   : > { %4303 = vtanh.f32 %v2381_v4 }
0x1987   : > { %v4304_v3 = vpop.eup %4303 }
0x1988   : > { %2385 = vrot.lane.b32.xlu1 %v4304_v3, %s4474_s8 }
0x19fa   : > { %v2386_v19 = vpop.permute.xlu1 %2385 }
0x19fb   : > { %v2388_v30 = vmul.f32 %v2386_v19, %v2383_v54 }
0x19fd   : > { %v5435_v21 = vadd.f32 %v2391_v22, %v2388_v30 }
0x19ff   : > { %v2398_v26 = vrot.slane %v5435_v21, 2  ;;  %v2462_v2 = vrot.slane %v5435_v21, 6 }
0x1a01   : > { %2399 = vrot.lane.b32.xlu0 %v2398_v26, %s4474_s8 }
0x1a73   : > { %v2400_v45 = vpop.permute.xlu0 %2399 }
0x1a74   : > { %4038 = vmatmul.msk.f32.vlgmr.msra.gmra.mxu2 %vm1684_vm6, %v2400_v45 }
0x1a75   : > { %2987 = vmatpush.msra.mxu2 %v5395_v34 }
0x1a77   : > { %2988 = vmatpush.msra.mxu2 %v5401_v16 }
0x1a79   : > { %2989 = vmatpush.msra.mxu2 %v5407_v59 }
0x1a7b   : > { %2990 = vmatpush.msra.mxu2 %v5413_v50 }
0x1af7   : > { %v2420_v58 = vpop.f32.mrf.mxu2 }
0x1af8   : > { %v2421_v44 = vadd.f32 %v5257_v27, %v2420_v58 }
0x1afa   : > { %v2424_v10 = vrot.slane %v2421_v44, 4 }
0x1afc   : > { %2446 = vrot.lane.b32.xlu2 %v2424_v10, %s4473_s4  ;;  %v2426_v28 = vadd.f32 %v2424_v10, %v5271_v12 }
0x1afe   : > { %v4039_v1 = vmul.f32 -1.442695, %v2426_v28 }
0x1b00   : > { %4305 = vpow2.f32 %v4039_v1 }
0x1b06   : > { %v4306_v8 = vpop.eup %4305 }
0x1b07   : > { %v2430_v24 = vadd.f32 1.0, %v4306_v8 }
0x1b09   : > { %4307 = vrcp.f32 %v2430_v24  ;;  %v2442_v38 = vand.u32 2147483648, %v2430_v24  ;;  %vm2436_vm1 = vweird.f32 %v2430_v24  ;;  %v2440_v39 = vand.u32 2147483647, %v2430_v24 }
0x1b0b   : > { %v2443_v40 = vor.u32 1.1754944e-38, %v2442_v38  ;;  %vm2441_vm2 = vcmp.eq.f32.partialorder %v2440_v39, 8.507059e+37 }
0x1b0f   : > { %v4308_v33 = vpop.eup %4307 }
0x1b10   : > { %v2432_v9 = vmul.f32 %v4308_v33, %v2430_v24  ;;  %vm2437_vm15 = vweird.f32 %v4308_v33 }
0x1b11   : > { %vm2438_vm0 = vmor %vm2436_vm1, %vm2437_vm15 }
0x1b12   : > { %v2433_v61 = vsub.f32 1.0, %v2432_v9 }
0x1b14   : > { %v2434_v36 = vmul.f32 %v4308_v33, %v2433_v61 }
0x1b16   : > { %v2435_v37 = vadd.f32 %v4308_v33, %v2434_v36 }
0x1b18   : > { %v2439_v27 = vsel %vm2438_vm0, %v4308_v33, %v2435_v37 }
0x1b19   : > { %v2444_v11 = vsel %vm2441_vm2, %v2443_v40, %v2439_v27 }
0x1b1a   : > { %v2456_v23 = vsub.f32 1.0, %v2444_v11  ;;  %v2464_v0 = vmul.f32 %v2462_v2, %v2444_v11 }
0x1b56   : > { %v2447_v60 = vpop.permute.xlu2 %2446 }
0x1b57   : > { %v2449_v42 = vmul.f32 %v2447_v60, %v2444_v11 }
0x1b59   : > { %2451 = vrot.lane.b32.xlu1 %v2449_v42, %s4473_s4 }
0x1bcb   : > { %v2452_v47 = vpop.permute.xlu1 %2451 }
0x1bcc   : > { %v2454_v7 = vadd.f32 %v2452_v47, %v5271_v12 }
0x1bce   : > { %4309 = vtanh.f32 %v2454_v7 }
0x1bd4   : > { %v4310_v17 = vpop.eup %4309 }
0x1bd5   : > { %2458 = vrot.lane.b32.xlu0 %v4310_v17, %s4474_s8 }
0x1c47   : > { %v2459_v57 = vpop.permute.xlu0 %2458 }
0x1c48   : > { %v2461_v20 = vmul.f32 %v2459_v57, %v2456_v23 }
0x1c4a   : > { %v5451_v48 = vadd.f32 %v2464_v0, %v2461_v20 }
0x1c4c   : > { %v2471_v49 = vrot.slane %v5451_v48, 4  ;;  %v2535_v8 = vrot.slane %v5451_v48, 6 }
0x1c4e   : > { %2472 = vrot.lane.b32.xlu2 %v2471_v49, %s4474_s8 }
0x1ca8   : > { %v2473_v52 = vpop.permute.xlu2 %2472 }
0x1ca9   : > { %4040 = vmatmul.msk.f32.vlgmr.msrb.gmra.mxu3 %vm1684_vm6, %v2473_v52 }
0x1caa   : > { %3060 = vmatpush.msrb.mxu3 %v5395_v34 }
0x1cac   : > { %3061 = vmatpush.msrb.mxu3 %v5401_v16 }
0x1cae   : > { %3062 = vmatpush.msrb.mxu3 %v5407_v59 }
0x1cb0   : > { %3063 = vmatpush.msrb.mxu3 %v5413_v50 }
0x1d2c   : > { %v2493_v55 = vpop.f32.mrf.mxu3 }
0x1d2d   : > { %v2494_v41 = vadd.f32 %v5463_v32, %v2493_v55 }
0x1d2f   : > { %v2497_v18 = vrot.slane %v2494_v41, 2 }
0x1d31   : > { %2519 = vrot.lane.b32.xlu1 %v2497_v18, %s4473_s4  ;;  %v2499_v29 = vadd.f32 %v2497_v18, %v5271_v12 }
0x1d33   : > { %v4041_v62 = vmul.f32 -1.442695, %v2499_v29 }
0x1d35   : > { %4311 = vpow2.f32 %v4041_v62 }
0x1d3b   : > { %v4312_v63 = vpop.eup %4311 }
0x1d3c   : > { %v2503_v5 = vadd.f32 1.0, %v4312_v63 }
0x1d3e   : > { %4313 = vrcp.f32 %v2503_v5  ;;  %v2515_v54 = vand.u32 2147483648, %v2503_v5  ;;  %vm2509_vm4 = vweird.f32 %v2503_v5  ;;  %v2513_v19 = vand.u32 2147483647, %v2503_v5 }
0x1d40   : > { %v2516_v22 = vor.u32 1.1754944e-38, %v2515_v54  ;;  %vm2514_vm8 = vcmp.eq.f32.partialorder %v2513_v19, 8.507059e+37 }
0x1d44   : > { %v4314_v6 = vpop.eup %4313 }
0x1d45   : > { %v2505_v14 = vmul.f32 %v4314_v6, %v2503_v5  ;;  %vm2510_vm3 = vweird.f32 %v4314_v6 }
0x1d46   : > { %vm2511_vm7 = vmor %vm2509_vm4, %vm2510_vm3 }
0x1d47   : > { %v2506_v4 = vsub.f32 1.0, %v2505_v14 }
0x1d49   : > { %v2507_v3 = vmul.f32 %v4314_v6, %v2506_v4 }
0x1d4b   : > { %v2508_v31 = vadd.f32 %v4314_v6, %v2507_v3 }
0x1d4d   : > { %v2512_v30 = vsel %vm2511_vm7, %v4314_v6, %v2508_v31 }
0x1d4e   : > { %v2517_v45 = vsel %vm2514_vm8, %v2516_v22, %v2512_v30 }
0x1d4f   : > { %v2529_v1 = vsub.f32 1.0, %v2517_v45  ;;  %v2537_v33 = vmul.f32 %v2535_v8, %v2517_v45 }
0x1da3   : > { %v2520_v26 = vpop.permute.xlu1 %2519 }
0x1da4   : > { %v2522_v58 = vmul.f32 %v2520_v26, %v2517_v45 }
0x1da6   : > { %2524 = vrot.lane.b32.xlu0 %v2522_v58, %s4473_s4 }
0x1e18   : > { %v2525_v44 = vpop.permute.xlu0 %2524 }
0x1e19   : > { %v2527_v10 = vadd.f32 %v2525_v44, %v5271_v12 }
0x1e1b   : > { %4315 = vtanh.f32 %v2527_v10 }
0x1e21   : > { %v4316_v28 = vpop.eup %4315 }
0x1e22   : > { %2531 = vrot.lane.b32.xlu2 %v4316_v28, %s4474_s8 }
0x1e7c   : > { %v2532_v24 = vpop.permute.xlu2 %2531 }
0x1e7d   : > { %v2534_v9 = vmul.f32 %v2532_v24, %v2529_v1 }
0x1e7f   : > { %v5472_v61 = vadd.f32 %v2537_v33, %v2534_v9 }
0x1e81   : > { %v2544_v36 = vrot.slane %v5472_v61, 6 }
0x1e83   : > { %2545 = vrot.lane.b32.xlu1 %v2544_v36, %s4474_s8 }
0x1ef5   : > { %v2546_v37 = vpop.permute.xlu1 %2545 }
0x1ef6   : > { %4042 = vmatmul.msk.f32.vlgmr.msra.gmra.mxu0 %vm1684_vm6, %v2546_v37 }
0x1ef7   : > { %3133 = vmatpush.msra.mxu0 %v5395_v34 }
0x1ef9   : > { %3134 = vmatpush.msra.mxu0 %v5401_v16 }
0x1efb   : > { %3135 = vmatpush.msra.mxu0 %v5407_v59 }
0x1efd   : > { %3136 = vmatpush.msra.mxu0 %v5413_v50 }
0x1f73   : > { %v2566_v12 = vpop.f32.mrf.mxu0 }
0x1f74   : > { %v2567_v38 = vadd.f32 %v5463_v32, %v2566_v12 }
0x1f76   : > { %2590 = vrot.lane.b32.xlu0 %v2567_v38, %s4473_s4  ;;  %v2569_v39 = vadd.f32 %v2567_v38, %v5273_v51 }
0x1f78   : > { %v4043_v27 = vmul.f32 -1.442695, %v2569_v39 }
0x1f7a   : > { %4317 = vpow2.f32 %v4043_v27 }
0x1f80   : > { %v4318_v40 = vpop.eup %4317 }
0x1f81   : > { %v2573_v60 = vadd.f32 1.0, %v4318_v40 }
0x1f83   : > { %4319 = vrcp.f32 %v2573_v60  ;;  %v2585_v59 = vand.u32 2147483648, %v2573_v60  ;;  %vm2579_vm10 = vweird.f32 %v2573_v60  ;;  %v2583_v50 = vand.u32 2147483647, %v2573_v60 }
0x1f85   : > { %v2586_v17 = vor.u32 1.1754944e-38, %v2585_v59  ;;  %vm2584_vm12 = vcmp.eq.f32.partialorder %v2583_v50, 8.507059e+37 }
0x1f89   : > { %v4320_v11 = vpop.eup %4319 }
0x1f8a   : > { %v2575_v34 = vmul.f32 %v4320_v11, %v2573_v60  ;;  %vm2580_vm9 = vweird.f32 %v4320_v11 }
0x1f8b   : > { %vm2581_vm11 = vmor %vm2579_vm10, %vm2580_vm9 }
0x1f8c   : > { %v2576_v42 = vsub.f32 1.0, %v2575_v34 }
0x1f8e   : > { %v2577_v16 = vmul.f32 %v4320_v11, %v2576_v42 }
0x1f90   : > { %v2578_v47 = vadd.f32 %v4320_v11, %v2577_v16 }
0x1f92   : > { %v2582_v7 = vsel %vm2581_vm11, %v4320_v11, %v2578_v47 }
0x1f93   : > { %v2587_v2 = vsel %vm2584_vm12, %v2586_v17, %v2582_v7 }
0x1f94   : > { %v2600_v52 = vsub.f32 1.0, %v2587_v2  ;;  %v2607_v41 = vmul.f32 %v2587_v2, %v2544_v36 }
0x1fe8   : > { %v2591_v23 = vpop.permute.xlu0 %2590 }
0x1fe9   : > { %v2593_v57 = vmul.f32 %v2591_v23, %v2587_v2 }
0x1feb   : > { %2595 = vrot.lane.b32.xlu2 %v2593_v57, %s4473_s4 }
0x2045   : > { %v2596_v0 = vpop.permute.xlu2 %2595 }
0x2046   : > { %v2598_v20 = vadd.f32 %v2596_v0, %v5273_v51 }
0x2048   : > { %4321 = vtanh.f32 %v2598_v20 }
0x204e   : > { %v4322_v49 = vpop.eup %4321 }
0x204f   : > { %2602 = vrot.lane.b32.xlu1 %v4322_v49, %s4474_s8 }
0x20c1   : > { %v2603_v55 = vpop.permute.xlu1 %2602 }
0x20c2   : > { %v2605_v18 = vmul.f32 %v2603_v55, %v2600_v52 }
0x20c4   : > { %v2608_v29 = vadd.f32 %v2607_v41, %v2605_v18 }
0x20c6   : > { %2610 = vrot.lane.b32.xlu0 %v2608_v29, %s4474_s8  ;;  %v2675_v10 = vrot.slane %v2608_v29, 6 }
0x2138   : > { %v2611_v62 = vpop.permute.xlu0 %2610 }
0x2139   : > { %2613 = vst.msk [vmem:[#allocation2 + $0x18] sm:$0x3] %vm1751_vm5, %v2611_v62  ;;  %4044 = vmatmul.msk.f32.vlgmr.msrb.gmra.mxu1 %vm1684_vm6, %v2611_v62 }
0x21b6   : > { %v2633_v63 = vpop.f32.mrf.mxu1 }
0x21b7   : > { %v2634_v5 = vadd.f32 %v5463_v32, %v2633_v63 }
0x21b9   : > { %v2637_v6 = vrot.slane %v2634_v5, 6 }
0x21bb   : > { %v2639_v14 = vadd.f32 %v2637_v6, %v5273_v51  ;;  %2659 = vrot.lane.b32.xlu2 %v2637_v6, %s4473_s4 }
0x21bd   : > { %v4045_v4 = vmul.f32 -1.442695, %v2639_v14 }
0x21bf   : > { %4323 = vpow2.f32 %v4045_v4 }
0x21c5   : > { %v4324_v3 = vpop.eup %4323 }
0x21c6   : > { %v2643_v31 = vadd.f32 1.0, %v4324_v3 }
0x21c8   : > { %4325 = vrcp.f32 %v2643_v31  ;;  %v2655_v22 = vand.u32 2147483648, %v2643_v31  ;;  %v2653_v45 = vand.u32 2147483647, %v2643_v31  ;;  %vm2649_vm14 = vweird.f32 %v2643_v31 }
0x21ca   : > { %v2656_v44 = vor.u32 1.1754944e-38, %v2655_v22  ;;  %vm2654_vm1 = vcmp.eq.f32.partialorder %v2653_v45, 8.507059e+37 }
0x21ce   : > { %v4326_v54 = vpop.eup %4325 }
0x21cf   : > { %v2645_v19 = vmul.f32 %v4326_v54, %v2643_v31  ;;  %vm2650_vm13 = vweird.f32 %v4326_v54 }
0x21d0   : > { %vm2651_vm15 = vmor %vm2649_vm14, %vm2650_vm13 }
0x21d1   : > { %v2646_v30 = vsub.f32 1.0, %v2645_v19 }
0x21d3   : > { %v2647_v26 = vmul.f32 %v4326_v54, %v2646_v30 }
0x21d5   : > { %v2648_v58 = vadd.f32 %v4326_v54, %v2647_v26 }
0x21d7   : > { %v2652_v28 = vsel %vm2651_vm15, %v4326_v54, %v2648_v58 }
0x21d8   : > { %v2657_v1 = vsel %vm2654_vm1, %v2656_v44, %v2652_v28 }
0x21d9   : > { %v2677_v8 = vmul.f32 %v2675_v10, %v2657_v1  ;;  %v2669_v12 = vsub.f32 1.0, %v2657_v1 }
0x2215   : > { %v2660_v24 = vpop.permute.xlu2 %2659 }
0x2216   : > { %v2662_v33 = vmul.f32 %v2660_v24, %v2657_v1 }
0x2218   : > { %2664 = vrot.lane.b32.xlu1 %v2662_v33, %s4473_s4 }
0x228a   : > { %v2665_v9 = vpop.permute.xlu1 %2664 }
0x228b   : > { %v2667_v36 = vadd.f32 %v2665_v9, %v5273_v51 }
0x228d   : > { %4327 = vtanh.f32 %v2667_v36 }
0x2293   : > { %v4328_v37 = vpop.eup %4327 }
0x2294   : > { %2671 = vrot.lane.b32.xlu0 %v4328_v37, %s4474_s8 }
0x2306   : > { %v2672_v38 = vpop.permute.xlu0 %2671 }
0x2307   : > { %v2674_v39 = vmul.f32 %v2672_v38, %v2669_v12 }
0x2309   : > { %v5496_v27 = vadd.f32 %v2677_v8, %v2674_v39 }
0x230b   : > { %v2684_v40 = vrot.slane %v5496_v27, 2  ;;  %v2748_v6 = vrot.slane %v5496_v27, 6 }
0x230d   : > { %2685 = vrot.lane.b32.xlu2 %v2684_v40, %s4474_s8 }
0x2367   : > { %v2686_v60 = vpop.permute.xlu2 %2685 }
0x2368   : > { %4046 = vmatmul.msk.f32.vlgmr.msrb.gmra.mxu2 %vm1684_vm6, %v2686_v60 }
0x23eb   : > { %v2706_v11 = vpop.f32.mrf.mxu2 }
0x23ec   : > { %v2707_v34 = vadd.f32 %v5463_v32, %v2706_v11 }
0x23ee   : > { %v2710_v42 = vrot.slane %v2707_v34, 4 }
0x23f0   : > { %2732 = vrot.lane.b32.xlu1 %v2710_v42, %s4473_s4  ;;  %v2712_v16 = vadd.f32 %v2710_v42, %v5273_v51 }
0x23f2   : > { %v4047_v47 = vmul.f32 -1.442695, %v2712_v16 }
0x23f4   : > { %4329 = vpow2.f32 %v4047_v47 }
0x23fa   : > { %v4330_v59 = vpop.eup %4329 }
0x23fb   : > { %v2716_v50 = vadd.f32 1.0, %v4330_v59 }
0x23fd   : > { %4331 = vrcp.f32 %v2716_v50  ;;  %v2728_v0 = vand.u32 2147483648, %v2716_v50  ;;  %vm2722_vm2 = vweird.f32 %v2716_v50  ;;  %v2726_v20 = vand.u32 2147483647, %v2716_v50 }
0x23ff   : > { %v2729_v52 = vor.u32 1.1754944e-38, %v2728_v0  ;;  %vm2727_vm4 = vcmp.eq.f32.partialorder %v2726_v20, 8.507059e+37 }
0x2403   : > { %v4332_v7 = vpop.eup %4331 }
0x2404   : > { %v2718_v17 = vmul.f32 %v4332_v7, %v2716_v50  ;;  %vm2723_vm0 = vweird.f32 %v4332_v7 }
0x2405   : > { %vm2724_vm3 = vmor %vm2722_vm2, %vm2723_vm0 }
0x2406   : > { %v2719_v23 = vsub.f32 1.0, %v2718_v17 }
0x2408   : > { %v2720_v2 = vmul.f32 %v4332_v7, %v2719_v23 }
0x240a   : > { %v2721_v57 = vadd.f32 %v4332_v7, %v2720_v2 }
0x240c   : > { %v2725_v49 = vsel %vm2724_vm3, %v4332_v7, %v2721_v57 }
0x240d   : > { %v2730_v41 = vsel %vm2727_vm4, %v2729_v52, %v2725_v49 }
0x240e   : > { %v2742_v5 = vsub.f32 1.0, %v2730_v41  ;;  %v2750_v4 = vmul.f32 %v2748_v6, %v2730_v41 }
0x2462   : > { %v2733_v55 = vpop.permute.xlu1 %2732 }
0x2463   : > { %v2735_v18 = vmul.f32 %v2733_v55, %v2730_v41 }
0x2465   : > { %2737 = vrot.lane.b32.xlu0 %v2735_v18, %s4473_s4 }
0x24d7   : > { %v2738_v29 = vpop.permute.xlu0 %2737 }
0x24d8   : > { %v2740_v62 = vadd.f32 %v2738_v29, %v5273_v51 }
0x24da   : > { %4333 = vtanh.f32 %v2740_v62 }
0x24e0   : > { %v4334_v63 = vpop.eup %4333 }
0x24e1   : > { %2744 = vrot.lane.b32.xlu2 %v4334_v63, %s4474_s8 }
0x253b   : > { %v2745_v14 = vpop.permute.xlu2 %2744 }
0x253c   : > { %v2747_v3 = vmul.f32 %v2745_v14, %v2742_v5 }
0x253e   : > { %v5508_v31 = vadd.f32 %v2750_v4, %v2747_v3 }
0x2540   : > { %v2757_v54 = vrot.slane %v5508_v31, 4  ;;  %v2821_v16 = vrot.slane %v5508_v31, 6 }
0x2542   : > { %2758 = vrot.lane.b32.xlu1 %v2757_v54, %s4474_s8 }
0x25b4   : > { %v2759_v19 = vpop.permute.xlu1 %2758 }
0x25b5   : > { %4048 = vmatmul.msk.f32.vlgmr.msra.gmra.mxu3 %vm1684_vm6, %v2759_v19 }
0x2638   : > { %v2779_v30 = vpop.f32.mrf.mxu3 }
0x2639   : > { %v2780_v22 = vadd.f32 %v5463_v32, %v2779_v30 }
0x263b   : > { %v2783_v26 = vrot.slane %v2780_v22, 2 }
0x263d   : > { %2805 = vrot.lane.b32.xlu0 %v2783_v26, %s4473_s4  ;;  %v2785_v45 = vadd.f32 %v2783_v26, %v5273_v51 }
0x263f   : > { %v4049_v58 = vmul.f32 -1.442695, %v2785_v45 }
0x2641   : > { %4335 = vpow2.f32 %v4049_v58 }
0x2647   : > { %v4336_v44 = vpop.eup %4335 }
0x2648   : > { %v2789_v10 = vadd.f32 1.0, %v4336_v44 }
0x264a   : > { %4337 = vrcp.f32 %v2789_v10  ;;  %v2801_v9 = vand.u32 2147483648, %v2789_v10  ;;  %vm2795_vm8 = vweird.f32 %v2789_v10  ;;  %v2799_v36 = vand.u32 2147483647, %v2789_v10 }
0x264c   : > { %v2802_v12 = vor.u32 1.1754944e-38, %v2801_v9  ;;  %vm2800_vm10 = vcmp.eq.f32.partialorder %v2799_v36, 8.507059e+37 }
0x2650   : > { %v4338_v28 = vpop.eup %4337 }
0x2651   : > { %v2791_v1 = vmul.f32 %v4338_v28, %v2789_v10  ;;  %vm2796_vm7 = vweird.f32 %v4338_v28 }
0x2652   : > { %vm2797_vm9 = vmor %vm2795_vm8, %vm2796_vm7 }
0x2653   : > { %v2792_v8 = vsub.f32 1.0, %v2791_v1 }
0x2655   : > { %v2793_v24 = vmul.f32 %v4338_v28, %v2792_v8 }
0x2657   : > { %v2794_v33 = vadd.f32 %v4338_v28, %v2793_v24 }
0x2659   : > { %v2798_v37 = vsel %vm2797_vm9, %v4338_v28, %v2794_v33 }
0x265a   : > { %v2803_v39 = vsel %vm2800_vm10, %v2802_v12, %v2798_v37 }
0x265b   : > { %v2815_v42 = vsub.f32 1.0, %v2803_v39  ;;  %v2823_v59 = vmul.f32 %v2821_v16, %v2803_v39 }
0x26af   : > { %v2806_v38 = vpop.permute.xlu0 %2805 }
0x26b0   : > { %v2808_v40 = vmul.f32 %v2806_v38, %v2803_v39 }
0x26b2   : > { %2810 = vrot.lane.b32.xlu2 %v2808_v40, %s4473_s4 }
0x270c   : > { %v2811_v60 = vpop.permute.xlu2 %2810 }
0x270d   : > { %v2813_v11 = vadd.f32 %v2811_v60, %v5273_v51 }
0x270f   : > { %4339 = vtanh.f32 %v2813_v11 }
0x2715   : > { %v4340_v34 = vpop.eup %4339 }
0x2716   : > { %2817 = vrot.lane.b32.xlu1 %v4340_v34, %s4474_s8 }
0x2788   : > { %v2818_v47 = vpop.permute.xlu1 %2817 }
0x2789   : > { %v2820_v50 = vmul.f32 %v2818_v47, %v2815_v42 }
0x278b   : > { %v5520_v7 = vadd.f32 %v2823_v59, %v2820_v50 }
0x278d   : > { %v2830_v17 = vrot.slane %v5520_v7, 6 }
0x278f   : > { %2831 = vrot.lane.b32.xlu0 %v2830_v17, %s4474_s8 }
0x2801   : > { %v2832_v23 = vpop.permute.xlu0 %2831 }
0x2802   : > { %4050 = vmatmul.msk.f32.vlgmr.msrb.gmra.mxu0 %vm1684_vm6, %v2832_v23 }
0x287f   : > { %v2852_v51 = vpop.f32.mrf.mxu0 }
0x2880   : > { %v2853_v2 = vadd.f32 %v5463_v32, %v2852_v51 }
0x2882   : > { %2876 = vrot.lane.b32.xlu2 %v2853_v2, %s4473_s4  ;;  %v2855_v57 = vadd.f32 %v2853_v2, %v5275_v13 }
0x2884   : > { %v4051_v0 = vmul.f32 -1.442695, %v2855_v57 }
0x2886   : > { %4341 = vpow2.f32 %v4051_v0 }
0x288c   : > { %v4342_v20 = vpop.eup %4341 }
0x288d   : > { %v2859_v49 = vadd.f32 1.0, %v4342_v20 }
0x288f   : > { %4343 = vrcp.f32 %v2859_v49  ;;  %v2871_v62 = vand.u32 2147483648, %v2859_v49  ;;  %vm2865_vm12 = vweird.f32 %v2859_v49  ;;  %v2869_v63 = vand.u32 2147483647, %v2859_v49 }
0x2891   : > { %v2872_v6 = vor.u32 1.1754944e-38, %v2871_v62  ;;  %vm2870_vm14 = vcmp.eq.f32.partialorder %v2869_v63, 8.507059e+37 }
0x2895   : > { %v4344_v52 = vpop.eup %4343 }
0x2896   : > { %v2861_v55 = vmul.f32 %v4344_v52, %v2859_v49  ;;  %vm2866_vm11 = vweird.f32 %v4344_v52 }
0x2897   : > { %vm2867_vm13 = vmor %vm2865_vm12, %vm2866_vm11 }
0x2898   : > { %v2862_v41 = vsub.f32 1.0, %v2861_v55 }
0x289a   : > { %v2863_v18 = vmul.f32 %v4344_v52, %v2862_v41 }
0x289c   : > { %v2864_v29 = vadd.f32 %v4344_v52, %v2863_v18 }
0x289e   : > { %v2868_v5 = vsel %vm2867_vm13, %v4344_v52, %v2864_v29  ;;  %vm1970_vm13 = vcmask 261126  }
0x289f   : > { %v2873_v4 = vsel %vm2870_vm14, %v2872_v6, %v2868_v5 }
0x28a0   : > { %v2886_v22 = vsub.f32 1.0, %v2873_v4  ;;  %v2893_v45 = vmul.f32 %v2873_v4, %v2830_v17 }
0x28dc   : > { %v2877_v14 = vpop.permute.xlu2 %2876 }
0x28dd   : > { %v2879_v3 = vmul.f32 %v2877_v14, %v2873_v4 }
0x28df   : > { %2881 = vrot.lane.b32.xlu1 %v2879_v3, %s4473_s4 }
0x2951   : > { %v2882_v54 = vpop.permute.xlu1 %2881 }
0x2952   : > { %v2884_v19 = vadd.f32 %v2882_v54, %v5275_v13 }
0x2954   : > { %4345 = vtanh.f32 %v2884_v19 }
0x295a   : > { %v4346_v30 = vpop.eup %4345 }
0x295b   : > { %2888 = vrot.lane.b32.xlu0 %v4346_v30, %s4474_s8 }
0x29cd   : > { %v2889_v26 = vpop.permute.xlu0 %2888 }
0x29ce   : > { %v2891_v58 = vmul.f32 %v2889_v26, %v2886_v22 }
0x29d0   : > { %v2894_v44 = vadd.f32 %v2893_v45, %v2891_v58 }
0x29d2   : > { %2896 = vrot.lane.b32.xlu2 %v2894_v44, %s4474_s8  ;;  %v2961_v51 = vrot.slane %v2894_v44, 6 }
0x2a2c   : > { %v2897_v10 = vpop.permute.xlu2 %2896 }
0x2a2d   : > { %2899 = vst.msk [vmem:[#allocation2 + $0x20] sm:$0x3] %vm1751_vm5, %v2897_v10  ;;  %4052 = vmatmul.msk.f32.vlgmr.msra.gmra.mxu1 %vm1684_vm6, %v2897_v10 }
0x2aaa   : > { %v2919_v28 = vpop.f32.mrf.mxu1 }
0x2aab   : > { %v2920_v1 = vadd.f32 %v5463_v32, %v2919_v28 }
0x2aad   : > { %v2923_v8 = vrot.slane %v2920_v1, 6 }
0x2aaf   : > { %2945 = vrot.lane.b32.xlu1 %v2923_v8, %s4473_s4  ;;  %v2925_v24 = vadd.f32 %v2923_v8, %v5275_v13 }
0x2ab1   : > { %v4053_v33 = vmul.f32 -1.442695, %v2925_v24 }
0x2ab3   : > { %4347 = vpow2.f32 %v4053_v33 }
0x2ab9   : > { %v4348_v9 = vpop.eup %4347 }
0x2aba   : > { %v2929_v36 = vadd.f32 1.0, %v4348_v9 }
0x2abc   : > { %4349 = vrcp.f32 %v2929_v36  ;;  %v2941_v60 = vand.u32 2147483648, %v2929_v36  ;;  %vm2935_vm1 = vweird.f32 %v2929_v36  ;;  %v2939_v11 = vand.u32 2147483647, %v2929_v36 }
0x2abe   : > { %v2942_v42 = vor.u32 1.1754944e-38, %v2941_v60  ;;  %vm2940_vm2 = vcmp.eq.f32.partialorder %v2939_v11, 8.507059e+37 }
0x2ac2   : > { %v4350_v37 = vpop.eup %4349 }
0x2ac3   : > { %v2931_v12 = vmul.f32 %v4350_v37, %v2929_v36  ;;  %vm2936_vm15 = vweird.f32 %v4350_v37 }
0x2ac4   : > { %vm2937_vm0 = vmor %vm2935_vm1, %vm2936_vm15 }
0x2ac5   : > { %v2932_v38 = vsub.f32 1.0, %v2931_v12 }
0x2ac7   : > { %v2933_v39 = vmul.f32 %v4350_v37, %v2932_v38 }
0x2ac9   : > { %v2934_v40 = vadd.f32 %v4350_v37, %v2933_v39 }
0x2acb   : > { %v2938_v34 = vsel %vm2937_vm0, %v4350_v37, %v2934_v40 }
0x2acc   : > { %v2943_v47 = vsel %vm2940_vm2, %v2942_v42, %v2938_v34  ;;  %vm1822_vm2 = vcmask 257026  }
0x2acd   : > { %v2955_v2 = vsub.f32 1.0, %v2943_v47  ;;  %v2963_v20 = vmul.f32 %v2961_v51, %v2943_v47 }
0x2b21   : > { %v2946_v16 = vpop.permute.xlu1 %2945 }
0x2b22   : > { %v2948_v59 = vmul.f32 %v2946_v16, %v2943_v47 }
0x2b24   : > { %2950 = vrot.lane.b32.xlu0 %v2948_v59, %s4473_s4 }
0x2b96   : > { %v2951_v50 = vpop.permute.xlu0 %2950 }
0x2b97   : > { %v2953_v17 = vadd.f32 %v2951_v50, %v5275_v13 }
0x2b99   : > { %4351 = vtanh.f32 %v2953_v17 }
0x2b9f   : > { %v4352_v23 = vpop.eup %4351 }
0x2ba0   : > { %2957 = vrot.lane.b32.xlu2 %v4352_v23, %s4474_s8 }
0x2bfa   : > { %v2958_v57 = vpop.permute.xlu2 %2957 }
0x2bfb   : > { %v2960_v0 = vmul.f32 %v2958_v57, %v2955_v2 }
0x2bfd   : > { %v5540_v49 = vadd.f32 %v2963_v20, %v2960_v0 }
0x2bff   : > { %v2970_v52 = vrot.slane %v5540_v49, 2  ;;  %v3034_v33 = vrot.slane %v5540_v49, 6 }
0x2c01   : > { %2971 = vrot.lane.b32.xlu1 %v2970_v52, %s4474_s8 }
0x2c73   : > { %v2972_v55 = vpop.permute.xlu1 %2971 }
0x2c74   : > { %4054 = vmatmul.msk.f32.vlgmr.msra.gmra.mxu2 %vm1684_vm6, %v2972_v55 }
0x2cf7   : > { %v2992_v41 = vpop.f32.mrf.mxu2 }
0x2cf8   : > { %v2993_v18 = vadd.f32 %v5463_v32, %v2992_v41 }
0x2cfa   : > { %v2996_v29 = vrot.slane %v2993_v18, 4 }
0x2cfc   : > { %3018 = vrot.lane.b32.xlu0 %v2996_v29, %s4473_s4  ;;  %v2998_v62 = vadd.f32 %v2996_v29, %v5275_v13 }
0x2cfe   : > { %v4055_v63 = vmul.f32 -1.442695, %v2998_v62 }
0x2d00   : > { %4353 = vpow2.f32 %v4055_v63 }
0x2d06   : > { %v4354_v5 = vpop.eup %4353 }
0x2d07   : > { %v3002_v6 = vadd.f32 1.0, %v4354_v5 }
0x2d09   : > { %4355 = vrcp.f32 %v3002_v6  ;;  %v3014_v30 = vand.u32 2147483648, %v3002_v6  ;;  %vm3008_vm4 = vweird.f32 %v3002_v6  ;;  %v3012_v22 = vand.u32 2147483647, %v3002_v6 }
0x2d0b   : > { %v3015_v45 = vor.u32 1.1754944e-38, %v3014_v30  ;;  %vm3013_vm8 = vcmp.eq.f32.partialorder %v3012_v22, 8.507059e+37 }
0x2d0f   : > { %v4356_v14 = vpop.eup %4355 }
0x2d10   : > { %v3004_v4 = vmul.f32 %v4356_v14, %v3002_v6  ;;  %vm3009_vm3 = vweird.f32 %v4356_v14 }
0x2d11   : > { %vm3010_vm7 = vmor %vm3008_vm4, %vm3009_vm3  ;;  %vm1896_vm3 = vcmask 259076   ;;  %vm3250_vm4 = vcmask 7168  }
0x2d12   : > { %v3005_v3 = vsub.f32 1.0, %v3004_v4 }
0x2d14   : > { %v3006_v54 = vmul.f32 %v4356_v14, %v3005_v3 }
0x2d16   : > { %v3007_v19 = vadd.f32 %v4356_v14, %v3006_v54 }
0x2d18   : > { %v3011_v26 = vsel %vm3010_vm7, %v4356_v14, %v3007_v19  ;;  %vm3257_vm7 = vcmask 1024  }
0x2d19   : > { %v3016_v44 = vsel %vm3013_vm8, %v3015_v45, %v3011_v26 }
0x2d1a   : > { %v3028_v24 = vsub.f32 1.0, %v3016_v44  ;;  %v3036_v36 = vmul.f32 %v3034_v33, %v3016_v44 }
0x2d6e   : > { %v3019_v58 = vpop.permute.xlu0 %3018 }
0x2d6f   : > { %v3021_v10 = vmul.f32 %v3019_v58, %v3016_v44 }
0x2d71   : > { %3023 = vrot.lane.b32.xlu2 %v3021_v10, %s4473_s4 }
0x2dcb   : > { %v3024_v28 = vpop.permute.xlu2 %3023 }
0x2dcc   : > { %v3026_v1 = vadd.f32 %v3024_v28, %v5275_v13 }
0x2dce   : > { %4357 = vtanh.f32 %v3026_v1 }
0x2dd4   : > { %v4358_v8 = vpop.eup %4357 }
0x2dd5   : > { %3030 = vrot.lane.b32.xlu1 %v4358_v8, %s4474_s8 }
0x2e47   : > { %v3031_v9 = vpop.permute.xlu1 %3030 }
0x2e48   : > { %v3033_v37 = vmul.f32 %v3031_v9, %v3028_v24 }
0x2e4a   : > { %v5552_v12 = vadd.f32 %v3036_v36, %v3033_v37 }
0x2e4c   : > { %v3043_v38 = vrot.slane %v5552_v12, 4  ;;  %v3107_v5 = vrot.slane %v5552_v12, 6 }
0x2e4e   : > { %3044 = vrot.lane.b32.xlu0 %v3043_v38, %s4474_s8 }
0x2ec0   : > { %v3045_v39 = vpop.permute.xlu0 %3044 }
0x2ec1   : > { %4056 = vmatmul.msk.f32.vlgmr.msrb.gmra.mxu3 %vm1684_vm6, %v3045_v39 }
0x2f44   : > { %v3065_v40 = vpop.f32.mrf.mxu3 }
0x2f45   : > { %v3066_v60 = vadd.f32 %v5463_v32, %v3065_v40 }
0x2f47   : > { %v3069_v11 = vrot.slane %v3066_v60, 2 }
0x2f49   : > { %3091 = vrot.lane.b32.xlu2 %v3069_v11, %s4473_s4  ;;  %v3071_v34 = vadd.f32 %v3069_v11, %v5275_v13 }
0x2f4b   : > { %v4057_v42 = vmul.f32 -1.442695, %v3071_v34 }
0x2f4d   : > { %4359 = vpow2.f32 %v4057_v42 }
0x2f53   : > { %v4360_v16 = vpop.eup %4359 }
0x2f54   : > { %v3075_v47 = vadd.f32 1.0, %v4360_v16  ;;  %v5633_v16 = vld [vmem:[%s5866_s2 + $0x130] sm:$0xff] }
0x2f56   : > { %4361 = vrcp.f32 %v3075_v47  ;;  %v3087_v2 = vand.u32 2147483648, %v3075_v47  ;;  %vm3081_vm10 = vweird.f32 %v3075_v47  ;;  %v3085_v57 = vand.u32 2147483647, %v3075_v47 }
0x2f58   : > { %v3088_v20 = vor.u32 1.1754944e-38, %v3087_v2  ;;  %vm3086_vm12 = vcmp.eq.f32.partialorder %v3085_v57, 8.507059e+37 }
0x2f5c   : > { %v4362_v59 = vpop.eup %4361 }
0x2f5d   : > { %v3077_v50 = vmul.f32 %v4362_v59, %v3075_v47  ;;  %vm3082_vm9 = vweird.f32 %v4362_v59 }
0x2f5e   : > { %vm3083_vm11 = vmor %vm3081_vm10, %vm3082_vm9 }
0x2f5f   : > { %v3078_v17 = vsub.f32 1.0, %v3077_v50 }
0x2f61   : > { %v3079_v23 = vmul.f32 %v4362_v59, %v3078_v17 }
0x2f63   : > { %v3080_v51 = vadd.f32 %v4362_v59, %v3079_v23 }
0x2f65   : > { %v3084_v0 = vsel %vm3083_vm11, %v4362_v59, %v3080_v51  ;;  %v4060_v59 = vadd.f32 -1.0, %v5633_v16 }
0x2f66   : > { %v3089_v55 = vsel %vm3086_vm12, %v3088_v20, %v3084_v0 }
0x2f67   : > { %v3101_v63 = vsub.f32 1.0, %v3089_v55  ;;  %v3109_v14 = vmul.f32 %v3107_v5, %v3089_v55  ;;  %v5639_v50 = vmul.f32 1e+30, %v4060_v59 }
0x2fa3   : > { %v3092_v52 = vpop.permute.xlu2 %3091 }
0x2fa4   : > { %v3094_v41 = vmul.f32 %v3092_v52, %v3089_v55 }
0x2fa6   : > { %3096 = vrot.lane.b32.xlu1 %v3094_v41, %s4473_s4 }
0x3018   : > { %v3097_v18 = vpop.permute.xlu1 %3096 }
0x3019   : > { %v3099_v29 = vadd.f32 %v3097_v18, %v5275_v13 }
0x301b   : > { %4363 = vtanh.f32 %v3099_v29 }
0x3021   : > { %v4364_v62 = vpop.eup %4363 }
0x3022   : > { %3103 = vrot.lane.b32.xlu0 %v4364_v62, %s4474_s8  ;;  %v5665_v62 = vld [vmem:[%s5866_s2 + $0x158] sm:$0x3] }
0x3094   : > { %v3104_v6 = vpop.permute.xlu0 %3103 }
0x3095   : > { %v3106_v4 = vmul.f32 %v3104_v6, %v3101_v63  ;;  %v4065_v63 = vadd.f32 -1.0, %v5665_v62 }
0x3097   : > { %v5564_v3 = vadd.f32 %v3109_v14, %v3106_v4  ;;  %v5668_v5 = vmul.f32 1e+30, %v4065_v63 }
0x3099   : > { %v3116_v54 = vrot.slane %v5564_v3, 6 }
0x309b   : > { %3117 = vrot.lane.b32.xlu2 %v3116_v54, %s4474_s8 }
0x30a3   : > { %1967 = vrot.lane.b32.xlu2 %v5327_v53, %s4474_s8  ;;  %v4404_v53 = vld [vmem:[%s5866_s2 + $0x3] ss:$0 sm:$0xff] }
0x30ab   : > { %2254 = vrot.lane.b32.xlu2 %v5387_v15, %s4474_s8  ;;  %v1676_v15 = vadd.f32 %v4404_v53, %v5318_v46 }
0x30f5   : > { %v3118_v13 = vpop.permute.xlu2 %3117 }
0x30f6   : > { %4058 = vmatmul.msk.f32.vlgmr.msra.gmra.mxu0 %vm1684_vm6, %v3118_v13  ;;  %v5679_v13 = vld [vmem:[%s5866_s2 + $0x138] sm:$0xff] }
0x30fd   : > { %v1968_v19 = vpop.permute.xlu2 %1967 }
0x30fe   : > { %1971 = vst.msk [vmem:[#allocation2] sm:$0xc0] %vm1970_vm13, %v1968_v19 }
0x3105   : > { %v2255_v30 = vpop.permute.xlu2 %2254 }
0x3106   : > { %2257 = vst.msk [vmem:[#allocation2 + $0x8] sm:$0xc0] %vm1970_vm13, %v2255_v30  ;;  %v4061_v30 = vadd.f32 -1.0, %v5679_v13 }
0x3173   : > { %v3138_v22 = vpop.f32.mrf.mxu0 }
0x3174   : > { %v3139_v26 = vadd.f32 %v5463_v32, %v3138_v22  ;;  %v3239_v22 = vmul.f32 1e+30, %v4061_v30 }
0x3176   : > { %3162 = vrot.lane.b32.xlu1 %v3139_v26, %s4473_s4  ;;  %v3141_v32 = vadd.f32 %v3139_v26, %v1676_v15  ;;  %v5686_v26 = vld [vmem:[%s5866_s2 + $0x140] sm:$0xff] }
0x317e   : > { %1819 = vrot.lane.b32.xlu1 %v5293_v43, %s4474_s8  ;;  %v4059_v43 = vmul.f32 -1.442695, %v3141_v32 }
0x3180   : > { %4365 = vpow2.f32 %v4059_v43  ;;  %v5703_v43 = vld [vmem:[%s5866_s2 + $0x150] sm:$0xff] }
0x3186   : > { %2108 = vrot.lane.b32.xlu1 %v5355_v56, %s4474_s8  ;;  %v4366_v45 = vpop.eup %4365 }
0x3187   : > { %v3145_v56 = vadd.f32 1.0, %v4366_v45 }
0x3189   : > { %4367 = vrcp.f32 %v3145_v56  ;;  %v3157_v28 = vand.u32 2147483648, %v3145_v56  ;;  %vm3151_vm15 = vweird.f32 %v3145_v56 }
0x318b   : > { %v3158_v8 = vor.u32 1.1754944e-38, %v3157_v28 }
0x318e   : > { %2966 = vrot.lane.b32.xlu1 %v5540_v49, %s4474_s8 }
0x318f   : > { %v4368_v58 = vpop.eup %4367 }
0x3190   : > { %v3147_v49 = vmul.f32 %v4368_v58, %v3145_v56  ;;  %vm3152_vm14 = vweird.f32 %v4368_v58 }
0x3191   : > { %vm3153_vm1 = vmor %vm3151_vm15, %vm3152_vm14  ;;  %vm3568_vm15 = vcmask 1040384  }
0x3192   : > { %v3148_v44 = vsub.f32 1.0, %v3147_v49  ;;  %v4064_v49 = vadd.f32 -1.0, %v5703_v43 }
0x3194   : > { %v3149_v10 = vmul.f32 %v4368_v58, %v3148_v44  ;;  %v3242_v44 = vmul.f32 1e+30, %v4064_v49 }
0x3196   : > { %2540 = vrot.lane.b32.xlu1 %v5472_v61, %s4474_s8  ;;  %v3150_v61 = vadd.f32 %v4368_v58, %v3149_v10  ;;  %v4223_v10 = vld [vmem:[%s5866_s2 + $0x6] ss:$0 sm:$0xff] }
0x3198   : > { %v3154_v1 = vsel %vm3153_vm1, %v4368_v58, %v3150_v61 }
0x319e   : > { %2826 = vrot.lane.b32.xlu1 %v5520_v7, %s4474_s8  ;;  %v3155_v7 = vand.u32 2147483647, %v3145_v56 }
0x31a0   : > { %vm3156_vm0 = vcmp.eq.f32.partialorder %v3155_v7, 8.507059e+37 }
0x31a1   : > { %v5593_v24 = vsel %vm3156_vm0, %v3158_v8, %v3154_v1 }
0x31a2   : > { %v3172_v6 = vsub.f32 1.0, %v5593_v24  ;;  %v3179_v4 = vmul.f32 %v5593_v24, %v3116_v54  ;;  %v5693_v54 = vld [vmem:[%s5866_s2 + $0x148] sm:$0xff] }
0x31e8   : > { %v3163_v46 = vpop.permute.xlu1 %3162 }
0x31e9   : > { %v3165_v33 = vmul.f32 %v3163_v46, %v5593_v24 }
0x31eb   : > { %3167 = vrot.lane.b32.xlu0 %v3165_v33, %s4473_s4 }
0x31f0   : > { %v1820_v9 = vpop.permute.xlu1 %1819 }
0x31f1   : > { %1823 = vst.msk [vmem:[#allocation2] sm:$0xc] %vm1822_vm2, %v1820_v9 }
0x31f3   : > { %1893 = vrot.lane.b32.xlu0 %v5309_v25, %s4474_s8 }
0x31f8   : > { %v2109_v36 = vpop.permute.xlu1 %2108 }
0x31f9   : > { %2111 = vst.msk [vmem:[#allocation2 + $0x8] sm:$0xc] %vm1822_vm2, %v2109_v36 }
0x31fb   : > { %2181 = vrot.lane.b32.xlu0 %v5371_v35, %s4474_s8 }
0x3200   : > { %v2967_v37 = vpop.permute.xlu1 %2966 }
0x3201   : > { %2969 = vst.msk [vmem:[#allocation2 + $0x20] sm:$0xc] %vm1822_vm2, %v2967_v37 }
0x3203   : > { %3039 = vrot.lane.b32.xlu0 %v5552_v12, %s4474_s8 }
0x3208   : > { %v2541_v38 = vpop.permute.xlu1 %2540 }
0x3209   : > { %2543 = vst.msk [vmem:[#allocation2 + $0x10] sm:$0xc0] %vm1970_vm13, %v2541_v38 }
0x320b   : > { %2394 = vrot.lane.b32.xlu0 %v5435_v21, %s4474_s8  ;;  %v5617_v21 = vld [vmem:[%s5866_s2 + $0x5] ss:$0 sm:$0xff] }
0x3210   : > { %v2827_v39 = vpop.permute.xlu1 %2826 }
0x3211   : > { %2829 = vst.msk [vmem:[#allocation2 + $0x18] sm:$0xc0] %vm1970_vm13, %v2827_v39 }
0x3213   : > { %2680 = vrot.lane.b32.xlu0 %v5496_v27, %s4474_s8 }
0x325d   : > { %v3168_v25 = vpop.permute.xlu0 %3167 }
0x325e   : > { %v3170_v35 = vadd.f32 %v3168_v25, %v1676_v15  ;;  %v4063_v15 = vadd.f32 -1.0, %v5693_v54 }
0x3260   : > { %4369 = vtanh.f32 %v3170_v35  ;;  %v3241_v32 = vmul.f32 1e+30, %v4063_v15 }
0x3265   : > { %v1894_v40 = vpop.permute.xlu0 %1893 }
0x3266   : > { %v4370_v60 = vpop.eup %4369  ;;  %1897 = vst.msk [vmem:[#allocation2] sm:$0x30] %vm1896_vm3, %v1894_v40 }
0x3267   : > { %3174 = vrot.lane.b32.xlu2 %v4370_v60, %s4474_s8 }
0x326d   : > { %v2182_v12 = vpop.permute.xlu0 %2181  ;;  %v5619_v11 = vld [vmem:[#allocation2] sm:$0xff] }
0x326e   : > { %2184 = vst.msk [vmem:[#allocation2 + $0x8] sm:$0x30] %vm1896_vm3, %v2182_v12  ;;  %v3195_v27 = vmul.f32 %v5617_v21, %v5619_v11 }
0x326f   : > { %3112 = vrot.lane.b32.xlu2 %v5564_v3, %s4474_s8  ;;  %v4062_v3 = vadd.f32 -1.0, %v5686_v26 }
0x3270   : > { %v3201_v34 = vsel %vm1684_vm6, %v3195_v27, 0.0 }
0x3271   : > { %3202 = vadd.xlane.f32.xlu0 %v3201_v34  ;;  %v3240_v53 = vmul.f32 1e+30, %v4062_v3 }
0x3275   : > { %v3040_v42 = vpop.permute.xlu0 %3039 }
0x3276   : > { %3042 = vst.msk [vmem:[#allocation2 + $0x20] sm:$0x30] %vm1896_vm3, %v3040_v42 }
0x3277   : > { %2467 = vrot.lane.b32.xlu2 %v5451_v48, %s4474_s8  ;;  %v5644_v48 = vld [vmem:[#allocation2 + $0x8] sm:$0xff] }
0x3278   : > { %v3196_v23 = vmul.f32 %v5617_v21, %v5644_v48 }
0x327a   : > { %v3204_v51 = vsel %vm1684_vm6, %v3196_v23, 0.0 }
0x327d   : > { %v2395_v47 = vpop.permute.xlu0 %2394 }
0x327e   : > { %2397 = vst.msk [vmem:[#allocation2 + $0x10] sm:$0xc] %vm1822_vm2, %v2395_v47 }
0x327f   : > { %2753 = vrot.lane.b32.xlu2 %v5508_v31, %s4474_s8 }
0x3285   : > { %v2681_v17 = vpop.permute.xlu0 %2680  ;;  %3389 = vrot.lane.b32.xlu0 %v5639_v50, %s4475_s6 }
0x3286   : > { %2683 = vst.msk [vmem:[#allocation2 + $0x18] sm:$0xc] %vm1822_vm2, %v2681_v17 }
0x328d   : > { %3399 = vrot.lane.b32.xlu0 %v5668_v5, %s4475_s6 }
0x3295   : > { %3395 = vrot.lane.b32.xlu0 %v3241_v32, %s4475_s6 }
0x32a8   : > { %3205 = vadd.xlane.f32.xlu2 %v3204_v51 }
0x32c1   : > { %v3175_v2 = vpop.permute.xlu2 %3174 }
0x32c2   : > { %v3177_v14 = vmul.f32 %v3175_v2, %v3172_v6 }
0x32c4   : > { %v3180_v19 = vadd.f32 %v3179_v4, %v3177_v14 }
0x32c9   : > { %v3113_v57 = vpop.permute.xlu2 %3112 }
0x32ca   : > { %3115 = vst.msk [vmem:[#allocation2 + $0x20] sm:$0xc0] %vm1970_vm13, %v3113_v57 }
0x32d1   : > { %v2468_v31 = vpop.permute.xlu2 %2467  ;;  %v5650_v0 = vld [vmem:[#allocation2 + $0x20] sm:$0xff] }
0x32d2   : > { %2470 = vst.msk [vmem:[#allocation2 + $0x10] sm:$0x30] %vm1896_vm3, %v2468_v31  ;;  %v3199_v20 = vmul.f32 %v5617_v21, %v5650_v0 }
0x32d4   : > { %v3213_v52 = vsel %vm1684_vm6, %v3199_v20, 0.0 }
0x32d5   : > { %3214 = vadd.xlane.f32.xlu1 %v3213_v52 }
0x32d9   : > { %v2754_v55 = vpop.permute.xlu2 %2753  ;;  %v5656_v41 = vld [vmem:[#allocation2 + $0x10] sm:$0xff] }
0x32da   : > { %2756 = vst.msk [vmem:[#allocation2 + $0x18] sm:$0x30] %vm1896_vm3, %v2754_v55  ;;  %v3197_v18 = vmul.f32 %v5617_v21, %v5656_v41 }
0x32dc   : > { %v3207_v29 = vsel %vm1684_vm6, %v3197_v18, 0.0 }
0x32dd   : > { %3208 = vadd.xlane.f32.xlu2 %v3207_v29 }
0x32e1   : > { %v5707_v45 = vld [vmem:[#allocation2 + $0x18] sm:$0xff] }
0x32e2   : > { %v3198_v56 = vmul.f32 %v5617_v21, %v5707_v45 }
0x32e4   : > { %v3210_v58 = vsel %vm1684_vm6, %v3198_v56, 0.0  ;;  %v3203_v33 = vpop.xlane.xlu0 %3202 }
0x32e5   : > { %v3220_v40 = vadd.f32 %v4223_v10, %v3203_v33 }
0x32e7   : > { %v5736_v42 = vadd.f32 %v5639_v50, %v3220_v40 }
0x32e9   : > { %v3251_v63 = vsel %vm3250_vm4, %v5736_v42, -inf }
0x32ee   : > { %3182 = vrot.lane.b32.xlu1 %v3180_v19, %s4474_s8 }
0x32f5   : > { %3391 = vrot.lane.b32.xlu2 %v3239_v22, %s4475_s6 }
0x32f7   : > { %v3390_v36 = vpop.permute.xlu0 %3389 }
0x32f8   : > { %v3407_v47 = vadd.f32 %v3390_v36, %v3220_v40 }
0x32fa   : > { %v3413_v6 = vsel %vm3250_vm4, %v3407_v47, -inf }
0x32fd   : > { %3393 = vrot.lane.b32.xlu2 %v3240_v53, %s4475_s6 }
0x32ff   : > { %v3400_v38 = vpop.permute.xlu0 %3399 }
0x3305   : > { %3456 = vrot.lane.b32.xlu2 %v5679_v13, %s4475_s6 }
0x3307   : > { %v3396_v35 = vpop.permute.xlu0 %3395 }
0x330d   : > { %3462 = vrot.lane.b32.xlu2 %v5703_v43, %s4475_s6 }
0x3318   : > { %3211 = vadd.xlane.f32.xlu1 %v3210_v58 }
0x331b   : > { %v3206_v9 = vpop.xlane.xlu2 %3205 }
0x331c   : > { %v3221_v60 = vadd.f32 %v4223_v10, %v3206_v9 }
0x331e   : > { %v5738_v59 = vadd.f32 %v3239_v22, %v3221_v60 }
0x3320   : > { %v3252_v14 = vsel %vm3250_vm4, %v5738_v59, -inf }
0x3331   : > { %3397 = vrot.lane.b32.xlu1 %v3242_v44, %s4475_s6 }
0x3339   : > { %3454 = vrot.lane.b32.xlu1 %v5633_v16, %s4475_s6 }
0x3341   : > { %3460 = vrot.lane.b32.xlu1 %v5693_v54, %s4475_s6 }
0x3348   : > { %v3215_v61 = vpop.xlane.xlu1 %3214 }
0x3349   : > { %v3224_v28 = vadd.f32 %v4223_v10, %v3215_v61 }
0x334b   : > { %v5721_v7 = vadd.f32 %v3242_v44, %v3224_v28 }
0x334d   : > { %v3255_v20 = vsel %vm3250_vm4, %v5721_v7, -inf }
0x334e   : > { %v3256_v3 = vmax.f32 %v3251_v63, %v3255_v20 }
0x3350   : > { %v3209_v37 = vpop.xlane.xlu2 %3208 }
0x3351   : > { %v3222_v27 = vadd.f32 %v4223_v10, %v3209_v37 }
0x3353   : > { %v5744_v52 = vadd.f32 %v3240_v53, %v3222_v27 }
0x3355   : > { %v3253_v56 = vsel %vm3250_vm4, %v5744_v52, -inf }
0x3358   : > { %v3392_v25 = vpop.permute.xlu2 %3391 }
0x3359   : > { %v3408_v17 = vadd.f32 %v3392_v25, %v3221_v60 }
0x335b   : > { %v3414_v4 = vsel %vm3250_vm4, %v3408_v17, -inf }
0x3360   : > { %v3183_v1 = vpop.permute.xlu1 %3182  ;;  %v3394_v23 = vpop.permute.xlu2 %3393 }
0x3361   : > { %3185 = vst.msk [vmem:[#allocation2 + $0x28] sm:$0x3] %vm1751_vm5, %v3183_v1  ;;  %v3409_v55 = vadd.f32 %v3394_v23, %v3222_v27 }
0x3363   : > { %v3415_v58 = vsel %vm3250_vm4, %v3409_v55, -inf }
0x3368   : > { %v5724_v8 = vld [vmem:[#allocation2 + $0x28] sm:$0x3] }
0x3369   : > { %v3200_v46 = vmul.f32 %v5617_v21, %v5724_v8 }
0x336b   : > { %v3216_v24 = vsel %vm1751_vm5, %v3200_v46, 0.0 }
0x336c   : > { %3217 = vadd.xlane.f32.xlu0 %v3216_v24 }
0x3380   : > { %3458 = vrot.lane.b32.xlu0 %v5686_v26, %s4475_s6 }
0x3388   : > { %3464 = vrot.lane.b32.xlu0 %v5665_v62, %s4475_s6  ;;  %s4076_s6 = sshll.u32 %s4517_s16, 1 }
0x3389   : > { %s3617_s11 = scalar_lea.hbm %s5867_s3, %s4076_s6 }
0x338a   : > { %s3621_s8 = sshll.u32 %s3617_s11, 4  ;;  %s3622_s8 = int_to_ptr.hbm [resolvable:$true] %s3621_s8 }
0x338b   : > { %v3212_v39 = vpop.xlane.xlu1 %3211  ;;  %s4419_s16 = sshra.s32 %s3622_s8, 4  ;;  %s4420_s16 = int_to_ptr.hbm [resolvable:$true] %s4419_s16 }
0x338c   : > { %v3223_v12 = vadd.f32 %v4223_v10, %v3212_v39  ;;  %s4421_s26 = scalar_lea.hbm %s4420_s16, 2  ;;  %p4426_p0 = scmp.lt.s32.totalorder %s4420_s16, %s5867_s3 }
0x338d   : > { %p4422_p11 = scmp.ne.s32.totalorder %s4420_s16, %s4421_s26  ;;  %p4427_p1 = scmp.lt.s32.totalorder %s4425_s29, %s4421_s26 }
0x338e   : > { %v5740_v2 = vadd.f32 %v3241_v32, %v3223_v12  ;;  %v3410_v57 = vadd.f32 %v3396_v35, %v3223_v12 }
0x338f   : > { %p4423_p12 = pnand %p4422_p11, %p4534_p5  ;;  %p4428_p2 = por %p4427_p1, %p4426_p0 }
0x3390   : > { %v3254_v19 = vsel %vm3250_vm4, %v5740_v2, -inf  ;;  %v3416_v30 = vsel %vm3250_vm4, %v3410_v57, -inf }
0x3391   : > { %v3261_v49 = vmax.f32 %v3253_v56, %v3254_v19  ;;  %v3422_v44 = vmax.f32 %v3415_v58, %v3416_v30  ;;  %p4424_p13 = pneg %p4423_p12 }
0x3393   : > { %p4429_p3 = pnand %p4428_p2, %p4424_p13 }
0x33a3   : > { %v3398_v21 = vpop.permute.xlu1 %3397 }
0x33a4   : > { %v5733_v34 = vadd.f32 %v3398_v21, %v3224_v28 }
0x33a6   : > { %v3417_v50 = vsel %vm3250_vm4, %v5733_v34, -inf }
0x33a7   : > { %v3418_v53 = vmax.f32 %v3413_v6, %v3417_v50 }
0x33df   : > { %v3218_v51 = vpop.xlane.xlu0 %3217 }
0x33e0   : > { %v3225_v31 = vadd.f32 %v4223_v10, %v3218_v51 }
0x33e2   : > { %v5749_v18 = vadd.f32 %v5668_v5, %v3225_v31  ;;  %v3412_v29 = vadd.f32 %v3400_v38, %v3225_v31 }
0x33e4   : > { %v3258_v5 = vsel %vm3257_vm7, %v5749_v18, -inf  ;;  %v3419_v22 = vsel %vm3257_vm7, %v3412_v29, -inf }
0x33e5   : > { %v3259_v15 = vmax.f32 %v3252_v14, %v3258_v5  ;;  %v3420_v32 = vmax.f32 %v3414_v4, %v3419_v22  ;;  %v3455_v14 = vpop.permute.xlu1 %3454 }
0x33e7   : > { %v3260_v10 = vmax.f32 %v3256_v3, %v3259_v15  ;;  %v3421_v61 = vmax.f32 %v3418_v53, %v3420_v32 }
0x33e9   : > { %v3262_v28 = vmax.f32 %v3260_v10, %v3261_v49  ;;  %v3423_v1 = vmax.f32 %v3421_v61, %v3422_v44 }
0x33eb   : > { %v3263_v46 = vrot.slane %v3262_v28, 4  ;;  %v3424_v24 = vrot.slane %v3423_v1, 4 }
0x33ed   : > { %v3264_v33 = vmax.f32 %v3262_v28, %v3263_v46  ;;  %v3425_v9 = vmax.f32 %v3423_v1, %v3424_v24 }
0x33ef   : > { %v3265_v36 = vrot.slane %v3264_v33, 2  ;;  %v3426_v37 = vrot.slane %v3425_v9, 2 }
0x33f1   : > { %v3266_v38 = vmax.f32 %v3264_v33, %v3265_v36  ;;  %v3427_v39 = vmax.f32 %v3425_v9, %v3426_v37 }
0x33f3   : > { %v3267_v25 = vrot.slane %v3266_v38, 1  ;;  %v3428_v35 = vrot.slane %v3427_v39, 1 }
0x33f5   : > { %v3268_v40 = vmax.f32 %v3266_v38, %v3267_v25  ;;  %v3429_v60 = vmax.f32 %v3427_v39, %v3428_v35 }
0x33f7   : > { %v3435_v21 = vsub.f32 %v3412_v29, %v3429_v60  ;;  %v3432_v12 = vsub.f32 %v3409_v55, %v3429_v60  ;;  %v3430_v27 = vsub.f32 %v3407_v47, %v3429_v60  ;;  %v3431_v23 = vsub.f32 %v3408_v17, %v3429_v60  ;;  %v3457_v47 = vpop.permute.xlu2 %3456  ;;  %v3459_v29 = vpop.permute.xlu0 %3458 }
0x33f8   : > { %v3433_v51 = vsub.f32 %v3410_v57, %v3429_v60  ;;  %v3270_v31 = vsub.f32 %v5738_v59, %v3268_v40  ;;  %v3434_v63 = vsub.f32 %v5733_v34, %v3429_v60  ;;  %v3269_v19 = vsub.f32 %v5736_v42, %v3268_v40 }
0x33f9   : > { %v3446_v20 = vmul.f32 1.442695, %v3435_v21  ;;  %v3440_v50 = vmul.f32 1.442695, %v3432_v12  ;;  %v3436_v6 = vmul.f32 1.442695, %v3430_v27  ;;  %v3271_v5 = vsub.f32 %v5744_v52, %v3268_v40 }
0x33fa   : > { %v3438_v4 = vmul.f32 1.442695, %v3431_v23  ;;  %v3442_v30 = vmul.f32 1.442695, %v3433_v51  ;;  %v3273_v55 = vsub.f32 %v5721_v7, %v3268_v40  ;;  %v3444_v17 = vmul.f32 1.442695, %v3434_v63 }
0x33fb   : > { %4371 = vpow2.f32 %v3446_v20  ;;  %v3277_v59 = vmul.f32 1.442695, %v3270_v31  ;;  %v3272_v57 = vsub.f32 %v5740_v2, %v3268_v40  ;;  %v3274_v34 = vsub.f32 %v5749_v18, %v3268_v40  ;;  %v3461_v2 = vpop.permute.xlu1 %3460 }
0x33fc   : > { %4373 = vpow2.f32 %v3440_v50  ;;  %v3275_v22 = vmul.f32 1.442695, %v3269_v19  ;;  %v3279_v42 = vmul.f32 1.442695, %v3271_v5  ;;  %v3283_v3 = vmul.f32 1.442695, %v3273_v55 }
0x33fd   : > { %4375 = vpow2.f32 %v3436_v6  ;;  %v3281_v52 = vmul.f32 1.442695, %v3272_v57  ;;  %v3285_v15 = vmul.f32 1.442695, %v3274_v34 }
0x33fe   : > { %4377 = vpow2.f32 %v3438_v4 }
0x33ff   : > { %4379 = vpow2.f32 %v3442_v30  ;;  %v3463_v28 = vpop.permute.xlu2 %3462  ;;  %v3465_v36 = vpop.permute.xlu0 %3464 }
0x3400   : > { %4381 = vpow2.f32 %v3444_v17 }
0x3401   : > { %v4372_v53 = vpop.eup %4371  ;;  %4383 = vpow2.f32 %v3277_v59 }
0x3402   : > { %v4374_v7 = vpop.eup %4373  ;;  %4385 = vpow2.f32 %v3275_v22  ;;  %v3477_v23 = vmul.f32 %v4372_v53, %v3465_v36 }
0x3403   : > { %v4376_v32 = vpop.eup %4375  ;;  %4387 = vpow2.f32 %v3279_v42  ;;  %v3474_v49 = vmul.f32 %v4374_v7, %v3459_v29 }
0x3404   : > { %v4378_v56 = vpop.eup %4377  ;;  %v3472_v58 = vmul.f32 %v4376_v32, %v3455_v14  ;;  %4389 = vpow2.f32 %v3283_v3  ;;  %v3487_v19 = vsel %vm3257_vm7, %v3477_v23, 0.0 }
0x3405   : > { %v4380_v18 = vpop.eup %4379  ;;  %v3473_v44 = vmul.f32 %v4378_v56, %v3457_v47  ;;  %4391 = vpow2.f32 %v3281_v52  ;;  %v3481_v39 = vsel %vm3250_vm4, %v3474_v49, 0.0 }
0x3406   : > { %v4382_v10 = vpop.eup %4381  ;;  %4393 = vpow2.f32 %v3285_v15  ;;  %v3478_v61 = vsel %vm3250_vm4, %v3472_v58, 0.0  ;;  %3497 = vperm.xlu0 %4208, %v3472_v58   ;;  %v3475_v24 = vmul.f32 %v4380_v18, %v3461_v2 }
0x3407   : > { %v4384_v1 = vpop.eup %4383  ;;  %v3479_v46 = vsel %vm3250_vm4, %v3473_v44, 0.0  ;;  %v3476_v25 = vmul.f32 %v4382_v10, %v3463_v28 }
0x3408   : > { %v4386_v33 = vpop.eup %4385  ;;  %v3480_v9 = vadd.f32 %v3479_v46, %v3478_v61  ;;  %v3288_v37 = vmul.f32 %v4384_v1, %v5679_v13  ;;  %v3483_v51 = vsel %vm3250_vm4, %v3475_v24, 0.0 }
0x3409   : > { %v4388_v38 = vpop.eup %4387  ;;  %v3287_v35 = vmul.f32 %v4386_v33, %v5633_v16  ;;  %v3485_v16 = vsel %vm3250_vm4, %v3476_v25, 0.0 }
0x340a   : > { %v4390_v40 = vpop.eup %4389  ;;  %v3482_v60 = vadd.f32 %v3481_v39, %v3480_v9  ;;  %3317 = vperm.xlu2 %4215, %v3288_v37   ;;  %v3294_v21 = vsel %vm3250_vm4, %v3288_v37, 0.0  ;;  %v3289_v12 = vmul.f32 %v4388_v38, %v5686_v26 }
0x340b   : > { %v4392_v27 = vpop.eup %4391  ;;  %3312 = vperm.xlu1 %4214, %v3287_v35   ;;  %v3293_v13 = vsel %vm3250_vm4, %v3287_v35, 0.0  ;;  %v3291_v14 = vmul.f32 %v4390_v40, %v5703_v43  ;;  %v4160_v40 = vld [vmem:[%s5865_s1 + $0x288] sm:$0xff] }
0x340c   : > { %v4394_v31 = vpop.eup %4393  ;;  %v3484_v20 = vadd.f32 %v3483_v51, %v3482_v60  ;;  %v3295_v50 = vadd.f32 %v3294_v21, %v3293_v13  ;;  %v3290_v63 = vmul.f32 %v4392_v27, %v5693_v54  ;;  %v3296_v6 = vsel %vm3250_vm4, %v3289_v12, 0.0  ;;  %3598 = vmatpush.bf16.msrb.mxu1 %v4160_v40 }
0x340d   : > { %v3292_v5 = vmul.f32 %v4394_v31, %v5665_v62  ;;  %v3300_v17 = vsel %vm3250_vm4, %v3291_v14, 0.0 }
0x340e   : > { %v3486_v4 = vadd.f32 %v3485_v16, %v3484_v20  ;;  %v3297_v26 = vadd.f32 %v3296_v6, %v3295_v50  ;;  %3507 = vperm.xlu0 %4208, %v3474_v49   ;;  %v3298_v30 = vsel %vm3250_vm4, %v3290_v63, 0.0 }
0x340f   : > { %v3302_v59 = vsel %vm3257_vm7, %v3292_v5, 0.0 }
0x3410   : > { %v3488_v55 = vadd.f32 %v3487_v19, %v3486_v4  ;;  %v3299_v47 = vadd.f32 %v3298_v30, %v3297_v26 }
0x3412   : > { %3322 = vperm.xlu2 %4215, %v3289_v12   ;;  %v3301_v54 = vadd.f32 %v3300_v17, %v3299_v47  ;;  %v3489_v57 = vrot.slane %v3488_v55, 4 }
0x3413   : > { %3502 = vperm.xlu1 %4214, %v3473_v44  }
0x3414   : > { %v3303_v43 = vadd.f32 %v3302_v59, %v3301_v54  ;;  %v3490_v29 = vadd.f32 %v3489_v57, %v3488_v55 }
0x3416   : > { %3332 = vperm.xlu0 %4208, %v3291_v14   ;;  %v3304_v34 = vrot.slane %v3303_v43, 4  ;;  %v3491_v3 = vrot.slane %v3490_v29, 2 }
0x3418   : > { %v3305_v22 = vadd.f32 %v3304_v34, %v3303_v43  ;;  %v3492_v7 = vadd.f32 %v3491_v3, %v3490_v29 }
0x341a   : > { %3512 = vperm.xlu2 %4215, %v3475_v24   ;;  %v3306_v42 = vrot.slane %v3305_v22, 2  ;;  %v3493_v15 = vrot.slane %v3492_v7, 1 }
0x341b   : > { %3327 = vperm.xlu1 %4214, %v3290_v63  }
0x341c   : > { %v3307_v62 = vadd.f32 %v3306_v42, %v3305_v22  ;;  %v3494_v32 = vadd.f32 %v3493_v15, %v3492_v7 }
0x341e   : > { %v3308_v53 = vrot.slane %v3307_v62, 1 }
0x3420   : > { %v3309_v52 = vadd.f32 %v3308_v53, %v3307_v62 }
0x3422   : > { %3337 = vperm.xlu2 %4215, %v3292_v5   ;;  %3365 = vperm.xlu0 %4208, %v3309_v52  }
0x3423   : > { %3517 = vperm.xlu1 %4214, %v3476_v25  }
0x342a   : > { %3550 = vperm.xlu2 %4215, %v3494_v32  }
0x342b   : > { %3522 = vperm.xlu1 %4214, %v3477_v23  }
0x3464   : > { %v3318_v56 = vpop.permute.xlu2 %3317 }
0x3465   : > { %v3341_v1 = vmul.f32 %v3318_v56, %v5644_v48 }
0x3467   : > { %v3347_v24 = vsel %vm1684_vm6, %v3341_v1, 0.0 }
0x346c   : > { %v3323_v58 = vpop.permute.xlu2 %3322 }
0x346d   : > { %v3342_v33 = vmul.f32 %v3323_v58, %v5656_v41 }
0x346f   : > { %v3349_v38 = vsel %vm1684_vm6, %v3342_v33, 0.0 }
0x3474   : > { %v3513_v18 = vpop.permute.xlu2 %3512 }
0x3475   : > { %v3528_v19 = vmul.f32 %v3513_v18, %v5707_v45 }
0x3478   : > { %v3498_v2 = vpop.permute.xlu0 %3497 }
0x3479   : > { %v3525_v12 = vmul.f32 %v3498_v2, %v5619_v11 }
0x347b   : > { %v3531_v50 = vsel %vm1684_vm6, %v3525_v12, 0.0 }
0x347c   : > { %v3338_v61 = vpop.permute.xlu2 %3337 }
0x347d   : > { %v3313_v49 = vpop.permute.xlu1 %3312  ;;  %v3345_v27 = vmul.f32 %v3338_v61, %v5724_v8 }
0x347e   : > { %v3340_v10 = vmul.f32 %v3313_v49, %v5619_v11 }
0x347f   : > { %v3355_v11 = vsel %vm1751_vm5, %v3345_v27, 0.0 }
0x3480   : > { %v3508_v44 = vpop.permute.xlu0 %3507  ;;  %v3346_v46 = vsel %vm1684_vm6, %v3340_v10, 0.0 }
0x3481   : > { %v3348_v36 = vadd.f32 %v3347_v24, %v3346_v46  ;;  %v3527_v63 = vmul.f32 %v3508_v44, %v5656_v41  ;;  %v3536_v41 = vsel %vm1684_vm6, %v3528_v19, 0.0 }
0x3483   : > { %v3350_v21 = vadd.f32 %v3349_v38, %v3348_v36  ;;  %v3534_v30 = vsel %vm1684_vm6, %v3527_v63, 0.0 }
0x3484   : > { %v5803_v60 = vpop.permute.xlu2 %3550 }
0x3485   : > { %v3503_v28 = vpop.permute.xlu1 %3502  ;;  %4395 = vrcp.f32 %v5803_v60  ;;  %vm3558_vm11 = vweird.f32 %v5803_v60  ;;  %v3562_v10 = vand.u32 2147483647, %v5803_v60 }
0x3486   : > { %v3526_v39 = vmul.f32 %v3503_v28, %v5644_v48  ;;  %v4159_v48 = vld [vmem:[%s5865_s1 + $0x280] sm:$0xff] }
0x3487   : > { %3599 = vmatpush.bf16.msrb.mxu1 %v4159_v48  ;;  %vm3563_vm14 = vcmp.eq.f32.partialorder %v3562_v10, 8.507059e+37 }
0x3488   : > { %v3333_v9 = vpop.permute.xlu0 %3332  ;;  %v3532_v13 = vsel %vm1684_vm6, %v3526_v39, 0.0 }
0x3489   : > { %v3344_v25 = vmul.f32 %v3333_v9, %v5650_v0  ;;  %v3533_v6 = vadd.f32 %v3532_v13, %v3531_v50 }
0x348b   : > { %v3353_v31 = vsel %vm1684_vm6, %v3344_v25, 0.0  ;;  %v4396_v26 = vpop.eup %4395  ;;  %v3535_v55 = vadd.f32 %v3534_v30, %v3533_v6 }
0x348c   : > { %v3554_v54 = vmul.f32 %v4396_v26, %v5803_v60  ;;  %vm3559_vm9 = vweird.f32 %v4396_v26 }
0x348d   : > { %v3328_v37 = vpop.permute.xlu1 %3327  ;;  %v3537_v34 = vadd.f32 %v3536_v41, %v3535_v55  ;;  %vm3560_vm12 = vmor %vm3558_vm11, %vm3559_vm9 }
0x348e   : > { %v3343_v35 = vmul.f32 %v3328_v37, %v5707_v45  ;;  %v3555_v42 = vsub.f32 1.0, %v3554_v54 }
0x3490   : > { %v3351_v23 = vsel %vm1684_vm6, %v3343_v35, 0.0  ;;  %v3556_v7 = vmul.f32 %v4396_v26, %v3555_v42 }
0x3491   : > { %v3352_v51 = vadd.f32 %v3351_v23, %v3350_v21  ;;  %v4224_v21 = vld [vmem:[%s5866_s2 + $0x7] ss:$0 sm:$0xff] }
0x3492   : > { %v3557_v18 = vadd.f32 %v4396_v26, %v3556_v7 }
0x3493   : > { %v3354_v20 = vadd.f32 %v3353_v31, %v3352_v51 }
0x3494   : > { %v3366_v16 = vpop.permute.xlu0 %3365  ;;  %v3561_v24 = vsel %vm3560_vm12, %v4396_v26, %v3557_v18 }
0x3495   : > { %v3356_v14 = vadd.f32 %v3355_v11, %v3354_v20  ;;  %4397 = vrcp.f32 %v3366_v16  ;;  %v3518_v4 = vpop.permute.xlu1 %3517  ;;  %v3379_v2 = vand.u32 2147483648, %v3366_v16  ;;  %vm3373_vm10 = vweird.f32 %v3366_v16 }
0x3496   : > { %v3529_v5 = vmul.f32 %v3518_v4, %v5650_v0  ;;  %v3377_v49 = vand.u32 2147483647, %v3366_v16 }
0x3497   : > { %v3357_v47 = vrot.slane %v3356_v14, 4  ;;  %v3380_v46 = vor.u32 1.1754944e-38, %v3379_v2 }
0x3498   : > { %v3538_v57 = vsel %vm1684_vm6, %v3529_v5, 0.0  ;;  %vm3378_vm13 = vcmp.eq.f32.partialorder %v3377_v49, 8.507059e+37 }
0x3499   : > { %v3358_v43 = vadd.f32 %v3357_v47, %v3356_v14  ;;  %v3539_v3 = vadd.f32 %v3538_v57, %v3537_v34 }
0x349b   : > { %v4398_v17 = vpop.eup %4397  ;;  %v3359_v62 = vrot.slane %v3358_v43, 2 }
0x349c   : > { %v3369_v59 = vmul.f32 %v4398_v17, %v3366_v16  ;;  %vm3374_vm8 = vweird.f32 %v4398_v17 }
0x349d   : > { %v3523_v29 = vpop.permute.xlu1 %3522  ;;  %v3360_v32 = vadd.f32 %v3359_v62, %v3358_v43 }
0x349e   : > { %v3370_v22 = vsub.f32 1.0, %v3369_v59  ;;  %v3530_v45 = vmul.f32 %v3523_v29, %v5724_v8  ;;  %v3564_v8 = vand.u32 2147483648, %v5803_v60 }
0x349f   : > { %v3361_v61 = vrot.slane %v3360_v32, 1 }
0x34a0   : > { %v3540_v0 = vsel %vm1751_vm5, %v3530_v45, 0.0  ;;  %v3371_v53 = vmul.f32 %v4398_v17, %v3370_v22  ;;  %vm3375_vm5 = vmor %vm3373_vm10, %vm3374_vm8  ;;  %v3565_v9 = vor.u32 1.1754944e-38, %v3564_v8 }
0x34a1   : > { %v3541_v52 = vadd.f32 %v3540_v0, %v3539_v3  ;;  %v3362_v37 = vadd.f32 %v3361_v61, %v3360_v32 }
0x34a2   : > { %v3372_v56 = vadd.f32 %v4398_v17, %v3371_v53  ;;  %v3566_v39 = vsel %vm3563_vm14, %v3565_v9, %v3561_v24 }
0x34a3   : > { %v3542_v15 = vrot.slane %v3541_v52, 4 }
0x34a4   : > { %v3376_v28 = vsel %vm3375_vm5, %v4398_v17, %v3372_v56 }
0x34a5   : > { %v3543_v58 = vadd.f32 %v3542_v15, %v3541_v52  ;;  %v3381_v36 = vsel %vm3378_vm13, %v3380_v46, %v3376_v28 }
0x34a6   : > { %v3382_v25 = vmul.f32 %v3381_v36, %v3362_v37 }
0x34a7   : > { %v3544_v44 = vrot.slane %v3543_v58, 2 }
0x34a9   : > { %v3545_v1 = vadd.f32 %v3544_v44, %v3543_v58 }
0x34ab   : > { %v3546_v33 = vrot.slane %v3545_v1, 1 }
0x34ad   : > { %v3547_v38 = vadd.f32 %v3546_v33, %v3545_v1 }
0x34af   : > { %v3567_v35 = vmul.f32 %v3566_v39, %v3547_v38 }
0x34b1   : > { %v3569_v40 = vsel %vm3568_vm15, %v3382_v25, %v3567_v35 }
0x34b2   : > { %v3575_v60 = vpack.c.bf16 %v3569_v40, %v3569_v40 }
0x34b4   : > { %4074 = vmatmul.msk.bf16.vlgmr.msrb.gmra.mxu1 %vm1684_vm6, %v3575_v60 }
0x3531   : > { %v3601_v12 = vpop.f32.mrf.mxu1 }
0x3532   : > { %v3602_v27 = vadd.f32 %v4224_v21, %v3601_v12 }
0x3534   : > { %3605 = vst [vmem:[%s163_s20] sm:$0x3] %v3602_v27 }
0x3535   : > { %4432 = shalt.err (!%p4429_p3)
}
0x3536   : > { %4162 = dma.vmem_to_hbm [thread:$0]  (%p4534_p5), %s3620_s24, 32, %s3622_s8, %s3607_s25  }
0x3539   : > { %v3603_v23 = vpop.f32.mrf.mxu1 }
0x353a PF: > { %p4168_p4 = scmp.ge.s32.totalorder %s4467_s15, 2  ;;  %s3633_s5 = sand.u32 1, %s4455_s12  }
0x353b   : > { %s3634_s6 = scalar_lea.sflag [#allocation4], %s3633_s5 }
0x353c   : > { %p4165_p7 = pnand %p4168_p4, %p4538_p6 }
0x353e   : > { %p4166_p8 = pneg %p4165_p7 }
0x3540   : > { %4450 = dma.done.wait (%p4166_p8), %s3634_s6, 32  }
0x3541   : > { %4452 = vsyncadd (%p4166_p8), %s3634_s6, 4294967264  ;;  %p13_p9 = scmp.ge.s32.totalorder %s4521_s18, 4   ;;  %s5872_s12 = smov %s4459_s13 }
0x3542   : > { %s5873_s13 = smov %s4463_s14  ;;  %s5874_s14 = smov %s4532_s21 }
0x3543   : > { %s5875_s15 = smov %s4521_s18  ;;  %15 = sbr.rel (!%p13_p9) target bundleno = 3 (0x3), region = 67 }
0x3548   :  { %3640 = vsyncpa [#allocation4], 1 }
0x3549   :  { %3642 = vsyncpa [#allocation4 + $0x1], 1 }

</bundles_post_ra>
